<compile_context>
chip_gen: v6e
topology: v6e:2x2x1
jax: 0.10.0
libtpu: 0.0.40
codegen_flags: <defaults>
</compile_context>

<pallas_src>
import math
import numpy as np

import jax
import jax.numpy as jnp
from jax import lax
from jax.experimental import pallas as pl
from jax.experimental.pallas import tpu as pltpu


# -----------------------------------------------------------------------------
# Helpers
# -----------------------------------------------------------------------------

def _activation_fn(name):
    if name is None or name == "linear":
        return lambda y: y
    if name == "relu":
        return lambda y: jnp.maximum(y, 0.0)
    if name == "tanh":
        return jnp.tanh
    if name in ("swish", "silu"):
        return lambda y: y * jax.nn.sigmoid(y)
    if name == "sigmoid":
        return jax.nn.sigmoid
    raise ValueError(f"unsupported activation: {name!r}")


def _conv_selection_matrices(h_in, w_in, k, s):
    """0/1 matrices sel[j] (P_out, P_in) selecting im2col rows for conv tap j (valid pad)."""
    h_out = (h_in - k) // s + 1
    w_out = (w_in - k) // s + 1
    sel = np.zeros((k * k, h_out * w_out, h_in * w_in), np.float32)
    for kh in range(k):
        for kw in range(k):
            j = kh * k + kw
            for ho in range(h_out):
                for wo in range(w_out):
                    q = (ho * s + kh) * w_in + (wo * s + kw)
                    sel[j, ho * w_out + wo, q] = 1.0
    return sel, h_out, w_out


# -----------------------------------------------------------------------------
# The fused forward kernel (one batch element per grid step)
# -----------------------------------------------------------------------------

def _make_fused_kernel(num_conv, activation, has_eps):
    act = _activation_fn(activation)

    def kernel(*refs):
        # refs = x, (sel, w, b) * num_conv, wfc, bfc, [wfc_eps, eps], out
        x_ref = refs[0]
        conv_refs = refs[1:1 + 3 * num_conv]
        idx = 1 + 3 * num_conv
        wfc_ref, bfc_ref = refs[idx], refs[idx + 1]
        eps_pair = refs[idx + 2:idx + 4] if has_eps else None
        out_ref = refs[-1]

        h = x_ref[...]                                           # (P0, C0) bf16, lane-dense C
        for l in range(num_conv):
            sel_ref, w_ref, b_ref = conv_refs[3 * l:3 * l + 3]
            kk, p_out, _ = sel_ref.shape
            c_out = w_ref.shape[2]
            acc = jnp.zeros((p_out, c_out), jnp.float32)
            for j in range(kk):                                  # sum over conv taps
                g = jnp.dot(sel_ref[j], h,                       # im2col gather on the MXU
                            preferred_element_type=jnp.float32)
                acc = acc + jnp.dot(g.astype(jnp.bfloat16), w_ref[j],
                                    preferred_element_type=jnp.float32)
            h = act(acc + b_ref[...]).astype(jnp.bfloat16)       # f32 epilogue, bf16 hand-off

        # flatten + Linear:  y = sum_p h[p, :] @ Wfc[p]   (Wfc rows pre-permuted at init so
        # this equals Linear(torch.flatten(NCHW)); no runtime transpose needed).
        y = bfc_ref[...]                                         # (1, out_dim) f32
        for p in range(h.shape[0]):
            y = y + jnp.dot(h[p:p + 1, :], wfc_ref[p],
                            preferred_element_type=jnp.float32)
        if has_eps:
            wfce_ref, eps_ref = eps_pair
            y = y + jnp.dot(eps_ref[...], wfce_ref[...],
                            preferred_element_type=jnp.float32)
        out_ref[...] = y.astype(out_ref.dtype)

    return kernel


# -----------------------------------------------------------------------------
# Parameter init (shapes follow CNN.__init__) and forward builder
# -----------------------------------------------------------------------------

def init_cnn_params(key, input_channels, hidden_channels_list, output_dim,
                    kernel_size, stride, image_height, noise_dim=0):
    n = len(hidden_channels_list)
    ks = list(kernel_size) if isinstance(kernel_size, (list, tuple)) else [kernel_size] * n
    ss = list(stride) if isinstance(stride, (list, tuple)) else [stride] * n
    keys = iter(jax.random.split(key, 2 * n + 2))

    conv = []
    prev, h = input_channels, image_height
    for c, k, s in zip(hidden_channels_list, ks, ss):
        fan_in = prev * k * k
        bound = 1.0 / math.sqrt(fan_in)
        # (K*K, Cin, Cout): tap-major layout consumed directly by the fused kernel.
        w = jax.random.uniform(next(keys), (k * k, prev, c), jnp.float32, -bound, bound)
        b = jax.random.uniform(next(keys), (c,), jnp.float32, -bound, bound)
        conv.append((w, b))
        prev = c
        h = (h - k) // s + 1                                     # floor((h - k)/s + 1)

    hw = h * h
    fc_in = prev * hw + noise_dim
    bound = 1.0 / math.sqrt(fc_in)
    # Rows ordered like torch.flatten(NCHW): index = c*hw + p  (noise rows appended).
    w_fc = jax.random.uniform(next(keys), (fc_in, output_dim), jnp.float32, -bound, bound)
    b_fc = jax.random.uniform(next(keys), (output_dim,), jnp.float32, -bound, bound)
    # Pre-permute conv-feature rows to the kernel's position-major flatten order.
    wfc3 = jnp.transpose(w_fc[:prev * hw].reshape(prev, hw, output_dim), (1, 0, 2))
    wfc_eps = w_fc[prev * hw:]                                   # (noise_dim, output_dim)

    # TODO(synk): spectral_norm=True (nn.utils.spectral_norm) is a training-time weight
    # reparameterization and is not implemented (module default spectral_norm=False).
    params = {"conv": conv, "fc": (wfc3, wfc_eps, b_fc), "fc_torch": (w_fc, b_fc)}
    meta = {"kernel_sizes": ks, "strides": ss, "image_height": image_height,
            "input_channels": input_channels, "hidden": list(hidden_channels_list),
            "output_dim": output_dim, "noise_dim": noise_dim}
    return params, meta


def make_cnn_forward(params, meta, activation="relu", output_split_sizes=None):
    ks, ss = meta["kernel_sizes"], meta["strides"]
    out_dim, noise_dim = meta["output_dim"], meta["noise_dim"]
    num_conv = len(meta["hidden"])

    # Constant im2col selection matrices (trace-time numpy; 0/1 is exact in bf16).
    sels = []
    h = w = meta["image_height"]
    for k, s in zip(ks, ss):
        sel, h, w = _conv_selection_matrices(h, w, k, s)
        sels.append(jnp.asarray(sel, jnp.bfloat16))

    # Weights / selectors stored bf16 (halves DMA bytes); biases stay f32 for the epilogue.
    fixed_ops = []
    for (wcv, bcv), sel in zip(params["conv"], sels):
        fixed_ops += [sel, jnp.asarray(wcv, jnp.bfloat16),
                      jnp.asarray(bcv, jnp.float32).reshape(1, -1)]
    wfc3, wfc_eps, b_fc = params["fc"]
    fixed_ops += [jnp.asarray(wfc3, jnp.bfloat16),
                  jnp.asarray(b_fc, jnp.float32).reshape(1, -1)]
    wfc_eps_bf16 = jnp.asarray(wfc_eps, jnp.bfloat16)

    def _full_spec(a):
        nd = a.ndim
        return pl.BlockSpec(a.shape, lambda *_g, _nd=nd: (0,) * _nd)

    def forward(x, eps=None):
        B, C, H, W = x.shape
        has_eps = eps is not None
        # NCHW -> (B, H*W, C): channel-minor (lane-dense) rows.  One tiny XLA transpose of
        # the raw input; everything downstream is inside the single fused kernel.
        xm = jnp.transpose(x, (0, 2, 3, 1)).reshape(B, H * W, C).astype(jnp.bfloat16)

        operands = [xm] + fixed_ops
        in_specs = [pl.BlockSpec((None, H * W, C), lambda b: (b, 0, 0))]
        in_specs += [_full_spec(a) for a in fixed_ops]
        if has_eps:
            eps_b = eps.astype(jnp.bfloat16).reshape(B, 1, noise_dim)
            operands += [wfc_eps_bf16, eps_b]
            in_specs += [_full_spec(wfc_eps_bf16),
                         pl.BlockSpec((None, 1, noise_dim), lambda b: (b, 0, 0))]

        # VMEM budget from the actual (double-buffered) operand footprint.
        footprint = sum(int(a.size) * a.dtype.itemsize for a in operands) + 4 * out_dim
        vmem_bytes = int(min(max(4 * footprint, 8 << 20), 32 << 20))

        out = pl.pallas_call(
            _make_fused_kernel(num_conv, activation, has_eps),
            out_shape=jax.ShapeDtypeStruct((B, 1, out_dim), jnp.float32),
            grid=(B,),
            in_specs=in_specs,
            out_specs=pl.BlockSpec((None, 1, out_dim), lambda b: (b, 0, 0)),
            compiler_params=pltpu.CompilerParams(
                dimension_semantics=("parallel",),   # v7x: one batch element per TensorCore
                vmem_limit_bytes=vmem_bytes,
            ),
        )(*operands)

        out = out.reshape(B, out_dim)
        if output_split_sizes is not None:
            pieces, off = [], 0
            for sz in output_split_sizes:
                pieces.append(out[:, off:off + sz])
                off += sz
            return tuple(pieces)
        return out

    return forward


# -----------------------------------------------------------------------------
# Pure-JAX f32 reference (matches the torch module semantics) for a sanity check
# -----------------------------------------------------------------------------

def _reference_forward(params, meta, x, activation="relu"):
    act = _activation_fn(activation)
    h = x
    for (w, b), k, s in zip(params["conv"], meta["kernel_sizes"], meta["strides"]):
        cin, cout = w.shape[1], w.shape[2]
        w_oihw = jnp.transpose(w.reshape(k, k, cin, cout), (3, 2, 0, 1))
        h = lax.conv_general_dilated(h, w_oihw, (s, s), "VALID",
                                     dimension_numbers=("NCHW", "OIHW", "NCHW"))
        h = act(h + b.reshape(1, cout, 1, 1))
    flat = h.reshape(h.shape[0], -1)                              # torch.flatten(NCHW)
    w_fc, b_fc = params["fc_torch"]
    return flat @ w_fc + b_fc


# -----------------------------------------------------------------------------
# Main
# -----------------------------------------------------------------------------

if __name__ == "__main__":
    INPUT_CHANNELS = 4
    HIDDEN_CHANNELS = [32, 64]
    KERNEL_SIZE = 3
    STRIDE = 2
    IMAGE_HEIGHT = 16
    OUTPUT_DIM = 10
    BATCH = 2

    key = jax.random.PRNGKey(0)
    k_param, k_x = jax.random.split(key)

    params, meta = init_cnn_params(
        k_param, INPUT_CHANNELS, HIDDEN_CHANNELS, OUTPUT_DIM,
        KERNEL_SIZE, STRIDE, IMAGE_HEIGHT, noise_dim=0)

    x = jax.random.normal(k_x, (BATCH, INPUT_CHANNELS, IMAGE_HEIGHT, IMAGE_HEIGHT),
                          jnp.float32)

    forward = jax.jit(make_cnn_forward(params, meta, activation="relu",
                                       output_split_sizes=None))
    out = jax.block_until_ready(forward(x))

    assert out.shape == (BATCH, OUTPUT_DIM), out.shape
    assert bool(jnp.all(jnp.isfinite(out)))

    # Loose tolerance: the kernel feeds the MXU bf16 operands with f32 accumulation.
    ref = _reference_forward(params, meta, x, activation="relu")
    max_err = float(jnp.max(jnp.abs(out - ref)))
    assert jnp.allclose(out, ref, atol=5e-2, rtol=5e-2), max_err

    print("KERNEL_OK")
</pallas_src>

<mosaic_0001>
module attributes {stable_mosaic.version = 11 : i64} {
  func.func @kernel(%arg0: i32, %arg1: memref<1x256x4xbf16, #tpu.memory_space<vmem>>, %arg2: memref<9x49x256xbf16, #tpu.memory_space<vmem>>, %arg3: memref<9x4x32xbf16, #tpu.memory_space<vmem>>, %arg4: memref<1x32xf32, #tpu.memory_space<vmem>>, %arg5: memref<9x9x49xbf16, #tpu.memory_space<vmem>>, %arg6: memref<9x32x64xbf16, #tpu.memory_space<vmem>>, %arg7: memref<1x64xf32, #tpu.memory_space<vmem>>, %arg8: memref<9x64x10xbf16, #tpu.memory_space<vmem>>, %arg9: memref<1x10xf32, #tpu.memory_space<vmem>>, %arg10: memref<1x1x10xf32, #tpu.memory_space<vmem>>) attributes {dimension_semantics = [#tpu.dimension_semantics<parallel>], iteration_bounds = array<i64: 2>, scalar_prefetch = 0 : i64, scratch_operands = 0 : i64, tpu.core_type = #tpu.core_type<tc>, window_params = [{transform_indices = @transform_0, window_bounds = array<i64: 1, 256, 4>}, {pipeline_mode = #tpu.pipeline_mode<synchronous>, transform_indices = @transform_1, window_bounds = array<i64: 9, 49, 256>}, {pipeline_mode = #tpu.pipeline_mode<synchronous>, transform_indices = @transform_2, window_bounds = array<i64: 9, 4, 32>}, {pipeline_mode = #tpu.pipeline_mode<synchronous>, transform_indices = @transform_3, window_bounds = array<i64: 1, 32>}, {pipeline_mode = #tpu.pipeline_mode<synchronous>, transform_indices = @transform_4, window_bounds = array<i64: 9, 9, 49>}, {pipeline_mode = #tpu.pipeline_mode<synchronous>, transform_indices = @transform_5, window_bounds = array<i64: 9, 32, 64>}, {pipeline_mode = #tpu.pipeline_mode<synchronous>, transform_indices = @transform_6, window_bounds = array<i64: 1, 64>}, {pipeline_mode = #tpu.pipeline_mode<synchronous>, transform_indices = @transform_7, window_bounds = array<i64: 9, 64, 10>}, {pipeline_mode = #tpu.pipeline_mode<synchronous>, transform_indices = @transform_8, window_bounds = array<i64: 1, 10>}, {transform_indices = @transform_9, window_bounds = array<i64: 1, 1, 10>}]} {
    %c0 = arith.constant 0 : index
    %c0_0 = arith.constant 0 : index
    %c0_1 = arith.constant 0 : index
    %0 = vector.load %arg1[%c0, %c0_0, %c0_1] : memref<1x256x4xbf16, #tpu.memory_space<vmem>>, vector<1x256x4xbf16>
    %1 = vector.shape_cast %0 : vector<1x256x4xbf16> to vector<256x4xbf16>
    %cst = arith.constant 0.000000e+00 : f32
    %2 = vector.broadcast %cst : f32 to vector<49x32xf32>
    %c0_2 = arith.constant 0 : index
    %c0_3 = arith.constant 0 : index
    %c0_4 = arith.constant 0 : index
    %3 = vector.load %arg2[%c0_2, %c0_3, %c0_4] : memref<9x49x256xbf16, #tpu.memory_space<vmem>>, vector<1x49x256xbf16>
    %4 = vector.shape_cast %3 : vector<1x49x256xbf16> to vector<49x256xbf16>
    %cst_5 = arith.constant dense<0.000000e+00> : vector<49x4xf32>
    %5 = tpu.matmul %4, %1, %cst_5 {dimension_numbers = #tpu.dot_dimension_numbers<[1], [0], [0], [1], [0, 0, 1, 1], [], []>} : vector<49x256xbf16>, vector<256x4xbf16>, vector<49x4xf32> -> vector<49x4xf32>
    %6 = arith.truncf %5 : vector<49x4xf32> to vector<49x4xbf16>
    %c0_6 = arith.constant 0 : index
    %c0_7 = arith.constant 0 : index
    %c0_8 = arith.constant 0 : index
    %7 = vector.load %arg3[%c0_6, %c0_7, %c0_8] : memref<9x4x32xbf16, #tpu.memory_space<vmem>>, vector<1x4x32xbf16>
    %8 = vector.shape_cast %7 : vector<1x4x32xbf16> to vector<4x32xbf16>
    %cst_9 = arith.constant dense<0.000000e+00> : vector<49x32xf32>
    %9 = tpu.matmul %6, %8, %cst_9 {dimension_numbers = #tpu.dot_dimension_numbers<[1], [0], [0], [1], [0, 0, 1, 1], [], []>} : vector<49x4xbf16>, vector<4x32xbf16>, vector<49x32xf32> -> vector<49x32xf32>
    %10 = arith.addf %2, %9 : vector<49x32xf32>
    %c1 = arith.constant 1 : index
    %c0_10 = arith.constant 0 : index
    %c0_11 = arith.constant 0 : index
    %11 = vector.load %arg2[%c1, %c0_10, %c0_11] : memref<9x49x256xbf16, #tpu.memory_space<vmem>>, vector<1x49x256xbf16>
    %12 = vector.shape_cast %11 : vector<1x49x256xbf16> to vector<49x256xbf16>
    %cst_12 = arith.constant dense<0.000000e+00> : vector<49x4xf32>
    %13 = tpu.matmul %12, %1, %cst_12 {dimension_numbers = #tpu.dot_dimension_numbers<[1], [0], [0], [1], [0, 0, 1, 1], [], []>} : vector<49x256xbf16>, vector<256x4xbf16>, vector<49x4xf32> -> vector<49x4xf32>
    %14 = arith.truncf %13 : vector<49x4xf32> to vector<49x4xbf16>
    %c1_13 = arith.constant 1 : index
    %c0_14 = arith.constant 0 : index
    %c0_15 = arith.constant 0 : index
    %15 = vector.load %arg3[%c1_13, %c0_14, %c0_15] : memref<9x4x32xbf16, #tpu.memory_space<vmem>>, vector<1x4x32xbf16>
    %16 = vector.shape_cast %15 : vector<1x4x32xbf16> to vector<4x32xbf16>
    %cst_16 = arith.constant dense<0.000000e+00> : vector<49x32xf32>
    %17 = tpu.matmul %14, %16, %cst_16 {dimension_numbers = #tpu.dot_dimension_numbers<[1], [0], [0], [1], [0, 0, 1, 1], [], []>} : vector<49x4xbf16>, vector<4x32xbf16>, vector<49x32xf32> -> vector<49x32xf32>
    %18 = arith.addf %10, %17 : vector<49x32xf32>
    %c2 = arith.constant 2 : index
    %c0_17 = arith.constant 0 : index
    %c0_18 = arith.constant 0 : index
    %19 = vector.load %arg2[%c2, %c0_17, %c0_18] : memref<9x49x256xbf16, #tpu.memory_space<vmem>>, vector<1x49x256xbf16>
    %20 = vector.shape_cast %19 : vector<1x49x256xbf16> to vector<49x256xbf16>
    %cst_19 = arith.constant dense<0.000000e+00> : vector<49x4xf32>
    %21 = tpu.matmul %20, %1, %cst_19 {dimension_numbers = #tpu.dot_dimension_numbers<[1], [0], [0], [1], [0, 0, 1, 1], [], []>} : vector<49x256xbf16>, vector<256x4xbf16>, vector<49x4xf32> -> vector<49x4xf32>
    %22 = arith.truncf %21 : vector<49x4xf32> to vector<49x4xbf16>
    %c2_20 = arith.constant 2 : index
    %c0_21 = arith.constant 0 : index
    %c0_22 = arith.constant 0 : index
    %23 = vector.load %arg3[%c2_20, %c0_21, %c0_22] : memref<9x4x32xbf16, #tpu.memory_space<vmem>>, vector<1x4x32xbf16>
    %24 = vector.shape_cast %23 : vector<1x4x32xbf16> to vector<4x32xbf16>
    %cst_23 = arith.constant dense<0.000000e+00> : vector<49x32xf32>
    %25 = tpu.matmul %22, %24, %cst_23 {dimension_numbers = #tpu.dot_dimension_numbers<[1], [0], [0], [1], [0, 0, 1, 1], [], []>} : vector<49x4xbf16>, vector<4x32xbf16>, vector<49x32xf32> -> vector<49x32xf32>
    %26 = arith.addf %18, %25 : vector<49x32xf32>
    %c3 = arith.constant 3 : index
    %c0_24 = arith.constant 0 : index
    %c0_25 = arith.constant 0 : index
    %27 = vector.load %arg2[%c3, %c0_24, %c0_25] : memref<9x49x256xbf16, #tpu.memory_space<vmem>>, vector<1x49x256xbf16>
    %28 = vector.shape_cast %27 : vector<1x49x256xbf16> to vector<49x256xbf16>
    %cst_26 = arith.constant dense<0.000000e+00> : vector<49x4xf32>
    %29 = tpu.matmul %28, %1, %cst_26 {dimension_numbers = #tpu.dot_dimension_numbers<[1], [0], [0], [1], [0, 0, 1, 1], [], []>} : vector<49x256xbf16>, vector<256x4xbf16>, vector<49x4xf32> -> vector<49x4xf32>
    %30 = arith.truncf %29 : vector<49x4xf32> to vector<49x4xbf16>
    %c3_27 = arith.constant 3 : index
    %c0_28 = arith.constant 0 : index
    %c0_29 = arith.constant 0 : index
    %31 = vector.load %arg3[%c3_27, %c0_28, %c0_29] : memref<9x4x32xbf16, #tpu.memory_space<vmem>>, vector<1x4x32xbf16>
    %32 = vector.shape_cast %31 : vector<1x4x32xbf16> to vector<4x32xbf16>
    %cst_30 = arith.constant dense<0.000000e+00> : vector<49x32xf32>
    %33 = tpu.matmul %30, %32, %cst_30 {dimension_numbers = #tpu.dot_dimension_numbers<[1], [0], [0], [1], [0, 0, 1, 1], [], []>} : vector<49x4xbf16>, vector<4x32xbf16>, vector<49x32xf32> -> vector<49x32xf32>
    %34 = arith.addf %26, %33 : vector<49x32xf32>
    %c4 = arith.constant 4 : index
    %c0_31 = arith.constant 0 : index
    %c0_32 = arith.constant 0 : index
    %35 = vector.load %arg2[%c4, %c0_31, %c0_32] : memref<9x49x256xbf16, #tpu.memory_space<vmem>>, vector<1x49x256xbf16>
    %36 = vector.shape_cast %35 : vector<1x49x256xbf16> to vector<49x256xbf16>
    %cst_33 = arith.constant dense<0.000000e+00> : vector<49x4xf32>
    %37 = tpu.matmul %36, %1, %cst_33 {dimension_numbers = #tpu.dot_dimension_numbers<[1], [0], [0], [1], [0, 0, 1, 1], [], []>} : vector<49x256xbf16>, vector<256x4xbf16>, vector<49x4xf32> -> vector<49x4xf32>
    %38 = arith.truncf %37 : vector<49x4xf32> to vector<49x4xbf16>
    %c4_34 = arith.constant 4 : index
    %c0_35 = arith.constant 0 : index
    %c0_36 = arith.constant 0 : index
    %39 = vector.load %arg3[%c4_34, %c0_35, %c0_36] : memref<9x4x32xbf16, #tpu.memory_space<vmem>>, vector<1x4x32xbf16>
    %40 = vector.shape_cast %39 : vector<1x4x32xbf16> to vector<4x32xbf16>
    %cst_37 = arith.constant dense<0.000000e+00> : vector<49x32xf32>
    %41 = tpu.matmul %38, %40, %cst_37 {dimension_numbers = #tpu.dot_dimension_numbers<[1], [0], [0], [1], [0, 0, 1, 1], [], []>} : vector<49x4xbf16>, vector<4x32xbf16>, vector<49x32xf32> -> vector<49x32xf32>
    %42 = arith.addf %34, %41 : vector<49x32xf32>
    %c5 = arith.constant 5 : index
    %c0_38 = arith.constant 0 : index
    %c0_39 = arith.constant 0 : index
    %43 = vector.load %arg2[%c5, %c0_38, %c0_39] : memref<9x49x256xbf16, #tpu.memory_space<vmem>>, vector<1x49x256xbf16>
    %44 = vector.shape_cast %43 : vector<1x49x256xbf16> to vector<49x256xbf16>
    %cst_40 = arith.constant dense<0.000000e+00> : vector<49x4xf32>
    %45 = tpu.matmul %44, %1, %cst_40 {dimension_numbers = #tpu.dot_dimension_numbers<[1], [0], [0], [1], [0, 0, 1, 1], [], []>} : vector<49x256xbf16>, vector<256x4xbf16>, vector<49x4xf32> -> vector<49x4xf32>
    %46 = arith.truncf %45 : vector<49x4xf32> to vector<49x4xbf16>
    %c5_41 = arith.constant 5 : index
    %c0_42 = arith.constant 0 : index
    %c0_43 = arith.constant 0 : index
    %47 = vector.load %arg3[%c5_41, %c0_42, %c0_43] : memref<9x4x32xbf16, #tpu.memory_space<vmem>>, vector<1x4x32xbf16>
    %48 = vector.shape_cast %47 : vector<1x4x32xbf16> to vector<4x32xbf16>
    %cst_44 = arith.constant dense<0.000000e+00> : vector<49x32xf32>
    %49 = tpu.matmul %46, %48, %cst_44 {dimension_numbers = #tpu.dot_dimension_numbers<[1], [0], [0], [1], [0, 0, 1, 1], [], []>} : vector<49x4xbf16>, vector<4x32xbf16>, vector<49x32xf32> -> vector<49x32xf32>
    %50 = arith.addf %42, %49 : vector<49x32xf32>
    %c6 = arith.constant 6 : index
    %c0_45 = arith.constant 0 : index
    %c0_46 = arith.constant 0 : index
    %51 = vector.load %arg2[%c6, %c0_45, %c0_46] : memref<9x49x256xbf16, #tpu.memory_space<vmem>>, vector<1x49x256xbf16>
    %52 = vector.shape_cast %51 : vector<1x49x256xbf16> to vector<49x256xbf16>
    %cst_47 = arith.constant dense<0.000000e+00> : vector<49x4xf32>
    %53 = tpu.matmul %52, %1, %cst_47 {dimension_numbers = #tpu.dot_dimension_numbers<[1], [0], [0], [1], [0, 0, 1, 1], [], []>} : vector<49x256xbf16>, vector<256x4xbf16>, vector<49x4xf32> -> vector<49x4xf32>
    %54 = arith.truncf %53 : vector<49x4xf32> to vector<49x4xbf16>
    %c6_48 = arith.constant 6 : index
    %c0_49 = arith.constant 0 : index
    %c0_50 = arith.constant 0 : index
    %55 = vector.load %arg3[%c6_48, %c0_49, %c0_50] : memref<9x4x32xbf16, #tpu.memory_space<vmem>>, vector<1x4x32xbf16>
    %56 = vector.shape_cast %55 : vector<1x4x32xbf16> to vector<4x32xbf16>
    %cst_51 = arith.constant dense<0.000000e+00> : vector<49x32xf32>
    %57 = tpu.matmul %54, %56, %cst_51 {dimension_numbers = #tpu.dot_dimension_numbers<[1], [0], [0], [1], [0, 0, 1, 1], [], []>} : vector<49x4xbf16>, vector<4x32xbf16>, vector<49x32xf32> -> vector<49x32xf32>
    %58 = arith.addf %50, %57 : vector<49x32xf32>
    %c7 = arith.constant 7 : index
    %c0_52 = arith.constant 0 : index
    %c0_53 = arith.constant 0 : index
    %59 = vector.load %arg2[%c7, %c0_52, %c0_53] : memref<9x49x256xbf16, #tpu.memory_space<vmem>>, vector<1x49x256xbf16>
    %60 = vector.shape_cast %59 : vector<1x49x256xbf16> to vector<49x256xbf16>
    %cst_54 = arith.constant dense<0.000000e+00> : vector<49x4xf32>
    %61 = tpu.matmul %60, %1, %cst_54 {dimension_numbers = #tpu.dot_dimension_numbers<[1], [0], [0], [1], [0, 0, 1, 1], [], []>} : vector<49x256xbf16>, vector<256x4xbf16>, vector<49x4xf32> -> vector<49x4xf32>
    %62 = arith.truncf %61 : vector<49x4xf32> to vector<49x4xbf16>
    %c7_55 = arith.constant 7 : index
    %c0_56 = arith.constant 0 : index
    %c0_57 = arith.constant 0 : index
    %63 = vector.load %arg3[%c7_55, %c0_56, %c0_57] : memref<9x4x32xbf16, #tpu.memory_space<vmem>>, vector<1x4x32xbf16>
    %64 = vector.shape_cast %63 : vector<1x4x32xbf16> to vector<4x32xbf16>
    %cst_58 = arith.constant dense<0.000000e+00> : vector<49x32xf32>
    %65 = tpu.matmul %62, %64, %cst_58 {dimension_numbers = #tpu.dot_dimension_numbers<[1], [0], [0], [1], [0, 0, 1, 1], [], []>} : vector<49x4xbf16>, vector<4x32xbf16>, vector<49x32xf32> -> vector<49x32xf32>
    %66 = arith.addf %58, %65 : vector<49x32xf32>
    %c8 = arith.constant 8 : index
    %c0_59 = arith.constant 0 : index
    %c0_60 = arith.constant 0 : index
    %67 = vector.load %arg2[%c8, %c0_59, %c0_60] : memref<9x49x256xbf16, #tpu.memory_space<vmem>>, vector<1x49x256xbf16>
    %68 = vector.shape_cast %67 : vector<1x49x256xbf16> to vector<49x256xbf16>
    %cst_61 = arith.constant dense<0.000000e+00> : vector<49x4xf32>
    %69 = tpu.matmul %68, %1, %cst_61 {dimension_numbers = #tpu.dot_dimension_numbers<[1], [0], [0], [1], [0, 0, 1, 1], [], []>} : vector<49x256xbf16>, vector<256x4xbf16>, vector<49x4xf32> -> vector<49x4xf32>
    %70 = arith.truncf %69 : vector<49x4xf32> to vector<49x4xbf16>
    %c8_62 = arith.constant 8 : index
    %c0_63 = arith.constant 0 : index
    %c0_64 = arith.constant 0 : index
    %71 = vector.load %arg3[%c8_62, %c0_63, %c0_64] : memref<9x4x32xbf16, #tpu.memory_space<vmem>>, vector<1x4x32xbf16>
    %72 = vector.shape_cast %71 : vector<1x4x32xbf16> to vector<4x32xbf16>
    %cst_65 = arith.constant dense<0.000000e+00> : vector<49x32xf32>
    %73 = tpu.matmul %70, %72, %cst_65 {dimension_numbers = #tpu.dot_dimension_numbers<[1], [0], [0], [1], [0, 0, 1, 1], [], []>} : vector<49x4xbf16>, vector<4x32xbf16>, vector<49x32xf32> -> vector<49x32xf32>
    %74 = arith.addf %66, %73 : vector<49x32xf32>
    %c0_66 = arith.constant 0 : index
    %c0_67 = arith.constant 0 : index
    %75 = vector.load %arg4[%c0_66, %c0_67] : memref<1x32xf32, #tpu.memory_space<vmem>>, vector<1x32xf32>
    %76 = vector.broadcast %75 : vector<1x32xf32> to vector<49x32xf32>
    %77 = arith.addf %74, %76 : vector<49x32xf32>
    %cst_68 = arith.constant 0.000000e+00 : f32
    %78 = vector.broadcast %cst_68 : f32 to vector<49x32xf32>
    %79 = arith.maximumf %77, %78 : vector<49x32xf32>
    %80 = arith.truncf %79 : vector<49x32xf32> to vector<49x32xbf16>
    %cst_69 = arith.constant 0.000000e+00 : f32
    %81 = vector.broadcast %cst_69 : f32 to vector<9x64xf32>
    %c0_70 = arith.constant 0 : index
    %c0_71 = arith.constant 0 : index
    %c0_72 = arith.constant 0 : index
    %82 = vector.load %arg5[%c0_70, %c0_71, %c0_72] : memref<9x9x49xbf16, #tpu.memory_space<vmem>>, vector<1x9x49xbf16>
    %83 = vector.shape_cast %82 : vector<1x9x49xbf16> to vector<9x49xbf16>
    %cst_73 = arith.constant dense<0.000000e+00> : vector<9x32xf32>
    %84 = tpu.matmul %83, %80, %cst_73 {dimension_numbers = #tpu.dot_dimension_numbers<[1], [0], [0], [1], [0, 0, 1, 1], [], []>} : vector<9x49xbf16>, vector<49x32xbf16>, vector<9x32xf32> -> vector<9x32xf32>
    %85 = arith.truncf %84 : vector<9x32xf32> to vector<9x32xbf16>
    %c0_74 = arith.constant 0 : index
    %c0_75 = arith.constant 0 : index
    %c0_76 = arith.constant 0 : index
    %86 = vector.load %arg6[%c0_74, %c0_75, %c0_76] : memref<9x32x64xbf16, #tpu.memory_space<vmem>>, vector<1x32x64xbf16>
    %87 = vector.shape_cast %86 : vector<1x32x64xbf16> to vector<32x64xbf16>
    %cst_77 = arith.constant dense<0.000000e+00> : vector<9x64xf32>
    %88 = tpu.matmul %85, %87, %cst_77 {dimension_numbers = #tpu.dot_dimension_numbers<[1], [0], [0], [1], [0, 0, 1, 1], [], []>} : vector<9x32xbf16>, vector<32x64xbf16>, vector<9x64xf32> -> vector<9x64xf32>
    %89 = arith.addf %81, %88 : vector<9x64xf32>
    %c1_78 = arith.constant 1 : index
    %c0_79 = arith.constant 0 : index
    %c0_80 = arith.constant 0 : index
    %90 = vector.load %arg5[%c1_78, %c0_79, %c0_80] : memref<9x9x49xbf16, #tpu.memory_space<vmem>>, vector<1x9x49xbf16>
    %91 = vector.shape_cast %90 : vector<1x9x49xbf16> to vector<9x49xbf16>
    %cst_81 = arith.constant dense<0.000000e+00> : vector<9x32xf32>
    %92 = tpu.matmul %91, %80, %cst_81 {dimension_numbers = #tpu.dot_dimension_numbers<[1], [0], [0], [1], [0, 0, 1, 1], [], []>} : vector<9x49xbf16>, vector<49x32xbf16>, vector<9x32xf32> -> vector<9x32xf32>
    %93 = arith.truncf %92 : vector<9x32xf32> to vector<9x32xbf16>
    %c1_82 = arith.constant 1 : index
    %c0_83 = arith.constant 0 : index
    %c0_84 = arith.constant 0 : index
    %94 = vector.load %arg6[%c1_82, %c0_83, %c0_84] : memref<9x32x64xbf16, #tpu.memory_space<vmem>>, vector<1x32x64xbf16>
    %95 = vector.shape_cast %94 : vector<1x32x64xbf16> to vector<32x64xbf16>
    %cst_85 = arith.constant dense<0.000000e+00> : vector<9x64xf32>
    %96 = tpu.matmul %93, %95, %cst_85 {dimension_numbers = #tpu.dot_dimension_numbers<[1], [0], [0], [1], [0, 0, 1, 1], [], []>} : vector<9x32xbf16>, vector<32x64xbf16>, vector<9x64xf32> -> vector<9x64xf32>
    %97 = arith.addf %89, %96 : vector<9x64xf32>
    %c2_86 = arith.constant 2 : index
    %c0_87 = arith.constant 0 : index
    %c0_88 = arith.constant 0 : index
    %98 = vector.load %arg5[%c2_86, %c0_87, %c0_88] : memref<9x9x49xbf16, #tpu.memory_space<vmem>>, vector<1x9x49xbf16>
    %99 = vector.shape_cast %98 : vector<1x9x49xbf16> to vector<9x49xbf16>
    %cst_89 = arith.constant dense<0.000000e+00> : vector<9x32xf32>
    %100 = tpu.matmul %99, %80, %cst_89 {dimension_numbers = #tpu.dot_dimension_numbers<[1], [0], [0], [1], [0, 0, 1, 1], [], []>} : vector<9x49xbf16>, vector<49x32xbf16>, vector<9x32xf32> -> vector<9x32xf32>
    %101 = arith.truncf %100 : vector<9x32xf32> to vector<9x32xbf16>
    %c2_90 = arith.constant 2 : index
    %c0_91 = arith.constant 0 : index
    %c0_92 = arith.constant 0 : index
    %102 = vector.load %arg6[%c2_90, %c0_91, %c0_92] : memref<9x32x64xbf16, #tpu.memory_space<vmem>>, vector<1x32x64xbf16>
    %103 = vector.shape_cast %102 : vector<1x32x64xbf16> to vector<32x64xbf16>
    %cst_93 = arith.constant dense<0.000000e+00> : vector<9x64xf32>
    %104 = tpu.matmul %101, %103, %cst_93 {dimension_numbers = #tpu.dot_dimension_numbers<[1], [0], [0], [1], [0, 0, 1, 1], [], []>} : vector<9x32xbf16>, vector<32x64xbf16>, vector<9x64xf32> -> vector<9x64xf32>
    %105 = arith.addf %97, %104 : vector<9x64xf32>
    %c3_94 = arith.constant 3 : index
    %c0_95 = arith.constant 0 : index
    %c0_96 = arith.constant 0 : index
    %106 = vector.load %arg5[%c3_94, %c0_95, %c0_96] : memref<9x9x49xbf16, #tpu.memory_space<vmem>>, vector<1x9x49xbf16>
    %107 = vector.shape_cast %106 : vector<1x9x49xbf16> to vector<9x49xbf16>
    %cst_97 = arith.constant dense<0.000000e+00> : vector<9x32xf32>
    %108 = tpu.matmul %107, %80, %cst_97 {dimension_numbers = #tpu.dot_dimension_numbers<[1], [0], [0], [1], [0, 0, 1, 1], [], []>} : vector<9x49xbf16>, vector<49x32xbf16>, vector<9x32xf32> -> vector<9x32xf32>
    %109 = arith.truncf %108 : vector<9x32xf32> to vector<9x32xbf16>
    %c3_98 = arith.constant 3 : index
    %c0_99 = arith.constant 0 : index
    %c0_100 = arith.constant 0 : index
    %110 = vector.load %arg6[%c3_98, %c0_99, %c0_100] : memref<9x32x64xbf16, #tpu.memory_space<vmem>>, vector<1x32x64xbf16>
    %111 = vector.shape_cast %110 : vector<1x32x64xbf16> to vector<32x64xbf16>
    %cst_101 = arith.constant dense<0.000000e+00> : vector<9x64xf32>
    %112 = tpu.matmul %109, %111, %cst_101 {dimension_numbers = #tpu.dot_dimension_numbers<[1], [0], [0], [1], [0, 0, 1, 1], [], []>} : vector<9x32xbf16>, vector<32x64xbf16>, vector<9x64xf32> -> vector<9x64xf32>
    %113 = arith.addf %105, %112 : vector<9x64xf32>
    %c4_102 = arith.constant 4 : index
    %c0_103 = arith.constant 0 : index
    %c0_104 = arith.constant 0 : index
    %114 = vector.load %arg5[%c4_102, %c0_103, %c0_104] : memref<9x9x49xbf16, #tpu.memory_space<vmem>>, vector<1x9x49xbf16>
    %115 = vector.shape_cast %114 : vector<1x9x49xbf16> to vector<9x49xbf16>
    %cst_105 = arith.constant dense<0.000000e+00> : vector<9x32xf32>
    %116 = tpu.matmul %115, %80, %cst_105 {dimension_numbers = #tpu.dot_dimension_numbers<[1], [0], [0], [1], [0, 0, 1, 1], [], []>} : vector<9x49xbf16>, vector<49x32xbf16>, vector<9x32xf32> -> vector<9x32xf32>
    %117 = arith.truncf %116 : vector<9x32xf32> to vector<9x32xbf16>
    %c4_106 = arith.constant 4 : index
    %c0_107 = arith.constant 0 : index
    %c0_108 = arith.constant 0 : index
    %118 = vector.load %arg6[%c4_106, %c0_107, %c0_108] : memref<9x32x64xbf16, #tpu.memory_space<vmem>>, vector<1x32x64xbf16>
    %119 = vector.shape_cast %118 : vector<1x32x64xbf16> to vector<32x64xbf16>
    %cst_109 = arith.constant dense<0.000000e+00> : vector<9x64xf32>
    %120 = tpu.matmul %117, %119, %cst_109 {dimension_numbers = #tpu.dot_dimension_numbers<[1], [0], [0], [1], [0, 0, 1, 1], [], []>} : vector<9x32xbf16>, vector<32x64xbf16>, vector<9x64xf32> -> vector<9x64xf32>
    %121 = arith.addf %113, %120 : vector<9x64xf32>
    %c5_110 = arith.constant 5 : index
    %c0_111 = arith.constant 0 : index
    %c0_112 = arith.constant 0 : index
    %122 = vector.load %arg5[%c5_110, %c0_111, %c0_112] : memref<9x9x49xbf16, #tpu.memory_space<vmem>>, vector<1x9x49xbf16>
    %123 = vector.shape_cast %122 : vector<1x9x49xbf16> to vector<9x49xbf16>
    %cst_113 = arith.constant dense<0.000000e+00> : vector<9x32xf32>
    %124 = tpu.matmul %123, %80, %cst_113 {dimension_numbers = #tpu.dot_dimension_numbers<[1], [0], [0], [1], [0, 0, 1, 1], [], []>} : vector<9x49xbf16>, vector<49x32xbf16>, vector<9x32xf32> -> vector<9x32xf32>
    %125 = arith.truncf %124 : vector<9x32xf32> to vector<9x32xbf16>
    %c5_114 = arith.constant 5 : index
    %c0_115 = arith.constant 0 : index
    %c0_116 = arith.constant 0 : index
    %126 = vector.load %arg6[%c5_114, %c0_115, %c0_116] : memref<9x32x64xbf16, #tpu.memory_space<vmem>>, vector<1x32x64xbf16>
    %127 = vector.shape_cast %126 : vector<1x32x64xbf16> to vector<32x64xbf16>
    %cst_117 = arith.constant dense<0.000000e+00> : vector<9x64xf32>
    %128 = tpu.matmul %125, %127, %cst_117 {dimension_numbers = #tpu.dot_dimension_numbers<[1], [0], [0], [1], [0, 0, 1, 1], [], []>} : vector<9x32xbf16>, vector<32x64xbf16>, vector<9x64xf32> -> vector<9x64xf32>
    %129 = arith.addf %121, %128 : vector<9x64xf32>
    %c6_118 = arith.constant 6 : index
    %c0_119 = arith.constant 0 : index
    %c0_120 = arith.constant 0 : index
    %130 = vector.load %arg5[%c6_118, %c0_119, %c0_120] : memref<9x9x49xbf16, #tpu.memory_space<vmem>>, vector<1x9x49xbf16>
    %131 = vector.shape_cast %130 : vector<1x9x49xbf16> to vector<9x49xbf16>
    %cst_121 = arith.constant dense<0.000000e+00> : vector<9x32xf32>
    %132 = tpu.matmul %131, %80, %cst_121 {dimension_numbers = #tpu.dot_dimension_numbers<[1], [0], [0], [1], [0, 0, 1, 1], [], []>} : vector<9x49xbf16>, vector<49x32xbf16>, vector<9x32xf32> -> vector<9x32xf32>
    %133 = arith.truncf %132 : vector<9x32xf32> to vector<9x32xbf16>
    %c6_122 = arith.constant 6 : index
    %c0_123 = arith.constant 0 : index
    %c0_124 = arith.constant 0 : index
    %134 = vector.load %arg6[%c6_122, %c0_123, %c0_124] : memref<9x32x64xbf16, #tpu.memory_space<vmem>>, vector<1x32x64xbf16>
    %135 = vector.shape_cast %134 : vector<1x32x64xbf16> to vector<32x64xbf16>
    %cst_125 = arith.constant dense<0.000000e+00> : vector<9x64xf32>
    %136 = tpu.matmul %133, %135, %cst_125 {dimension_numbers = #tpu.dot_dimension_numbers<[1], [0], [0], [1], [0, 0, 1, 1], [], []>} : vector<9x32xbf16>, vector<32x64xbf16>, vector<9x64xf32> -> vector<9x64xf32>
    %137 = arith.addf %129, %136 : vector<9x64xf32>
    %c7_126 = arith.constant 7 : index
    %c0_127 = arith.constant 0 : index
    %c0_128 = arith.constant 0 : index
    %138 = vector.load %arg5[%c7_126, %c0_127, %c0_128] : memref<9x9x49xbf16, #tpu.memory_space<vmem>>, vector<1x9x49xbf16>
    %139 = vector.shape_cast %138 : vector<1x9x49xbf16> to vector<9x49xbf16>
    %cst_129 = arith.constant dense<0.000000e+00> : vector<9x32xf32>
    %140 = tpu.matmul %139, %80, %cst_129 {dimension_numbers = #tpu.dot_dimension_numbers<[1], [0], [0], [1], [0, 0, 1, 1], [], []>} : vector<9x49xbf16>, vector<49x32xbf16>, vector<9x32xf32> -> vector<9x32xf32>
    %141 = arith.truncf %140 : vector<9x32xf32> to vector<9x32xbf16>
    %c7_130 = arith.constant 7 : index
    %c0_131 = arith.constant 0 : index
    %c0_132 = arith.constant 0 : index
    %142 = vector.load %arg6[%c7_130, %c0_131, %c0_132] : memref<9x32x64xbf16, #tpu.memory_space<vmem>>, vector<1x32x64xbf16>
    %143 = vector.shape_cast %142 : vector<1x32x64xbf16> to vector<32x64xbf16>
    %cst_133 = arith.constant dense<0.000000e+00> : vector<9x64xf32>
    %144 = tpu.matmul %141, %143, %cst_133 {dimension_numbers = #tpu.dot_dimension_numbers<[1], [0], [0], [1], [0, 0, 1, 1], [], []>} : vector<9x32xbf16>, vector<32x64xbf16>, vector<9x64xf32> -> vector<9x64xf32>
    %145 = arith.addf %137, %144 : vector<9x64xf32>
    %c8_134 = arith.constant 8 : index
    %c0_135 = arith.constant 0 : index
    %c0_136 = arith.constant 0 : index
    %146 = vector.load %arg5[%c8_134, %c0_135, %c0_136] : memref<9x9x49xbf16, #tpu.memory_space<vmem>>, vector<1x9x49xbf16>
    %147 = vector.shape_cast %146 : vector<1x9x49xbf16> to vector<9x49xbf16>
    %cst_137 = arith.constant dense<0.000000e+00> : vector<9x32xf32>
    %148 = tpu.matmul %147, %80, %cst_137 {dimension_numbers = #tpu.dot_dimension_numbers<[1], [0], [0], [1], [0, 0, 1, 1], [], []>} : vector<9x49xbf16>, vector<49x32xbf16>, vector<9x32xf32> -> vector<9x32xf32>
    %149 = arith.truncf %148 : vector<9x32xf32> to vector<9x32xbf16>
    %c8_138 = arith.constant 8 : index
    %c0_139 = arith.constant 0 : index
    %c0_140 = arith.constant 0 : index
    %150 = vector.load %arg6[%c8_138, %c0_139, %c0_140] : memref<9x32x64xbf16, #tpu.memory_space<vmem>>, vector<1x32x64xbf16>
    %151 = vector.shape_cast %150 : vector<1x32x64xbf16> to vector<32x64xbf16>
    %cst_141 = arith.constant dense<0.000000e+00> : vector<9x64xf32>
    %152 = tpu.matmul %149, %151, %cst_141 {dimension_numbers = #tpu.dot_dimension_numbers<[1], [0], [0], [1], [0, 0, 1, 1], [], []>} : vector<9x32xbf16>, vector<32x64xbf16>, vector<9x64xf32> -> vector<9x64xf32>
    %153 = arith.addf %145, %152 : vector<9x64xf32>
    %c0_142 = arith.constant 0 : index
    %c0_143 = arith.constant 0 : index
    %154 = vector.load %arg7[%c0_142, %c0_143] : memref<1x64xf32, #tpu.memory_space<vmem>>, vector<1x64xf32>
    %155 = vector.broadcast %154 : vector<1x64xf32> to vector<9x64xf32>
    %156 = arith.addf %153, %155 : vector<9x64xf32>
    %cst_144 = arith.constant 0.000000e+00 : f32
    %157 = vector.broadcast %cst_144 : f32 to vector<9x64xf32>
    %158 = arith.maximumf %156, %157 : vector<9x64xf32>
    %159 = arith.truncf %158 : vector<9x64xf32> to vector<9x64xbf16>
    %c0_145 = arith.constant 0 : index
    %c0_146 = arith.constant 0 : index
    %160 = vector.load %arg9[%c0_145, %c0_146] : memref<1x10xf32, #tpu.memory_space<vmem>>, vector<1x10xf32>
    %161 = vector.extract_strided_slice %159 {offsets = [0, 0], sizes = [1, 64], strides = [1, 1]} : vector<9x64xbf16> to vector<1x64xbf16>
    %c0_147 = arith.constant 0 : index
    %c0_148 = arith.constant 0 : index
    %c0_149 = arith.constant 0 : index
    %162 = vector.load %arg8[%c0_147, %c0_148, %c0_149] : memref<9x64x10xbf16, #tpu.memory_space<vmem>>, vector<1x64x10xbf16>
    %163 = vector.shape_cast %162 : vector<1x64x10xbf16> to vector<64x10xbf16>
    %cst_150 = arith.constant dense<0.000000e+00> : vector<1x10xf32>
    %164 = tpu.matmul %161, %163, %cst_150 {dimension_numbers = #tpu.dot_dimension_numbers<[1], [0], [0], [1], [0, 0, 1, 1], [], []>} : vector<1x64xbf16>, vector<64x10xbf16>, vector<1x10xf32> -> vector<1x10xf32>
    %165 = arith.addf %160, %164 : vector<1x10xf32>
    %166 = vector.extract_strided_slice %159 {offsets = [1, 0], sizes = [1, 64], strides = [1, 1]} : vector<9x64xbf16> to vector<1x64xbf16>
    %c1_151 = arith.constant 1 : index
    %c0_152 = arith.constant 0 : index
    %c0_153 = arith.constant 0 : index
    %167 = vector.load %arg8[%c1_151, %c0_152, %c0_153] : memref<9x64x10xbf16, #tpu.memory_space<vmem>>, vector<1x64x10xbf16>
    %168 = vector.shape_cast %167 : vector<1x64x10xbf16> to vector<64x10xbf16>
    %cst_154 = arith.constant dense<0.000000e+00> : vector<1x10xf32>
    %169 = tpu.matmul %166, %168, %cst_154 {dimension_numbers = #tpu.dot_dimension_numbers<[1], [0], [0], [1], [0, 0, 1, 1], [], []>} : vector<1x64xbf16>, vector<64x10xbf16>, vector<1x10xf32> -> vector<1x10xf32>
    %170 = arith.addf %165, %169 : vector<1x10xf32>
    %171 = vector.extract_strided_slice %159 {offsets = [2, 0], sizes = [1, 64], strides = [1, 1]} : vector<9x64xbf16> to vector<1x64xbf16>
    %c2_155 = arith.constant 2 : index
    %c0_156 = arith.constant 0 : index
    %c0_157 = arith.constant 0 : index
    %172 = vector.load %arg8[%c2_155, %c0_156, %c0_157] : memref<9x64x10xbf16, #tpu.memory_space<vmem>>, vector<1x64x10xbf16>
    %173 = vector.shape_cast %172 : vector<1x64x10xbf16> to vector<64x10xbf16>
    %cst_158 = arith.constant dense<0.000000e+00> : vector<1x10xf32>
    %174 = tpu.matmul %171, %173, %cst_158 {dimension_numbers = #tpu.dot_dimension_numbers<[1], [0], [0], [1], [0, 0, 1, 1], [], []>} : vector<1x64xbf16>, vector<64x10xbf16>, vector<1x10xf32> -> vector<1x10xf32>
    %175 = arith.addf %170, %174 : vector<1x10xf32>
    %176 = vector.extract_strided_slice %159 {offsets = [3, 0], sizes = [1, 64], strides = [1, 1]} : vector<9x64xbf16> to vector<1x64xbf16>
    %c3_159 = arith.constant 3 : index
    %c0_160 = arith.constant 0 : index
    %c0_161 = arith.constant 0 : index
    %177 = vector.load %arg8[%c3_159, %c0_160, %c0_161] : memref<9x64x10xbf16, #tpu.memory_space<vmem>>, vector<1x64x10xbf16>
    %178 = vector.shape_cast %177 : vector<1x64x10xbf16> to vector<64x10xbf16>
    %cst_162 = arith.constant dense<0.000000e+00> : vector<1x10xf32>
    %179 = tpu.matmul %176, %178, %cst_162 {dimension_numbers = #tpu.dot_dimension_numbers<[1], [0], [0], [1], [0, 0, 1, 1], [], []>} : vector<1x64xbf16>, vector<64x10xbf16>, vector<1x10xf32> -> vector<1x10xf32>
    %180 = arith.addf %175, %179 : vector<1x10xf32>
    %181 = vector.extract_strided_slice %159 {offsets = [4, 0], sizes = [1, 64], strides = [1, 1]} : vector<9x64xbf16> to vector<1x64xbf16>
    %c4_163 = arith.constant 4 : index
    %c0_164 = arith.constant 0 : index
    %c0_165 = arith.constant 0 : index
    %182 = vector.load %arg8[%c4_163, %c0_164, %c0_165] : memref<9x64x10xbf16, #tpu.memory_space<vmem>>, vector<1x64x10xbf16>
    %183 = vector.shape_cast %182 : vector<1x64x10xbf16> to vector<64x10xbf16>
    %cst_166 = arith.constant dense<0.000000e+00> : vector<1x10xf32>
    %184 = tpu.matmul %181, %183, %cst_166 {dimension_numbers = #tpu.dot_dimension_numbers<[1], [0], [0], [1], [0, 0, 1, 1], [], []>} : vector<1x64xbf16>, vector<64x10xbf16>, vector<1x10xf32> -> vector<1x10xf32>
    %185 = arith.addf %180, %184 : vector<1x10xf32>
    %186 = vector.extract_strided_slice %159 {offsets = [5, 0], sizes = [1, 64], strides = [1, 1]} : vector<9x64xbf16> to vector<1x64xbf16>
    %c5_167 = arith.constant 5 : index
    %c0_168 = arith.constant 0 : index
    %c0_169 = arith.constant 0 : index
    %187 = vector.load %arg8[%c5_167, %c0_168, %c0_169] : memref<9x64x10xbf16, #tpu.memory_space<vmem>>, vector<1x64x10xbf16>
    %188 = vector.shape_cast %187 : vector<1x64x10xbf16> to vector<64x10xbf16>
    %cst_170 = arith.constant dense<0.000000e+00> : vector<1x10xf32>
    %189 = tpu.matmul %186, %188, %cst_170 {dimension_numbers = #tpu.dot_dimension_numbers<[1], [0], [0], [1], [0, 0, 1, 1], [], []>} : vector<1x64xbf16>, vector<64x10xbf16>, vector<1x10xf32> -> vector<1x10xf32>
    %190 = arith.addf %185, %189 : vector<1x10xf32>
    %191 = vector.extract_strided_slice %159 {offsets = [6, 0], sizes = [1, 64], strides = [1, 1]} : vector<9x64xbf16> to vector<1x64xbf16>
    %c6_171 = arith.constant 6 : index
    %c0_172 = arith.constant 0 : index
    %c0_173 = arith.constant 0 : index
    %192 = vector.load %arg8[%c6_171, %c0_172, %c0_173] : memref<9x64x10xbf16, #tpu.memory_space<vmem>>, vector<1x64x10xbf16>
    %193 = vector.shape_cast %192 : vector<1x64x10xbf16> to vector<64x10xbf16>
    %cst_174 = arith.constant dense<0.000000e+00> : vector<1x10xf32>
    %194 = tpu.matmul %191, %193, %cst_174 {dimension_numbers = #tpu.dot_dimension_numbers<[1], [0], [0], [1], [0, 0, 1, 1], [], []>} : vector<1x64xbf16>, vector<64x10xbf16>, vector<1x10xf32> -> vector<1x10xf32>
    %195 = arith.addf %190, %194 : vector<1x10xf32>
    %196 = vector.extract_strided_slice %159 {offsets = [7, 0], sizes = [1, 64], strides = [1, 1]} : vector<9x64xbf16> to vector<1x64xbf16>
    %c7_175 = arith.constant 7 : index
    %c0_176 = arith.constant 0 : index
    %c0_177 = arith.constant 0 : index
    %197 = vector.load %arg8[%c7_175, %c0_176, %c0_177] : memref<9x64x10xbf16, #tpu.memory_space<vmem>>, vector<1x64x10xbf16>
    %198 = vector.shape_cast %197 : vector<1x64x10xbf16> to vector<64x10xbf16>
    %cst_178 = arith.constant dense<0.000000e+00> : vector<1x10xf32>
    %199 = tpu.matmul %196, %198, %cst_178 {dimension_numbers = #tpu.dot_dimension_numbers<[1], [0], [0], [1], [0, 0, 1, 1], [], []>} : vector<1x64xbf16>, vector<64x10xbf16>, vector<1x10xf32> -> vector<1x10xf32>
    %200 = arith.addf %195, %199 : vector<1x10xf32>
    %201 = vector.extract_strided_slice %159 {offsets = [8, 0], sizes = [1, 64], strides = [1, 1]} : vector<9x64xbf16> to vector<1x64xbf16>
    %c8_179 = arith.constant 8 : index
    %c0_180 = arith.constant 0 : index
    %c0_181 = arith.constant 0 : index
    %202 = vector.load %arg8[%c8_179, %c0_180, %c0_181] : memref<9x64x10xbf16, #tpu.memory_space<vmem>>, vector<1x64x10xbf16>
    %203 = vector.shape_cast %202 : vector<1x64x10xbf16> to vector<64x10xbf16>
    %cst_182 = arith.constant dense<0.000000e+00> : vector<1x10xf32>
    %204 = tpu.matmul %201, %203, %cst_182 {dimension_numbers = #tpu.dot_dimension_numbers<[1], [0], [0], [1], [0, 0, 1, 1], [], []>} : vector<1x64xbf16>, vector<64x10xbf16>, vector<1x10xf32> -> vector<1x10xf32>
    %205 = arith.addf %200, %204 : vector<1x10xf32>
    %c0_183 = arith.constant 0 : index
    %c0_184 = arith.constant 0 : index
    %c0_185 = arith.constant 0 : index
    %206 = vector.load %arg10[%c0_183, %c0_184, %c0_185] : memref<1x1x10xf32, #tpu.memory_space<vmem>>, vector<1x1x10xf32>
    %207 = vector.shape_cast %206 : vector<1x1x10xf32> to vector<1x10xf32>
    %208 = vector.shape_cast %205 : vector<1x10xf32> to vector<1x1x10xf32>
    tpu.vector_store %arg10[%c0_183, %c0_184, %c0_185], %208 {strides = array<i32>} : memref<1x1x10xf32, #tpu.memory_space<vmem>>, vector<1x1x10xf32>,
    return
  }
  func.func @transform_0(%arg0: i32) -> (i32, i32, i32) {
    %c0_i32 = arith.constant 0 : i32
    %c0_i32_0 = arith.constant 0 : i32
    %c0_i32_1 = arith.constant 0 : i32
    return %arg0, %c0_i32, %c0_i32_0 : i32, i32, i32
  }
  func.func @transform_1(%arg0: i32) -> (i32, i32, i32) {
    %c0_i32 = arith.constant 0 : i32
    %c0_i32_0 = arith.constant 0 : i32
    %c0_i32_1 = arith.constant 0 : i32
    %c0_i32_2 = arith.constant 0 : i32
    return %c0_i32, %c0_i32_0, %c0_i32_1 : i32, i32, i32
  }
  func.func @transform_2(%arg0: i32) -> (i32, i32, i32) {
    %c0_i32 = arith.constant 0 : i32
    %c0_i32_0 = arith.constant 0 : i32
    %c0_i32_1 = arith.constant 0 : i32
    %c0_i32_2 = arith.constant 0 : i32
    return %c0_i32, %c0_i32_0, %c0_i32_1 : i32, i32, i32
  }
  func.func @transform_3(%arg0: i32) -> (i32, i32) {
    %c0_i32 = arith.constant 0 : i32
    %c0_i32_0 = arith.constant 0 : i32
    %c0_i32_1 = arith.constant 0 : i32
    return %c0_i32, %c0_i32_0 : i32, i32
  }
  func.func @transform_4(%arg0: i32) -> (i32, i32, i32) {
    %c0_i32 = arith.constant 0 : i32
    %c0_i32_0 = arith.constant 0 : i32
    %c0_i32_1 = arith.constant 0 : i32
    %c0_i32_2 = arith.constant 0 : i32
    return %c0_i32, %c0_i32_0, %c0_i32_1 : i32, i32, i32
  }
  func.func @transform_5(%arg0: i32) -> (i32, i32, i32) {
    %c0_i32 = arith.constant 0 : i32
    %c0_i32_0 = arith.constant 0 : i32
    %c0_i32_1 = arith.constant 0 : i32
    %c0_i32_2 = arith.constant 0 : i32
    return %c0_i32, %c0_i32_0, %c0_i32_1 : i32, i32, i32
  }
  func.func @transform_6(%arg0: i32) -> (i32, i32) {
    %c0_i32 = arith.constant 0 : i32
    %c0_i32_0 = arith.constant 0 : i32
    %c0_i32_1 = arith.constant 0 : i32
    return %c0_i32, %c0_i32_0 : i32, i32
  }
  func.func @transform_7(%arg0: i32) -> (i32, i32, i32) {
    %c0_i32 = arith.constant 0 : i32
    %c0_i32_0 = arith.constant 0 : i32
    %c0_i32_1 = arith.constant 0 : i32
    %c0_i32_2 = arith.constant 0 : i32
    return %c0_i32, %c0_i32_0, %c0_i32_1 : i32, i32, i32
  }
  func.func @transform_8(%arg0: i32) -> (i32, i32) {
    %c0_i32 = arith.constant 0 : i32
    %c0_i32_0 = arith.constant 0 : i32
    %c0_i32_1 = arith.constant 0 : i32
    return %c0_i32, %c0_i32_0 : i32, i32
  }
  func.func @transform_9(%arg0: i32) -> (i32, i32, i32) {
    %c0_i32 = arith.constant 0 : i32
    %c0_i32_0 = arith.constant 0 : i32
    %c0_i32_1 = arith.constant 0 : i32
    return %arg0, %c0_i32, %c0_i32_0 : i32, i32, i32
  }
}

</mosaic_0001>

<bundles_post_ra>
// kernel: forward.1
= control target key start
LH: loop header
LB: loop body
LE: loop exit
PB: predicated region body
PF: predicated region fallthrough
CT: control target
= control target key end

     0   :  { %14 = vsyncpa [#allocation3], 0  ;;  %s6919_s0 = inlined_call_operand.vmem [shape: bf16[2,256,4], index: 0, kind: input, shape index: {}]   ;;  %s6920_s1 = inlined_call_operand.vmem [shape: bf16[9,49,256], index: 1, kind: input, shape index: {}]   ;;  %s6921_s2 = inlined_call_operand.hbm [shape: bf16[9,4,32], index: 2, kind: input, shape index: {}]   ;;  %s6922_s3 = inlined_call_operand.vmem [shape: f32[1,32], index: 3, kind: input, shape index: {}]   ;;  %s6923_s4 = inlined_call_operand.hbm [shape: bf16[9,9,49], index: 4, kind: input, shape index: {}]   ;;  %s6924_s5 = inlined_call_operand.hbm [shape: bf16[9,32,64], index: 5, kind: input, shape index: {}]   ;;  %s6925_s6 = inlined_call_operand.vmem [shape: f32[1,64], index: 6, kind: input, shape index: {}]   ;;  %s6926_s7 = inlined_call_operand.hbm [shape: bf16[9,64,10], index: 7, kind: input, shape index: {}]   ;;  %s6927_s8 = inlined_call_operand.vmem [shape: f32[1,10], index: 8, kind: input, shape index: {}]   ;;  %s6928_s9 = inlined_call_operand.hbm [shape: f32[2,1,10], index: 9, kind: output, shape index: {}]  }
   0x1   :  { %15 = vsyncpa [#allocation6], 0 }
   0x2   :  { %16 = vsyncpa [#allocation9], 0 }
   0x3   :  { %17 = vsyncpa [#allocation4], 0 }
   0x4   :  { %19 = vsyncpa [#allocation4 + $0x1], 0  ;;  %s5931_s30 = smov 0   ;;  %s5933_s10 = smov 0  }
   0x5   :  { %s5935_s11 = smov 0   ;;  %s5937_s12 = smov 0  }
   0x6 LB: > { %s5952_s13 = sadd.s32 4294967295, %s5867_s12   ;;  %s4211_s14 = sadd.s32 4294967294, %s5867_s12   ;;  %s5867_s12 = sphi %s5937_s12, %s6951_s12   ;;  %s5863_s11 = sphi %s5935_s11, %s6950_s11   ;;  %s5859_s10 = sphi %s5933_s10, %s6949_s10   ;;  %s5855_s30 = sphi %s5931_s30, %s6948_s30  }
   0x7   : > { %s5956_s15 = sadd.s32 1, %s5867_s12   ;;  %s226_s16 = sadd.s32 1, %s5863_s11 }
   0x8   : > { %s223_s17 = ssub.s32 %s5867_s12, %s5956_s15  ;;  %p236_p0 = scmp.ne.s32.totalorder %s5863_s11, %s5859_s10 }
   0x9   : > { %p224_p1 = scmp.eq.s32.totalorder %s223_s17, 0  ;;  %p237_p2 = scmp.eq.s32.totalorder %s5952_s13, 1 }
   0xa   : > { %p242_p3 = scmp.ne.s32.totalorder %s5859_s10, %s5855_s30  ;;  %p243_p4 = scmp.eq.s32.totalorder %s4211_s14, 1 }
   0xb   : > { %s5967_s18 = scalar_select %p224_p1, %s5863_s11, %s226_s16  }
   0xc   : > { %p5969_p5 = por %p237_p2, %p236_p0  ;;  %p5973_p6 = por %p243_p4, %p242_p3 }
   0xd   : > { %6934 = sst [smem:[#allocation15_spill]] %s5967_s18  ;;  %p4212_p7 = scmp.ge.s32.totalorder %s5867_s12, 1 }
   0xe   : > { %p250_p8 = scmp.lt.s32.totalorder %s5867_s12, 3  ;;  %p6933_p9 = scmp.eq.s32.totalorder %s5952_s13, 0 }
   0xf   : > { %s5869_s22 = smov [#allocation5]   ;;  %s5870_s25 = smov [#allocation2]  }
  0x10   : > { %p5980_p10 = pnand %p4212_p7, %p250_p8  ;;  %s281_s23 = sshll.u32 %s5869_s22, 4  ;;  %s282_s23 = int_to_ptr.vmem [resolvable:$true] %s281_s23 }
  0x11   : > { %s265_s26 = sshll.u32 %s5870_s25, 4  ;;  %s5702_s27 = scalar_lea.vmem %s282_s23, 1152  ;;  %s266_s26 = int_to_ptr.vmem [resolvable:$true] %s265_s26 }
  0x12   : > { %p5428_p11 = pneg %p5980_p10  ;;  %p5703_p0 = scmp.ne.s32.totalorder %s282_s23, %s5702_s27 }
  0x13   : > { %p5710_p3 = scmp.lt.s32.totalorder %s282_s23, %s282_s23  ;;  %p5711_p4 = scmp.lt.s32.totalorder %s5702_s27, %s5702_s27 }
  0x14   : > { %p5988_p12 = pnand %p6933_p9, %p5428_p11 }
  0x15   : > { %p5712_p7 = por %p5711_p4, %p5710_p3 }
  0x16   : > { %p5693_p13 = pneg %p5988_p12 }
  0x18   : > { %p5705_p1 = pnand %p5703_p0, %p5693_p13 }
  0x1a   : > { %p5706_p2 = pneg %p5705_p1 }
  0x1c   : > { %p5713_p8 = pnand %p5712_p7, %p5706_p2 }
  0x1e   : > { %5716 = shalt.err (!%p5713_p8)
}
  0x1f   : > { %s6929_s28 = smov 64   ;;  %s6931_s29 = smov 4  }
  0x20   : > { %5434 = dma.hbm_to_vmem [thread:$0]  (!%p5988_p12), %s6923_s4, 1152, %s282_s23, [#allocation6], %s6929_s28, %s6929_s28, %s6931_s29  }
  0x21   : > { %s5728_s17 = scalar_lea.vmem %s266_s26, 288  ;;  %p5736_p2 = scmp.lt.s32.totalorder %s266_s26, %s266_s26 }
  0x22   : > { %p5729_p11 = scmp.ne.s32.totalorder %s266_s26, %s5728_s17  ;;  %p5737_p3 = scmp.lt.s32.totalorder %s5728_s17, %s5728_s17 }
  0x24   : > { %p5731_p0 = pnand %p5729_p11, %p5693_p13  ;;  %p5738_p4 = por %p5737_p3, %p5736_p2 }
  0x26   : > { %p5732_p1 = pneg %p5731_p0 }
  0x28   : > { %p5739_p7 = pnand %p5738_p4, %p5732_p1 }
  0x2a   : > { %5742 = shalt.err (!%p5739_p7)
}
  0x2b   : > { %s5873_s22 = smov 32   ;;  %s5874_s25 = smov 2  }
  0x2c   : > { %5431 = dma.hbm_to_vmem [thread:$0]  (!%p5988_p12), %s6921_s2, 288, %s266_s26, [#allocation3], %s5873_s22, %s5873_s22, %s5874_s25  }
  0x2d   : > { %s5875_s23 = smov [#allocation7]   ;;  %s5876_s16 = smov [#allocation8]  }
  0x2e   : > { %s294_s14 = sshll.u32 %s5875_s23, 4  ;;  %s310_s28 = sshll.u32 %s5876_s16, 4  ;;  %s295_s14 = int_to_ptr.vmem [resolvable:$true] %s294_s14  ;;  %s311_s28 = int_to_ptr.vmem [resolvable:$true] %s310_s28 }
  0x2f   : > { %s5754_s29 = scalar_lea.vmem %s295_s14, 2304  ;;  %p5762_p1 = scmp.lt.s32.totalorder %s295_s14, %s295_s14 }
  0x30   : > { %p5755_p8 = scmp.ne.s32.totalorder %s295_s14, %s5754_s29  ;;  %p5763_p2 = scmp.lt.s32.totalorder %s5754_s29, %s5754_s29 }
  0x32   : > { %p5757_p11 = pnand %p5755_p8, %p5693_p13  ;;  %p5764_p3 = por %p5763_p2, %p5762_p1 }
  0x34   : > { %p5758_p0 = pneg %p5757_p11 }
  0x36   : > { %p5765_p4 = pnand %p5764_p3, %p5758_p0 }
  0x38   : > { %5768 = shalt.err (!%p5765_p4)
}
  0x39   : > { %s6939_s18 = smov 4   ;;  %s6940_s26 = smov 64  }
  0x3a   : > { %5437 = dma.hbm_to_vmem [thread:$0]  (!%p5988_p12), %s6924_s5, 2304, %s295_s14, [#allocation6], %s6940_s26, %s6940_s26, %s6939_s18  }
  0x3b   : > { %s5780_s25 = scalar_lea.vmem %s311_s28, 4608  ;;  %p5788_p9 = scmp.lt.s32.totalorder %s311_s28, %s311_s28 }
  0x3c   : > { %p5781_p7 = scmp.ne.s32.totalorder %s311_s28, %s5780_s25  ;;  %p5789_p1 = scmp.lt.s32.totalorder %s5780_s25, %s5780_s25 }
  0x3e   : > { %p5783_p8 = pnand %p5781_p7, %p5693_p13  ;;  %p5790_p0 = por %p5789_p1, %p5788_p9 }
  0x40   : > { %p5784_p11 = pneg %p5783_p8 }
  0x42   : > { %p5791_p2 = pnand %p5790_p0, %p5784_p11 }
  0x44   : > { %5794 = shalt.err (!%p5791_p2)
}
  0x45   : > { %5440 = dma.hbm_to_vmem [thread:$0]  (!%p5988_p12), %s6926_s7, 4608, %s311_s28, [#allocation9], %s6940_s26, %s6940_s26, %s6939_s18  }
  0x46   : > { %337 = sbr.rel (%p5980_p10) target bundleno = 3813 (0xee5), region = 56  ;;  %p6941_p13 = scmp.eq.s32.totalorder (!%p5980_p10), %s5952_s13, 0 }
  0x4b   : > { %5838 = dma.done.wait (%p6941_p13), [#allocation3], 288   ;;  %p6942_p3 = pmov %p6941_p13 }
  0x4d   : > { %5840 = vsyncadd (%p6942_p3), [#allocation3], 4294967008  ;;  %p6943_p9 = pmov %p6942_p3 }
  0x4e   : > { %p6944_p4 = pmov %p6942_p3 }
  0x4f   : > { %5842 = dma.done.wait (%p6943_p9), [#allocation6], 3456  }
  0x50   : > { %5844 = vsyncadd (%p6944_p4), [#allocation6], 4294963840  ;;  %p6945_p7 = pmov %p6942_p3 }
  0x51   : > { %p6946_p12 = pmov %p6942_p3 }
  0x52   : > { %5846 = dma.done.wait (%p6945_p7), [#allocation9], 4608  }
  0x53   : > { %5848 = vsyncadd (%p6946_p12), [#allocation9], 4294962688  ;;  %p384_p10 = scmp.lt.s32.totalorder %s5952_s13, 1  ;;  %v5515_v11 = vld [vmem:[%s6920_s1 + $0x4] ss:$8 sps:$4 sm:$0xff]   ;;  %vm759_vm0 = vcmask 1041408  }
  0x54   : > { %v5518_v12 = vld [vmem:[%s6920_s1 + $0x3c] ss:$8 sps:$4 sm:$0xff]   ;;  %594 = vmatprep.mubr.bf16.mxu0 %v5515_v11  ;;  %v745_v18 = vld [vmem:[#allocation2 + $0x2] sm:$0x3]  ;;  %v5521_v22 = vld [vmem:[%s6920_s1 + $0x4c] ss:$8 sps:$4 sm:$0xff]  }
  0x55   : > { %s385_s21 = scalar_select %p384_p10, %s5952_s13, 1  ;;  %708 = vmatprep.mubr.bf16.mxu1 %v5518_v12  ;;  %v5513_v19 = vld [vmem:[%s6920_s1] ss:$8 sps:$4 sm:$0xff]   ;;  %v5519_v21 = vld [vmem:[%s6920_s1 + $0x14] ss:$8 sps:$4 sm:$0xff]   ;;  %v761_v23 = vsel %vm759_vm0, %v745_v18, 0 }
  0x56   : > { %v5516_v20 = vld [vmem:[%s6920_s1 + $0x38] ss:$8 sps:$4 sm:$0xff]   ;;  %v5524_v25 = vld [vmem:[%s6920_s1 + $0x48] ss:$8 sps:$4 sm:$0xff]   ;;  %v5525_v26 = vld [vmem:[%s6920_s1 + $0x24] ss:$8 sps:$4 sm:$0xff]  }
  0x57   : > { %s4500_s24 = sshll.u32 %s385_s21, 7  ;;  %v5523_v24 = vld [vmem:[%s6920_s1 + $0x10] ss:$8 sps:$4 sm:$0xff]   ;;  %v5527_v27 = vld [vmem:[%s6920_s1 + $0x5c] ss:$8 sps:$4 sm:$0xff]   ;;  %vm746_vm1 = vcmask 31744  }
  0x58   : > { %s6054_s14 = scalar_lea.vmem %s6919_s0, %s4500_s24  ;;  %v428_v28 = vld [vmem:[%s6920_s1 + $0x30] sm:$0x11]  ;;  %v4255_v29 = vld [vmem:[%s6920_s1 + $0x68] sm:$0x11]  ;;  %v5530_v31 = vld [vmem:[%s6920_s1 + $0x58] ss:$8 sps:$4 sm:$0xff]  }
  0x59   : > { %v6057_v0 = vld [vmem:[%s6054_s14 + $0x78] sm:$0xff]   ;;  %v6065_v2 = vld [vmem:[%s6054_s14 + $0x70] sm:$0xff]   ;;  %v6075_v4 = vld [vmem:[%s6054_s14 + $0x68] sm:$0xff]   ;;  %v4232_v32 = vcombine.high %v428_v28, %v428_v28  ;;  %v4263_v33 = vcombine.high %v4255_v29, %v4255_v29  ;;  %v4231_v34 = vcombine.low %v428_v28, %v428_v28  ;;  %v4262_v35 = vcombine.low %v4255_v29, %v4255_v29  ;;  %s382_s27 = sand.u32 1, %s5859_s10   ;;  %s4497_s21 = sshll.u32 %s5952_s13, 4 }
  0x5a   : > { %v6060_v1 = vld [vmem:[%s6054_s14 + $0x38] sm:$0xff]   ;;  %4501 = vmatprep.subr.bf16.mxu0 %v6057_v0  ;;  %4541 = vmatprep.subr.bf16.mxu1 %v6057_v0  ;;  %v6070_v3 = vld [vmem:[%s6054_s14 + $0x30] sm:$0xff]   ;;  %v6080_v5 = vld [vmem:[%s6054_s14 + $0x28] sm:$0xff]   ;;  %vm5878_vm2 = vmmov 0   ;;  %vm2349_vm3 = vcmask 1040384   ;;  %vm2345_vm4 = vcmask 400384   ;;  %s6878_s18 = scalar_lea.hbm %s6928_s9, %s4497_s21 }
  0x5b   : > { %4502 = vmatpush3.bf16.msra.mxu0 %v6060_v1  ;;  %4542 = vmatpush3.bf16.msra.mxu1 %v6060_v1  ;;  %v6085_v6 = vld [vmem:[%s6054_s14 + $0x60] sm:$0xff]   ;;  %v6095_v8 = vld [vmem:[%s6054_s14 + $0x58] sm:$0xff]   ;;  %v6105_v10 = vld [vmem:[%s6054_s14 + $0x50] sm:$0xff]   ;;  %vm2471_vm5 = vcmask 261120   ;;  %vm3429_vm6 = vcmask 523264   ;;  %s383_s24 = scalar_lea.vmem [#allocation10], %s382_s27 }
  0x5c   : > { %4503 = vmatprep.subr.bf16.mxu0 %v6065_v2  ;;  %4543 = vmatprep.subr.bf16.mxu1 %v6065_v2  ;;  %v6090_v7 = vld [vmem:[%s6054_s14 + $0x20] sm:$0xff]   ;;  %v6100_v9 = vld [vmem:[%s6054_s14 + $0x18] sm:$0xff]   ;;  %v6116_v13 = vld [vmem:[%s6054_s14 + $0x10] sm:$0xff]   ;;  %s4115_s28 = sshll.u32 %s383_s24, 4  ;;  %vm4100_vm7 = vcmask 73728   ;;  %s4103_s13 = scalar_lea.sflag [#allocation4], %s382_s27  ;;  %s6880_s28 = int_to_ptr.vmem [resolvable:$true] %s4115_s28 }
  0x5d   : > { %v6121_v14 = vld [vmem:[%s6054_s14 + $0x48] sm:$0xff]   ;;  %v6131_v16 = vld [vmem:[%s6054_s14 + $0x40] sm:$0xff]   ;;  %s5795_s26 = scalar_lea.vmem %s6880_s28, 16  ;;  %s5880_s17 = smov [#allocation10]  }
  0x5e   : > { %v6126_v15 = vld [vmem:[%s6054_s14 + $0x8] sm:$0xff]   ;;  %v6134_v17 = vld [vmem:[%s6054_s14] sm:$0xff]   ;;  %p5796_p8 = scmp.ne.s32.totalorder %s6880_s28, %s5795_s26  ;;  %s5799_s22 = sshll.u32 %s5880_s17, 4  ;;  %s5800_s22 = int_to_ptr.vmem [resolvable:$false] %s5799_s22 }
  0x5f   : > { %4504 = vmatpush3.bf16.msra.mxu0 %v6070_v3  ;;  %4544 = vmatpush3.bf16.msra.mxu1 %v6070_v3  ;;  %v5529_v30 = vld [vmem:[%s6920_s1 + $0x20] ss:$8 sps:$4 sm:$0xff]   ;;  %s5801_s25 = scalar_lea.vmem %s5800_s22, 32  ;;  %p5802_p0 = scmp.lt.s32.totalorder %s6880_s28, %s5800_s22 }
  0x60   : > { %4505 = vmatprep.subr.bf16.mxu0 %v6075_v4  ;;  %4545 = vmatprep.subr.bf16.mxu1 %v6075_v4  ;;  %v630_v36 = vld [vmem:[#allocation2] sm:$0x3]  ;;  %p5797_p11 = pnand %p5796_p8, %p5969_p5  ;;  %p5803_p2 = scmp.lt.s32.totalorder %s5801_s25, %s5795_s26 }
  0x61   : > { %v840_v37 = vsel %vm759_vm0, %v630_v36, 0 }
  0x62   : > { %p5798_p1 = pneg %p5797_p11  ;;  %p5804_p13 = por %p5803_p2, %p5802_p0 }
  0x63   : > { %4506 = vmatpush3.bf16.msra.mxu0 %v6080_v5  ;;  %4546 = vmatpush3.bf16.msra.mxu1 %v6080_v5 }
  0x64   : > { %4507 = vmatprep.subr.bf16.mxu0 %v6085_v6  ;;  %4547 = vmatprep.subr.bf16.mxu1 %v6085_v6  ;;  %p5805_p3 = pnand %p5804_p13, %p5798_p1 }
  0x67   : > { %4508 = vmatpush3.bf16.msra.mxu0 %v6090_v7  ;;  %4548 = vmatpush3.bf16.msra.mxu1 %v6090_v7 }
  0x68   : > { %4509 = vmatprep.subr.bf16.mxu0 %v6095_v8  ;;  %4549 = vmatprep.subr.bf16.mxu1 %v6095_v8 }
  0x6b   : > { %4510 = vmatpush3.bf16.msra.mxu0 %v6100_v9  ;;  %4550 = vmatpush3.bf16.msra.mxu1 %v6100_v9 }
  0x6c   : > { %4511 = vmatprep.subr.bf16.mxu0 %v6105_v10  ;;  %4551 = vmatprep.subr.bf16.mxu1 %v6105_v10 }
  0x6f   : > { %4512 = vmatpush3.bf16.msra.mxu0 %v6116_v13  ;;  %4552 = vmatpush3.bf16.msra.mxu1 %v6116_v13 }
  0x70   : > { %4513 = vmatprep.subr.bf16.mxu0 %v6121_v14  ;;  %4553 = vmatprep.subr.bf16.mxu1 %v6121_v14 }
  0x73   : > { %4514 = vmatpush3.bf16.msra.mxu0 %v6126_v15  ;;  %4554 = vmatpush3.bf16.msra.mxu1 %v6126_v15 }
  0x74   : > { %4515 = vmatprep.subr.bf16.mxu0 %v6131_v16  ;;  %4555 = vmatprep.subr.bf16.mxu1 %v6131_v16 }
  0x77   : > { %4516 = vmatpush3.bf16.msra.mxu0 %v6134_v17  ;;  %4556 = vmatpush3.bf16.msra.mxu1 %v6134_v17 }
  0x78   : > { %5401 = vmatprep.subr.msk.bf16.mxu0 %vm759_vm0, %v745_v18  ;;  %5402 = vmatprep.subr.msk.bf16.mxu1 %vm759_vm0, %v630_v36 }
  0x7a   : > { %595 = vmatmul.mubr.bf16.vlgmr.msra.gmra.mxu0 %v5513_v19  ;;  %709 = vmatmul.mubr.bf16.vlgmr.msra.gmra.mxu1 %v5516_v20 }
  0x7b   : > { %602 = vmatprep.mubr.bf16.mxu0 %v5519_v21  ;;  %716 = vmatprep.mubr.bf16.mxu1 %v5521_v22 }
  0x7c   : > { %5024 = vmatpush3.bf16.msra.mxu0 %v761_v23  ;;  %5034 = vmatpush3.bf16.msra.mxu1 %v840_v37 }
  0x7d   : > { %4591 = vmatprep.subr.bf16.mxu0 %v6057_v0 }
  0x82   : > { %603 = vmatmul.mubr.bf16.gmra.mxu0 %v5523_v24  ;;  %717 = vmatmul.mubr.bf16.gmra.mxu1 %v5524_v25 }
  0x83   : > { %610 = vmatprep.mubr.bf16.mxu0 %v5525_v26  ;;  %724 = vmatprep.mubr.bf16.mxu1 %v5527_v27 }
  0x8a   : > { %611 = vmatmul.mubr.bf16.gmra.mxu0 %v5529_v30  ;;  %725 = vmatmul.mubr.bf16.gmra.mxu1 %v5530_v31 }
  0x8b   : > { %618 = vmatprep.mubr.bf16.mxu0 %v4232_v32  ;;  %732 = vmatprep.mubr.bf16.mxu1 %v4263_v33 }
  0x92   : > { %619 = vmatmul.mubr.bf16.gmra.mxu0 %v4231_v34  ;;  %733 = vmatmul.mubr.bf16.gmra.mxu1 %v4262_v35 }
 0x13a   : > { %v4517_v38 = vpop.f32.mrf.mxu0  ;;  %v4557_v39 = vpop.f32.mrf.mxu1 }
 0x13c   : > { %v4518_v40 = vpop.f32.mrf.mxu0  ;;  %v4558_v41 = vpop.f32.mrf.mxu1 }
 0x13d   : > { %v4519_v44 = vadd.f32 %v4518_v40, %v4517_v38  ;;  %v4559_v47 = vadd.f32 %v4558_v41, %v4557_v39  ;;  %v5537_v39 = vld [vmem:[%s6920_s1 + $0x74] ss:$8 sps:$4 sm:$0xff]  }
 0x13e   : > { %v4520_v42 = vpop.f32.mrf.mxu0  ;;  %v4560_v43 = vpop.f32.mrf.mxu1 }
 0x140   : > { %v4521_v45 = vpop.f32.mrf.mxu0  ;;  %v4561_v46 = vpop.f32.mrf.mxu1 }
 0x141   : > { %v4522_v48 = vadd.f32 %v4521_v45, %v4520_v42  ;;  %v4562_v49 = vadd.f32 %v4561_v46, %v4560_v43  ;;  %v5535_v45 = vld [vmem:[%s6920_s1 + $0x70] ss:$8 sps:$4 sm:$0xff]   ;;  %v5538_v46 = vld [vmem:[%s6920_s1 + $0x84] ss:$8 sps:$4 sm:$0xff]  }
 0x142   : > { %v4523_v50 = vpop.f32.mrf.mxu0  ;;  %v4563_v51 = vpop.f32.mrf.mxu1 }
 0x143   : > { %v626_v52 = vpack.c.bf16 %v4522_v48, %v4519_v44  ;;  %v740_v53 = vpack.c.bf16 %v4562_v49, %v4559_v47  ;;  %v5540_v47 = vld [vmem:[%s6920_s1 + $0x80] ss:$8 sps:$4 sm:$0xff]   ;;  %v5541_v48 = vld [vmem:[%s6920_s1 + $0x94] ss:$8 sps:$4 sm:$0xff]  }
 0x144   : > { %v4524_v54 = vpop.f32.mrf.mxu0  ;;  %v4564_v55 = vpop.f32.mrf.mxu1  ;;  %v4278_v49 = vld [vmem:[%s6920_s1 + $0xa0] sm:$0x11] }
 0x145   : > { %5025 = vmatprep.mubr.msk.bf16.mxu0 %vm746_vm1, %v740_v53  ;;  %5035 = vmatprep.mubr.msk.bf16.mxu1 %vm746_vm1, %v626_v52  ;;  %v4525_v58 = vadd.f32 %v4524_v54, %v4523_v50  ;;  %v4565_v61 = vadd.f32 %v4564_v55, %v4563_v51  ;;  %v5543_v50 = vld [vmem:[%s6920_s1 + $0x90] ss:$8 sps:$4 sm:$0xff]   ;;  %v4286_v51 = vcombine.high %v4278_v49, %v4278_v49  ;;  %v1020_v53 = vld [vmem:[#allocation2 + $0x4] sm:$0x3] }
 0x146   : > { %v4526_v56 = vpop.f32.mrf.mxu0  ;;  %v4566_v57 = vpop.f32.mrf.mxu1  ;;  %v4285_v52 = vcombine.low %v4278_v49, %v4278_v49  ;;  %5403 = vmatprep.subr.msk.bf16.mxu1 %vm759_vm0, %v1020_v53  ;;  %v1034_v54 = vsel %vm759_vm0, %v1020_v53, 0 }
 0x148   : > { %v4527_v59 = vpop.f32.mrf.mxu0  ;;  %v4567_v60 = vpop.f32.mrf.mxu1 }
 0x149   : > { %v4528_v62 = vadd.f32 %v4527_v59, %v4526_v56  ;;  %v4568_v63 = vadd.f32 %v4567_v60, %v4566_v57 }
 0x14a   : > { %v4529_v11 = vpop.f32.mrf.mxu0  ;;  %v4569_v12 = vpop.f32.mrf.mxu1 }
 0x14b   : > { %v627_v18 = vpack.c.bf16 %v4528_v62, %v4525_v58  ;;  %v741_v19 = vpack.c.bf16 %v4568_v63, %v4565_v61 }
 0x14c   : > { %v4530_v20 = vpop.f32.mrf.mxu0  ;;  %v4570_v21 = vpop.f32.mrf.mxu1 }
 0x14d   : > { %5026 = vmatmul.mubr.msk.bf16.vlgmr.msra.gmra.mxu0 %vm746_vm1, %v741_v19  ;;  %5036 = vmatmul.mubr.msk.bf16.vlgmr.msra.gmra.mxu1 %vm746_vm1, %v627_v18  ;;  %v4531_v24 = vadd.f32 %v4530_v20, %v4529_v11  ;;  %v4571_v25 = vadd.f32 %v4570_v21, %v4569_v12 }
 0x14e   : > { %4592 = vmatpush3.bf16.msra.mxu0 %v6060_v1  ;;  %v4532_v22 = vpop.f32.mrf.mxu0  ;;  %v4572_v23 = vpop.f32.mrf.mxu1  ;;  %5044 = vmatpush3.bf16.msra.mxu1 %v1034_v54 }
 0x14f   : > { %4593 = vmatprep.subr.bf16.mxu0 %v6065_v2  ;;  %4636 = vmatprep.subr.bf16.mxu1 %v6057_v0 }
 0x150   : > { %v4533_v26 = vpop.f32.mrf.mxu0  ;;  %v4573_v27 = vpop.f32.mrf.mxu1 }
 0x151   : > { %v4534_v28 = vadd.f32 %v4533_v26, %v4532_v22  ;;  %v4574_v29 = vadd.f32 %v4573_v27, %v4572_v23 }
 0x152   : > { %4594 = vmatpush3.bf16.msra.mxu0 %v6070_v3  ;;  %v4535_v30 = vpop.f32.mrf.mxu0  ;;  %v4575_v31 = vpop.f32.mrf.mxu1 }
 0x153   : > { %v628_v32 = vpack.c.bf16 %v4534_v28, %v4531_v24  ;;  %v742_v33 = vpack.c.bf16 %v4574_v29, %v4571_v25  ;;  %4595 = vmatprep.subr.bf16.mxu0 %v6075_v4 }
 0x154   : > { %v4536_v34 = vpop.f32.mrf.mxu0  ;;  %v4576_v35 = vpop.f32.mrf.mxu1 }
 0x155   : > { %v4537_v36 = vadd.f32 %v4536_v34, %v4535_v30  ;;  %v4577_v37 = vadd.f32 %v4576_v35, %v4575_v31  ;;  %5029 = vmatprep.mubr.msk.bf16.mxu0 %vm746_vm1, %v742_v33  ;;  %5039 = vmatprep.mubr.msk.bf16.mxu1 %vm746_vm1, %v628_v32 }
 0x156   : > { %4596 = vmatpush3.bf16.msra.mxu0 %v6080_v5  ;;  %v4578_v38 = vpop.f32.mrf.mxu1  ;;  %v4538_v40 = vpop.f32.mrf.mxu0 }
 0x157   : > { %v629_v41 = vpack.c.bf16 %v4537_v36, %v4537_v36  ;;  %v743_v42 = vpack.c.bf16 %v4577_v37, %v4577_v37  ;;  %4597 = vmatprep.subr.bf16.mxu0 %v6085_v6 }
 0x158   : > { %v4579_v43 = vpop.f32.mrf.mxu1  ;;  %v4539_v44 = vpop.f32.mrf.mxu0 }
 0x159   : > { %5030 = vmatmul.mubr.msk.bf16.gmra.mxu0 %vm746_vm1, %v743_v42  ;;  %5040 = vmatmul.mubr.msk.bf16.gmra.mxu1 %vm746_vm1, %v629_v41 }
 0x15a   : > { %4598 = vmatpush3.bf16.msra.mxu0 %v6090_v7  ;;  %983 = vmatprep.mubr.bf16.mxu0 %v5537_v39 }
 0x15b   : > { %4599 = vmatprep.subr.bf16.mxu0 %v6095_v8 }
 0x15e   : > { %4600 = vmatpush3.bf16.msra.mxu0 %v6100_v9 }
 0x15f   : > { %4601 = vmatprep.subr.bf16.mxu0 %v6105_v10 }
 0x162   : > { %4602 = vmatpush3.bf16.msra.mxu0 %v6116_v13 }
 0x163   : > { %4603 = vmatprep.subr.bf16.mxu0 %v6121_v14 }
 0x166   : > { %4604 = vmatpush3.bf16.msra.mxu0 %v6126_v15 }
 0x167   : > { %4605 = vmatprep.subr.bf16.mxu0 %v6131_v16 }
 0x16a   : > { %4606 = vmatpush3.bf16.msra.mxu0 %v6134_v17 }
 0x16d   : > { %984 = vmatmul.mubr.bf16.vlgmr.msra.gmra.mxu0 %v5535_v45 }
 0x16e   : > { %991 = vmatprep.mubr.bf16.mxu0 %v5538_v46 }
 0x175   : > { %992 = vmatmul.mubr.bf16.gmra.mxu0 %v5540_v47 }
 0x176   : > { %999 = vmatprep.mubr.bf16.mxu0 %v5541_v48 }
 0x17d   : > { %1000 = vmatmul.mubr.bf16.gmra.mxu0 %v5543_v50 }
 0x17e   : > { %1007 = vmatprep.mubr.bf16.mxu0 %v4286_v51 }
 0x185   : > { %1008 = vmatmul.mubr.bf16.gmra.mxu0 %v4285_v52  ;;  %v5548_v52 = vld [vmem:[%s6920_s1 + $0xac] ss:$8 sps:$4 sm:$0xff]  }
 0x20d   : > { %v5027_v55 = vpop.f32.mrf.mxu0  ;;  %v5037_v56 = vpop.f32.mrf.mxu1 }
 0x20e   : > { %v6230_v57 = vadd.f32 %v5037_v56, %v5027_v55  ;;  %v5546_v55 = vld [vmem:[%s6920_s1 + $0xa8] ss:$8 sps:$4 sm:$0xff]   ;;  %v5549_v56 = vld [vmem:[%s6920_s1 + $0xbc] ss:$8 sps:$4 sm:$0xff]  }
 0x20f   : > { %v797_v58 = vpop.f32.mrf.mxu0  ;;  %v876_v59 = vpop.f32.mrf.mxu1 }
 0x210   : > { %v6232_v60 = vadd.f32 %v876_v59, %v797_v58  ;;  %v5551_v58 = vld [vmem:[%s6920_s1 + $0xb8] ss:$8 sps:$4 sm:$0xff]   ;;  %v5552_v59 = vld [vmem:[%s6920_s1 + $0xcc] ss:$8 sps:$4 sm:$0xff]  }
 0x211   : > { %v5028_v61 = vpop.f32.mrf.mxu0  ;;  %v5038_v62 = vpop.f32.mrf.mxu1 }
 0x212   : > { %v6234_v63 = vadd.f32 %v5038_v62, %v5028_v61 }
 0x213   : > { %v6236_v11 = vpop.f32.mrf.mxu0  ;;  %v6238_v12 = vpop.f32.mrf.mxu1 }
 0x219   : > { %v5031_v18 = vpop.f32.mrf.mxu0  ;;  %v5041_v19 = vpop.f32.mrf.mxu1 }
 0x21a   : > { %v6240_v20 = vadd.f32 %v5041_v19, %v5031_v18 }
 0x21b   : > { %v813_v21 = vpop.f32.mrf.mxu0  ;;  %v892_v22 = vpop.f32.mrf.mxu1 }
 0x21c   : > { %v6242_v23 = vadd.f32 %v892_v22, %v813_v21 }
 0x21d   : > { %v5032_v24 = vpop.f32.mrf.mxu0  ;;  %v5042_v25 = vpop.f32.mrf.mxu1 }
 0x21f   : > { %v6244_v26 = vpop.f32.mrf.mxu0  ;;  %v6326_v61 = vpop.f32.mrf.mxu1 }
 0x22d   : > { %v4607_v27 = vpop.f32.mrf.mxu0 }
 0x22f   : > { %v4608_v28 = vpop.f32.mrf.mxu0 }
 0x230   : > { %v4609_v31 = vadd.f32 %v4608_v28, %v4607_v27 }
 0x231   : > { %v4610_v29 = vpop.f32.mrf.mxu0 }
 0x233   : > { %v4611_v30 = vpop.f32.mrf.mxu0 }
 0x234   : > { %v4612_v32 = vadd.f32 %v4611_v30, %v4610_v29 }
 0x235   : > { %v4613_v33 = vpop.f32.mrf.mxu0 }
 0x236   : > { %v1015_v34 = vpack.c.bf16 %v4612_v32, %v4609_v31 }
 0x237   : > { %v4614_v35 = vpop.f32.mrf.mxu0 }
 0x238   : > { %5045 = vmatprep.mubr.msk.bf16.mxu1 %vm746_vm1, %v1015_v34  ;;  %v4615_v38 = vadd.f32 %v4614_v35, %v4613_v33 }
 0x239   : > { %v4616_v36 = vpop.f32.mrf.mxu0 }
 0x23b   : > { %v4617_v37 = vpop.f32.mrf.mxu0 }
 0x23c   : > { %v4618_v39 = vadd.f32 %v4617_v37, %v4616_v36 }
 0x23d   : > { %v4619_v40 = vpop.f32.mrf.mxu0 }
 0x23e   : > { %v1016_v41 = vpack.c.bf16 %v4618_v39, %v4615_v38 }
 0x23f   : > { %v4620_v42 = vpop.f32.mrf.mxu0 }
 0x240   : > { %5046 = vmatmul.mubr.msk.bf16.vlgmr.msra.gmra.mxu1 %vm746_vm1, %v1016_v41  ;;  %v4621_v44 = vadd.f32 %v4620_v42, %v4619_v40 }
 0x241   : > { %4637 = vmatpush3.bf16.msra.mxu1 %v6060_v1  ;;  %v4622_v43 = vpop.f32.mrf.mxu0 }
 0x242   : > { %4638 = vmatprep.subr.bf16.mxu1 %v6065_v2 }
 0x243   : > { %v4623_v45 = vpop.f32.mrf.mxu0 }
 0x244   : > { %v4624_v46 = vadd.f32 %v4623_v45, %v4622_v43 }
 0x245   : > { %4639 = vmatpush3.bf16.msra.mxu1 %v6070_v3  ;;  %v4625_v47 = vpop.f32.mrf.mxu0 }
 0x246   : > { %v1017_v48 = vpack.c.bf16 %v4624_v46, %v4621_v44  ;;  %4640 = vmatprep.subr.bf16.mxu1 %v6075_v4  ;;  %v6351_v46 = vld [vmem:[%s6054_s14 + $0x78] sm:$0xff]  }
 0x247   : > { %v4626_v49 = vpop.f32.mrf.mxu0 }
 0x248   : > { %v4627_v50 = vadd.f32 %v4626_v49, %v4625_v47  ;;  %5049 = vmatprep.mubr.msk.bf16.mxu1 %vm746_vm1, %v1017_v48 }
 0x249   : > { %4641 = vmatpush3.bf16.msra.mxu1 %v6080_v5  ;;  %v4628_v51 = vpop.f32.mrf.mxu0 }
 0x24a   : > { %v1018_v53 = vpack.c.bf16 %v4627_v50, %v4627_v50  ;;  %4642 = vmatprep.subr.bf16.mxu1 %v6085_v6 }
 0x24b   : > { %v4629_v54 = vpop.f32.mrf.mxu0 }
 0x24c   : > { %5050 = vmatmul.mubr.msk.bf16.gmra.mxu1 %vm746_vm1, %v1018_v53 }
 0x24d   : > { %4643 = vmatpush3.bf16.msra.mxu1 %v6090_v7  ;;  %1184 = vmatprep.mubr.bf16.mxu1 %v5548_v52 }
 0x24e   : > { %4644 = vmatprep.subr.bf16.mxu1 %v6095_v8 }
 0x251   : > { %4645 = vmatpush3.bf16.msra.mxu1 %v6100_v9 }
 0x252   : > { %4646 = vmatprep.subr.bf16.mxu1 %v6105_v10 }
 0x255   : > { %4647 = vmatpush3.bf16.msra.mxu1 %v6116_v13 }
 0x256   : > { %4648 = vmatprep.subr.bf16.mxu1 %v6121_v14 }
 0x259   : > { %4649 = vmatpush3.bf16.msra.mxu1 %v6126_v15 }
 0x25a   : > { %4650 = vmatprep.subr.bf16.mxu1 %v6131_v16 }
 0x25d   : > { %4651 = vmatpush3.bf16.msra.mxu1 %v6134_v17 }
 0x25e   : > { %4681 = vmatprep.subr.bf16.mxu1 %v6057_v0  ;;  %v4297_v0 = vld [vmem:[%s6920_s1 + $0xd8] sm:$0x11] }
 0x260   : > { %1185 = vmatmul.mubr.bf16.vlgmr.msra.gmra.mxu1 %v5546_v55 }
 0x261   : > { %4682 = vmatpush3.bf16.msra.mxu1 %v6060_v1  ;;  %1192 = vmatprep.mubr.bf16.mxu1 %v5549_v56  ;;  %v5554_v1 = vld [vmem:[%s6920_s1 + $0xc8] ss:$8 sps:$4 sm:$0xff]  }
 0x262   : > { %4683 = vmatprep.subr.bf16.mxu1 %v6065_v2  ;;  %v4305_v2 = vcombine.high %v4297_v0, %v4297_v0 }
 0x265   : > { %4684 = vmatpush3.bf16.msra.mxu1 %v6070_v3  ;;  %v4304_v3 = vcombine.low %v4297_v0, %v4297_v0 }
 0x266   : > { %4685 = vmatprep.subr.bf16.mxu1 %v6075_v4  ;;  %v5559_v4 = vld [vmem:[%s6920_s1 + $0xe4] ss:$8 sps:$4 sm:$0xff]  }
 0x268   : > { %1193 = vmatmul.mubr.bf16.gmra.mxu1 %v5551_v58 }
 0x269   : > { %4686 = vmatpush3.bf16.msra.mxu1 %v6080_v5  ;;  %1200 = vmatprep.mubr.bf16.mxu1 %v5552_v59  ;;  %v5557_v5 = vld [vmem:[%s6920_s1 + $0xe0] ss:$8 sps:$4 sm:$0xff]  }
 0x26a   : > { %4687 = vmatprep.subr.bf16.mxu1 %v6085_v6  ;;  %v5560_v6 = vld [vmem:[%s6920_s1 + $0xf4] ss:$8 sps:$4 sm:$0xff]  }
 0x26d   : > { %4688 = vmatpush3.bf16.msra.mxu1 %v6090_v7  ;;  %v5562_v7 = vld [vmem:[%s6920_s1 + $0xf0] ss:$8 sps:$4 sm:$0xff]  }
 0x26e   : > { %4689 = vmatprep.subr.bf16.mxu1 %v6095_v8  ;;  %v5563_v8 = vld [vmem:[%s6920_s1 + $0x104] ss:$8 sps:$4 sm:$0xff]  }
 0x270   : > { %1201 = vmatmul.mubr.bf16.gmra.mxu1 %v5554_v1 }
 0x271   : > { %4690 = vmatpush3.bf16.msra.mxu1 %v6100_v9  ;;  %1208 = vmatprep.mubr.bf16.mxu1 %v4305_v2  ;;  %v4316_v9 = vld [vmem:[%s6920_s1 + $0x110] sm:$0x11] }
 0x272   : > { %4691 = vmatprep.subr.bf16.mxu1 %v6105_v10  ;;  %v5565_v10 = vld [vmem:[%s6920_s1 + $0x100] ss:$8 sps:$4 sm:$0xff]  }
 0x275   : > { %4692 = vmatpush3.bf16.msra.mxu1 %v6116_v13  ;;  %v4324_v13 = vcombine.high %v4316_v9, %v4316_v9 }
 0x276   : > { %4693 = vmatprep.subr.bf16.mxu1 %v6121_v14  ;;  %v4323_v14 = vcombine.low %v4316_v9, %v4316_v9 }
 0x278   : > { %1209 = vmatmul.mubr.bf16.gmra.mxu1 %v4304_v3 }
 0x279   : > { %4694 = vmatpush3.bf16.msra.mxu1 %v6126_v15  ;;  %1385 = vmatprep.mubr.bf16.mxu1 %v5559_v4  ;;  %v1221_v15 = vld [vmem:[#allocation2 + $0x6] sm:$0x3] }
 0x27a   : > { %4695 = vmatprep.subr.bf16.mxu1 %v6131_v16  ;;  %5404 = vmatprep.subr.msk.bf16.mxu0 %vm759_vm0, %v1221_v15  ;;  %v1235_v16 = vsel %vm759_vm0, %v1221_v15, 0 }
 0x27b   : > { %5054 = vmatpush3.bf16.msra.mxu0 %v1235_v16  ;;  %v6359_v16 = vld [vmem:[%s6054_s14 + $0x38] sm:$0xff]  }
 0x27d   : > { %4696 = vmatpush3.bf16.msra.mxu1 %v6134_v17  ;;  %v1422_v17 = vld [vmem:[#allocation2 + $0x8] sm:$0x3] }
 0x27e   : > { %5405 = vmatprep.subr.msk.bf16.mxu0 %vm759_vm0, %v1422_v17  ;;  %v1436_v43 = vsel %vm759_vm0, %v1422_v17, 0 }
 0x280   : > { %1386 = vmatmul.mubr.bf16.vlgmr.msra.gmra.mxu1 %v5557_v5 }
 0x281   : > { %1393 = vmatprep.mubr.bf16.mxu1 %v5560_v6 }
 0x288   : > { %1394 = vmatmul.mubr.bf16.gmra.mxu1 %v5562_v7 }
 0x289   : > { %1401 = vmatprep.mubr.bf16.mxu1 %v5563_v8 }
 0x290   : > { %1402 = vmatmul.mubr.bf16.gmra.mxu1 %v5565_v10 }
 0x291   : > { %1409 = vmatprep.mubr.bf16.mxu1 %v4324_v13 }
 0x298   : > { %1410 = vmatmul.mubr.bf16.gmra.mxu1 %v4323_v14 }
 0x300   : > { %v5047_v62 = vpop.f32.mrf.mxu1 }
 0x301   : > { %v6329_v18 = vadd.f32 %v5047_v62, %v6230_v57 }
 0x302   : > { %v1070_v19 = vpop.f32.mrf.mxu1 }
 0x303   : > { %v6332_v21 = vadd.f32 %v1070_v19, %v6232_v60  ;;  %v6363_v19 = vld [vmem:[%s6054_s14 + $0x70] sm:$0xff]  }
 0x304   : > { %v5048_v22 = vpop.f32.mrf.mxu1 }
 0x305   : > { %v6335_v24 = vadd.f32 %v5048_v22, %v6234_v63 }
 0x306   : > { %v6337_v25 = vpop.f32.mrf.mxu1 }
 0x30c   : > { %v5051_v27 = vpop.f32.mrf.mxu1 }
 0x30d   : > { %v6340_v28 = vadd.f32 %v5051_v27, %v6240_v20 }
 0x30e   : > { %v1086_v29 = vpop.f32.mrf.mxu1 }
 0x30f   : > { %v6343_v30 = vadd.f32 %v1086_v29, %v6242_v23  ;;  %v6367_v29 = vld [vmem:[%s6054_s14 + $0x30] sm:$0xff]  }
 0x310   : > { %v5052_v57 = vpop.f32.mrf.mxu1 }
 0x312   : > { %v6345_v31 = vpop.f32.mrf.mxu1 }
 0x320   : > { %v4652_v32 = vpop.f32.mrf.mxu1 }
 0x322   : > { %v4653_v60 = vpop.f32.mrf.mxu1 }
 0x323   : > { %v4654_v35 = vadd.f32 %v4653_v60, %v4652_v32  ;;  %v6371_v60 = vld [vmem:[%s6054_s14 + $0x68] sm:$0xff]  }
 0x324   : > { %v4655_v33 = vpop.f32.mrf.mxu1 }
 0x326   : > { %v4656_v34 = vpop.f32.mrf.mxu1 }
 0x327   : > { %v4657_v63 = vadd.f32 %v4656_v34, %v4655_v33 }
 0x328   : > { %v4658_v36 = vpop.f32.mrf.mxu1 }
 0x329   : > { %v1216_v37 = vpack.c.bf16 %v4657_v63, %v4654_v35  ;;  %v6376_v35 = vld [vmem:[%s6054_s14 + $0x28] sm:$0xff]  }
 0x32a   : > { %v4659_v38 = vpop.f32.mrf.mxu1 }
 0x32b   : > { %5055 = vmatprep.mubr.msk.bf16.mxu0 %vm746_vm1, %v1216_v37  ;;  %v4660_v40 = vadd.f32 %v4659_v38, %v4658_v36  ;;  %v5570_v36 = vld [vmem:[%s6920_s1 + $0x11c] ss:$8 sps:$4 sm:$0xff]  }
 0x32c   : > { %v4661_v20 = vpop.f32.mrf.mxu1  ;;  %v6383_v38 = vld [vmem:[%s6054_s14 + $0x60] sm:$0xff]  }
 0x32e   : > { %v4662_v39 = vpop.f32.mrf.mxu1 }
 0x32f   : > { %v4663_v23 = vadd.f32 %v4662_v39, %v4661_v20  ;;  %v6388_v39 = vld [vmem:[%s6054_s14 + $0x20] sm:$0xff]  }
 0x330   : > { %v4664_v41 = vpop.f32.mrf.mxu1 }
 0x331   : > { %v1217_v42 = vpack.c.bf16 %v4663_v23, %v4660_v40  ;;  %v6392_v40 = vld [vmem:[%s6054_s14 + $0x58] sm:$0xff]  }
 0x332   : > { %v4665_v44 = vpop.f32.mrf.mxu1  ;;  %v6396_v23 = vld [vmem:[%s6054_s14 + $0x18] sm:$0xff]  }
 0x333   : > { %5056 = vmatmul.mubr.msk.bf16.vlgmr.msra.gmra.mxu0 %vm746_vm1, %v1217_v42  ;;  %v4666_v48 = vadd.f32 %v4665_v44, %v4664_v41  ;;  %v6400_v41 = vld [vmem:[%s6054_s14 + $0x50] sm:$0xff]   ;;  %v6412_v44 = vld [vmem:[%s6054_s14 + $0x8] sm:$0xff]  }
 0x334   : > { %v4667_v45 = vpop.f32.mrf.mxu1  ;;  %5064 = vmatpush3.bf16.msra.mxu0 %v1436_v43  ;;  %v6404_v42 = vld [vmem:[%s6054_s14 + $0x10] sm:$0xff]   ;;  %v6408_v43 = vld [vmem:[%s6054_s14 + $0x48] sm:$0xff]  }
 0x335   : > { %4726 = vmatprep.subr.bf16.mxu0 %v6351_v46 }
 0x336   : > { %v4668_v47 = vpop.f32.mrf.mxu1 }
 0x337   : > { %v4669_v49 = vadd.f32 %v4668_v47, %v4667_v45  ;;  %v6416_v45 = vld [vmem:[%s6054_s14 + $0x40] sm:$0xff]  }
 0x338   : > { %v4670_v50 = vpop.f32.mrf.mxu1  ;;  %v5568_v47 = vld [vmem:[%s6920_s1 + $0x118] ss:$8 sps:$4 sm:$0xff]  }
 0x339   : > { %v1218_v51 = vpack.c.bf16 %v4669_v49, %v4666_v48  ;;  %v6423_v48 = vld [vmem:[%s6054_s14] sm:$0xff]   ;;  %v5571_v49 = vld [vmem:[%s6920_s1 + $0x12c] ss:$8 sps:$4 sm:$0xff]  }
 0x33a   : > { %v4671_v52 = vpop.f32.mrf.mxu1 }
 0x33b   : > { %v4672_v53 = vadd.f32 %v4671_v52, %v4670_v50  ;;  %5059 = vmatprep.mubr.msk.bf16.mxu0 %vm746_vm1, %v1218_v51  ;;  %v5573_v50 = vld [vmem:[%s6920_s1 + $0x128] ss:$8 sps:$4 sm:$0xff]   ;;  %v5574_v51 = vld [vmem:[%s6920_s1 + $0x13c] ss:$8 sps:$4 sm:$0xff]  }
 0x33c   : > { %v4673_v54 = vpop.f32.mrf.mxu1  ;;  %v4335_v52 = vld [vmem:[%s6920_s1 + $0x148] sm:$0x11] }
 0x33d   : > { %v1219_v55 = vpack.c.bf16 %v4672_v53, %v4672_v53  ;;  %v5576_v53 = vld [vmem:[%s6920_s1 + $0x138] ss:$8 sps:$4 sm:$0xff]   ;;  %v4343_v54 = vcombine.high %v4335_v52, %v4335_v52 }
 0x33e   : > { %v4674_v56 = vpop.f32.mrf.mxu1 }
 0x33f   : > { %5060 = vmatmul.mubr.msk.bf16.gmra.mxu0 %vm746_vm1, %v1219_v55  ;;  %v4342_v55 = vcombine.low %v4335_v52, %v4335_v52  ;;  %v5581_v56 = vld [vmem:[%s6920_s1 + $0x154] ss:$8 sps:$4 sm:$0xff]  }
 0x340   : > { %v4697_v58 = vpop.f32.mrf.mxu1 }
 0x342   : > { %v4698_v59 = vpop.f32.mrf.mxu1 }
 0x343   : > { %v4699_v2 = vadd.f32 %v4698_v59, %v4697_v58  ;;  %v5579_v58 = vld [vmem:[%s6920_s1 + $0x150] ss:$8 sps:$4 sm:$0xff]   ;;  %v5582_v59 = vld [vmem:[%s6920_s1 + $0x164] ss:$8 sps:$4 sm:$0xff]  }
 0x344   : > { %v4700_v0 = vpop.f32.mrf.mxu1 }
 0x346   : > { %v4701_v1 = vpop.f32.mrf.mxu1 }
 0x347   : > { %v4702_v3 = vadd.f32 %v4701_v1, %v4700_v0  ;;  %v5584_v0 = vld [vmem:[%s6920_s1 + $0x160] ss:$8 sps:$4 sm:$0xff]   ;;  %v5585_v1 = vld [vmem:[%s6920_s1 + $0x174] ss:$8 sps:$4 sm:$0xff]  }
 0x348   : > { %v4703_v4 = vpop.f32.mrf.mxu1 }
 0x349   : > { %v1417_v5 = vpack.c.bf16 %v4702_v3, %v4699_v2  ;;  %v4354_v2 = vld [vmem:[%s6920_s1 + $0x180] sm:$0x11]  ;;  %v5587_v3 = vld [vmem:[%s6920_s1 + $0x170] ss:$8 sps:$4 sm:$0xff]  }
 0x34a   : > { %v4704_v6 = vpop.f32.mrf.mxu1 }
 0x34b   : > { %5065 = vmatprep.mubr.msk.bf16.mxu0 %vm746_vm1, %v1417_v5  ;;  %v4705_v9 = vadd.f32 %v4704_v6, %v4703_v4  ;;  %v4362_v4 = vcombine.high %v4354_v2, %v4354_v2  ;;  %v4361_v5 = vcombine.low %v4354_v2, %v4354_v2  ;;  %v1623_v6 = vld [vmem:[#allocation2 + $0xa] sm:$0x3] }
 0x34c   : > { %v4706_v7 = vpop.f32.mrf.mxu1  ;;  %5406 = vmatprep.subr.msk.bf16.mxu1 %vm759_vm0, %v1623_v6 }
 0x34e   : > { %v4707_v8 = vpop.f32.mrf.mxu1 }
 0x34f   : > { %v4708_v10 = vadd.f32 %v4707_v8, %v4706_v7  ;;  %v1637_v7 = vsel %vm759_vm0, %v1623_v6, 0  ;;  %v1824_v8 = vld [vmem:[#allocation2 + $0xc] sm:$0x3] }
 0x350   : > { %v4709_v13 = vpop.f32.mrf.mxu1  ;;  %5074 = vmatpush3.bf16.msra.mxu1 %v1637_v7 }
 0x351   : > { %v1418_v14 = vpack.c.bf16 %v4708_v10, %v4705_v9  ;;  %5407 = vmatprep.subr.msk.bf16.mxu1 %vm759_vm0, %v1824_v8 }
 0x352   : > { %v4710_v15 = vpop.f32.mrf.mxu1 }
 0x353   : > { %5066 = vmatmul.mubr.msk.bf16.vlgmr.msra.gmra.mxu0 %vm746_vm1, %v1418_v14  ;;  %v4711_v62 = vadd.f32 %v4710_v15, %v4709_v13 }
 0x354   : > { %4727 = vmatpush3.bf16.msra.mxu0 %v6359_v16  ;;  %v4712_v17 = vpop.f32.mrf.mxu1 }
 0x355   : > { %4728 = vmatprep.subr.bf16.mxu0 %v6363_v19 }
 0x356   : > { %v4713_v22 = vpop.f32.mrf.mxu1 }
 0x357   : > { %v4714_v27 = vadd.f32 %v4713_v22, %v4712_v17 }
 0x358   : > { %4729 = vmatpush3.bf16.msra.mxu0 %v6367_v29  ;;  %v4715_v57 = vpop.f32.mrf.mxu1 }
 0x359   : > { %v1419_v32 = vpack.c.bf16 %v4714_v27, %v4711_v62  ;;  %4730 = vmatprep.subr.bf16.mxu0 %v6371_v60 }
 0x35a   : > { %v4716_v33 = vpop.f32.mrf.mxu1 }
 0x35b   : > { %v4717_v34 = vadd.f32 %v4716_v33, %v4715_v57  ;;  %5069 = vmatprep.mubr.msk.bf16.mxu0 %vm746_vm1, %v1419_v32 }
 0x35c   : > { %4731 = vmatpush3.bf16.msra.mxu0 %v6376_v35  ;;  %v4718_v63 = vpop.f32.mrf.mxu1 }
 0x35d   : > { %v1420_v37 = vpack.c.bf16 %v4717_v34, %v4717_v34  ;;  %4732 = vmatprep.subr.bf16.mxu0 %v6383_v38 }
 0x35e   : > { %v4719_v20 = vpop.f32.mrf.mxu1 }
 0x35f   : > { %5070 = vmatmul.mubr.msk.bf16.gmra.mxu0 %vm746_vm1, %v1420_v37 }
 0x360   : > { %4733 = vmatpush3.bf16.msra.mxu0 %v6388_v39  ;;  %1586 = vmatprep.mubr.bf16.mxu0 %v5570_v36 }
 0x361   : > { %4734 = vmatprep.subr.bf16.mxu0 %v6392_v40 }
 0x364   : > { %4735 = vmatpush3.bf16.msra.mxu0 %v6396_v23 }
 0x365   : > { %4736 = vmatprep.subr.bf16.mxu0 %v6400_v41 }
 0x368   : > { %4737 = vmatpush3.bf16.msra.mxu0 %v6404_v42 }
 0x369   : > { %4738 = vmatprep.subr.bf16.mxu0 %v6408_v43 }
 0x36c   : > { %4739 = vmatpush3.bf16.msra.mxu0 %v6412_v44 }
 0x36d   : > { %4740 = vmatprep.subr.bf16.mxu0 %v6416_v45 }
 0x370   : > { %4741 = vmatpush3.bf16.msra.mxu0 %v6423_v48 }
 0x371   : > { %4771 = vmatprep.subr.bf16.mxu0 %v6351_v46 }
 0x373   : > { %1587 = vmatmul.mubr.bf16.vlgmr.msra.gmra.mxu0 %v5568_v47 }
 0x374   : > { %4772 = vmatpush3.bf16.msra.mxu0 %v6359_v16  ;;  %1594 = vmatprep.mubr.bf16.mxu0 %v5571_v49 }
 0x375   : > { %4773 = vmatprep.subr.bf16.mxu0 %v6363_v19 }
 0x378   : > { %4774 = vmatpush3.bf16.msra.mxu0 %v6367_v29 }
 0x379   : > { %4775 = vmatprep.subr.bf16.mxu0 %v6371_v60 }
 0x37b   : > { %1595 = vmatmul.mubr.bf16.gmra.mxu0 %v5573_v50 }
 0x37c   : > { %4776 = vmatpush3.bf16.msra.mxu0 %v6376_v35  ;;  %1602 = vmatprep.mubr.bf16.mxu0 %v5574_v51 }
 0x37d   : > { %4777 = vmatprep.subr.bf16.mxu0 %v6383_v38 }
 0x380   : > { %4778 = vmatpush3.bf16.msra.mxu0 %v6388_v39 }
 0x381   : > { %4779 = vmatprep.subr.bf16.mxu0 %v6392_v40 }
 0x383   : > { %1603 = vmatmul.mubr.bf16.gmra.mxu0 %v5576_v53 }
 0x384   : > { %4780 = vmatpush3.bf16.msra.mxu0 %v6396_v23  ;;  %1610 = vmatprep.mubr.bf16.mxu0 %v4343_v54 }
 0x385   : > { %4781 = vmatprep.subr.bf16.mxu0 %v6400_v41 }
 0x388   : > { %4782 = vmatpush3.bf16.msra.mxu0 %v6404_v42 }
 0x389   : > { %4783 = vmatprep.subr.bf16.mxu0 %v6408_v43 }
 0x38b   : > { %1611 = vmatmul.mubr.bf16.gmra.mxu0 %v4342_v55 }
 0x38c   : > { %4784 = vmatpush3.bf16.msra.mxu0 %v6412_v44  ;;  %1787 = vmatprep.mubr.bf16.mxu0 %v5581_v56 }
 0x38d   : > { %4785 = vmatprep.subr.bf16.mxu0 %v6416_v45 }
 0x390   : > { %4786 = vmatpush3.bf16.msra.mxu0 %v6423_v48 }
 0x393   : > { %1788 = vmatmul.mubr.bf16.vlgmr.msra.gmra.mxu0 %v5579_v58 }
 0x394   : > { %1795 = vmatprep.mubr.bf16.mxu0 %v5582_v59 }
 0x39b   : > { %1796 = vmatmul.mubr.bf16.gmra.mxu0 %v5584_v0 }
 0x39c   : > { %1803 = vmatprep.mubr.bf16.mxu0 %v5585_v1 }
 0x3a3   : > { %1804 = vmatmul.mubr.bf16.gmra.mxu0 %v5587_v3 }
 0x3a4   : > { %1811 = vmatprep.mubr.bf16.mxu0 %v4362_v4 }
 0x3ab   : > { %1812 = vmatmul.mubr.bf16.gmra.mxu0 %v4361_v5 }
 0x3f3   : > { %v5057_v9 = vpop.f32.mrf.mxu0 }
 0x3f4   : > { %v1303_v10 = vadd.f32 %v5057_v9, %v6329_v18  ;;  %v1838_v9 = vsel %vm759_vm0, %v1824_v8, 0 }
 0x3f5   : > { %v1271_v13 = vpop.f32.mrf.mxu0 }
 0x3f6   : > { %v1301_v14 = vadd.f32 %v1271_v13, %v6332_v21 }
 0x3f7   : > { %v5058_v15 = vpop.f32.mrf.mxu0 }
 0x3f8   : > { %v1304_v17 = vadd.f32 %v5058_v15, %v6335_v24 }
 0x3f9   : > { %v6484_v62 = vpop.f32.mrf.mxu0 }
 0x3ff   : > { %v5061_v22 = vpop.f32.mrf.mxu0 }
 0x400   : > { %v1307_v27 = vadd.f32 %v5061_v22, %v6340_v28 }
 0x401   : > { %v1287_v57 = vpop.f32.mrf.mxu0 }
 0x402   : > { %v1305_v32 = vadd.f32 %v1287_v57, %v6343_v30 }
 0x403   : > { %v5062_v33 = vpop.f32.mrf.mxu0 }
 0x405   : > { %v6488_v34 = vpop.f32.mrf.mxu0 }
 0x413   : > { %v5067_v63 = vpop.f32.mrf.mxu0 }
 0x414   : > { %v6490_v36 = vadd.f32 %v5067_v63, %v1303_v10 }
 0x415   : > { %v1472_v18 = vpop.f32.mrf.mxu0 }
 0x416   : > { %v6492_v37 = vadd.f32 %v1472_v18, %v1301_v14 }
 0x417   : > { %v5068_v21 = vpop.f32.mrf.mxu0 }
 0x418   : > { %v6494_v20 = vadd.f32 %v5068_v21, %v1304_v17 }
 0x419   : > { %v6496_v24 = vpop.f32.mrf.mxu0 }
 0x41f   : > { %v5071_v47 = vpop.f32.mrf.mxu0 }
 0x420   : > { %v6498_v49 = vadd.f32 %v5071_v47, %v1307_v27 }
 0x421   : > { %v1488_v28 = vpop.f32.mrf.mxu0 }
 0x422   : > { %v6500_v50 = vadd.f32 %v1488_v28, %v1305_v32 }
 0x423   : > { %v5072_v30 = vpop.f32.mrf.mxu0 }
 0x425   : > { %v6502_v51 = vpop.f32.mrf.mxu0 }
 0x433   : > { %v4742_v52 = vpop.f32.mrf.mxu0 }
 0x435   : > { %v4743_v53 = vpop.f32.mrf.mxu0 }
 0x436   : > { %v4744_v56 = vadd.f32 %v4743_v53, %v4742_v52 }
 0x437   : > { %v4745_v54 = vpop.f32.mrf.mxu0 }
 0x439   : > { %v4746_v55 = vpop.f32.mrf.mxu0 }
 0x43a   : > { %v4747_v58 = vadd.f32 %v4746_v55, %v4745_v54 }
 0x43b   : > { %v4748_v59 = vpop.f32.mrf.mxu0 }
 0x43c   : > { %v1618_v0 = vpack.c.bf16 %v4747_v58, %v4744_v56 }
 0x43d   : > { %v4749_v1 = vpop.f32.mrf.mxu0 }
 0x43e   : > { %5075 = vmatprep.mubr.msk.bf16.mxu1 %vm746_vm1, %v1618_v0  ;;  %v4750_v4 = vadd.f32 %v4749_v1, %v4748_v59 }
 0x43f   : > { %v4751_v2 = vpop.f32.mrf.mxu0 }
 0x441   : > { %v4752_v3 = vpop.f32.mrf.mxu0 }
 0x442   : > { %v4753_v5 = vadd.f32 %v4752_v3, %v4751_v2 }
 0x443   : > { %v4754_v6 = vpop.f32.mrf.mxu0 }
 0x444   : > { %v1619_v7 = vpack.c.bf16 %v4753_v5, %v4750_v4 }
 0x445   : > { %v4755_v10 = vpop.f32.mrf.mxu0 }
 0x446   : > { %5076 = vmatmul.mubr.msk.bf16.vlgmr.msra.gmra.mxu1 %vm746_vm1, %v1619_v7  ;;  %v4756_v15 = vadd.f32 %v4755_v10, %v4754_v6 }
 0x447   : > { %v4757_v13 = vpop.f32.mrf.mxu0  ;;  %5084 = vmatpush3.bf16.msra.mxu1 %v1838_v9 }
 0x448   : > { %4816 = vmatprep.subr.bf16.mxu1 %v6351_v46 }
 0x449   : > { %v4758_v14 = vpop.f32.mrf.mxu0 }
 0x44a   : > { %v4759_v17 = vadd.f32 %v4758_v14, %v4757_v13 }
 0x44b   : > { %v4760_v22 = vpop.f32.mrf.mxu0 }
 0x44c   : > { %v1620_v27 = vpack.c.bf16 %v4759_v17, %v4756_v15  ;;  %v5592_v17 = vld [vmem:[%s6920_s1 + $0x18c] ss:$8 sps:$4 sm:$0xff]  }
 0x44d   : > { %v4761_v57 = vpop.f32.mrf.mxu0 }
 0x44e   : > { %v4762_v32 = vadd.f32 %v4761_v57, %v4760_v22  ;;  %5079 = vmatprep.mubr.msk.bf16.mxu1 %vm746_vm1, %v1620_v27  ;;  %v5590_v57 = vld [vmem:[%s6920_s1 + $0x188] ss:$8 sps:$4 sm:$0xff]  }
 0x44f   : > { %v4763_v33 = vpop.f32.mrf.mxu0 }
 0x450   : > { %v1621_v63 = vpack.c.bf16 %v4762_v32, %v4762_v32  ;;  %v5593_v32 = vld [vmem:[%s6920_s1 + $0x19c] ss:$8 sps:$4 sm:$0xff]   ;;  %v5595_v33 = vld [vmem:[%s6920_s1 + $0x198] ss:$8 sps:$4 sm:$0xff]  }
 0x451   : > { %v4764_v18 = vpop.f32.mrf.mxu0 }
 0x452   : > { %5080 = vmatmul.mubr.msk.bf16.gmra.mxu1 %vm746_vm1, %v1621_v63  ;;  %v5596_v63 = vld [vmem:[%s6920_s1 + $0x1ac] ss:$8 sps:$4 sm:$0xff]   ;;  %v880_v18 = vadd.f32 %v6238_v12, %v6236_v11  ;;  %v896_v11 = vadd.f32 %v6326_v61, %v6244_v26 }
 0x453   : > { %v4787_v8 = vpop.f32.mrf.mxu0 }
 0x455   : > { %v4788_v21 = vpop.f32.mrf.mxu0 }
 0x456   : > { %v4789_v30 = vadd.f32 %v4788_v21, %v4787_v8  ;;  %v1101_v21 = vadd.f32 %v6337_v25, %v880_v18  ;;  %v1105_v25 = vadd.f32 %v6345_v31, %v896_v11 }
 0x457   : > { %v4790_v47 = vpop.f32.mrf.mxu0 }
 0x459   : > { %v4791_v28 = vpop.f32.mrf.mxu0 }
 0x45a   : > { %v4792_v52 = vadd.f32 %v4791_v28, %v4790_v47 }
 0x45b   : > { %v4793_v53 = vpop.f32.mrf.mxu0 }
 0x45c   : > { %v1819_v54 = vpack.c.bf16 %v4792_v52, %v4789_v30  ;;  %v1302_v30 = vadd.f32 %v6484_v62, %v1101_v21  ;;  %v1306_v62 = vadd.f32 %v6488_v34, %v1105_v25 }
 0x45d   : > { %v4794_v55 = vpop.f32.mrf.mxu0 }
 0x45e   : > { %5085 = vmatprep.mubr.msk.bf16.mxu1 %vm746_vm1, %v1819_v54  ;;  %v4795_v59 = vadd.f32 %v4794_v55, %v4793_v53  ;;  %v1503_v54 = vadd.f32 %v6496_v24, %v1302_v30  ;;  %v1507_v24 = vadd.f32 %v6502_v51, %v1306_v62 }
 0x45f   : > { %v4796_v56 = vpop.f32.mrf.mxu0 }
 0x461   : > { %v4797_v58 = vpop.f32.mrf.mxu0 }
 0x462   : > { %v4798_v0 = vadd.f32 %v4797_v58, %v4796_v56 }
 0x463   : > { %v4799_v1 = vpop.f32.mrf.mxu0 }
 0x464   : > { %v1820_v2 = vpack.c.bf16 %v4798_v0, %v4795_v59 }
 0x465   : > { %v4800_v3 = vpop.f32.mrf.mxu0 }
 0x466   : > { %5086 = vmatmul.mubr.msk.bf16.vlgmr.msra.gmra.mxu1 %vm746_vm1, %v1820_v2  ;;  %v4801_v5 = vadd.f32 %v4800_v3, %v4799_v1 }
 0x467   : > { %4817 = vmatpush3.bf16.msra.mxu1 %v6359_v16  ;;  %v4802_v4 = vpop.f32.mrf.mxu0 }
 0x468   : > { %4818 = vmatprep.subr.bf16.mxu1 %v6363_v19 }
 0x469   : > { %v4803_v6 = vpop.f32.mrf.mxu0 }
 0x46a   : > { %v4804_v7 = vadd.f32 %v4803_v6, %v4802_v4 }
 0x46b   : > { %4819 = vmatpush3.bf16.msra.mxu1 %v6367_v29  ;;  %v4805_v9 = vpop.f32.mrf.mxu0 }
 0x46c   : > { %v1821_v10 = vpack.c.bf16 %v4804_v7, %v4801_v5  ;;  %4820 = vmatprep.subr.bf16.mxu1 %v6371_v60 }
 0x46d   : > { %v4806_v13 = vpop.f32.mrf.mxu0 }
 0x46e   : > { %v4807_v14 = vadd.f32 %v4806_v13, %v4805_v9  ;;  %5089 = vmatprep.mubr.msk.bf16.mxu1 %vm746_vm1, %v1821_v10 }
 0x46f   : > { %4821 = vmatpush3.bf16.msra.mxu1 %v6376_v35  ;;  %v4808_v15 = vpop.f32.mrf.mxu0 }
 0x470   : > { %v1822_v22 = vpack.c.bf16 %v4807_v14, %v4807_v14  ;;  %4822 = vmatprep.subr.bf16.mxu1 %v6383_v38 }
 0x471   : > { %v4809_v27 = vpop.f32.mrf.mxu0 }
 0x472   : > { %5090 = vmatmul.mubr.msk.bf16.gmra.mxu1 %vm746_vm1, %v1822_v22 }
 0x473   : > { %4823 = vmatpush3.bf16.msra.mxu1 %v6388_v39  ;;  %1988 = vmatprep.mubr.bf16.mxu1 %v5592_v17 }
 0x474   : > { %4824 = vmatprep.subr.bf16.mxu1 %v6392_v40 }
 0x477   : > { %4825 = vmatpush3.bf16.msra.mxu1 %v6396_v23 }
 0x478   : > { %4826 = vmatprep.subr.bf16.mxu1 %v6400_v41 }
 0x47b   : > { %4827 = vmatpush3.bf16.msra.mxu1 %v6404_v42 }
 0x47c   : > { %4828 = vmatprep.subr.bf16.mxu1 %v6408_v43 }
 0x47f   : > { %4829 = vmatpush3.bf16.msra.mxu1 %v6412_v44 }
 0x480   : > { %4830 = vmatprep.subr.bf16.mxu1 %v6416_v45 }
 0x483   : > { %4831 = vmatpush3.bf16.msra.mxu1 %v6423_v48 }
 0x484   : > { %4861 = vmatprep.subr.bf16.mxu1 %v6351_v46  ;;  %v4373_v46 = vld [vmem:[%s6920_s1 + $0x1b8] sm:$0x11] }
 0x486   : > { %1989 = vmatmul.mubr.bf16.vlgmr.msra.gmra.mxu1 %v5590_v57 }
 0x487   : > { %4862 = vmatpush3.bf16.msra.mxu1 %v6359_v16  ;;  %1996 = vmatprep.mubr.bf16.mxu1 %v5593_v32  ;;  %v5598_v16 = vld [vmem:[%s6920_s1 + $0x1a8] ss:$8 sps:$4 sm:$0xff]  }
 0x488   : > { %4863 = vmatprep.subr.bf16.mxu1 %v6363_v19  ;;  %v4381_v19 = vcombine.high %v4373_v46, %v4373_v46 }
 0x48b   : > { %4864 = vmatpush3.bf16.msra.mxu1 %v6367_v29  ;;  %v4380_v29 = vcombine.low %v4373_v46, %v4373_v46 }
 0x48c   : > { %4865 = vmatprep.subr.bf16.mxu1 %v6371_v60  ;;  %v5603_v60 = vld [vmem:[%s6920_s1 + $0x1c4] ss:$8 sps:$4 sm:$0xff]  }
 0x48e   : > { %1997 = vmatmul.mubr.bf16.gmra.mxu1 %v5595_v33 }
 0x48f   : > { %4866 = vmatpush3.bf16.msra.mxu1 %v6376_v35  ;;  %2004 = vmatprep.mubr.bf16.mxu1 %v5596_v63  ;;  %v5601_v35 = vld [vmem:[%s6920_s1 + $0x1c0] ss:$8 sps:$4 sm:$0xff]  }
 0x490   : > { %4867 = vmatprep.subr.bf16.mxu1 %v6383_v38  ;;  %v5604_v38 = vld [vmem:[%s6920_s1 + $0x1d4] ss:$8 sps:$4 sm:$0xff]  }
 0x493   : > { %4868 = vmatpush3.bf16.msra.mxu1 %v6388_v39  ;;  %v5606_v39 = vld [vmem:[%s6920_s1 + $0x1d0] ss:$8 sps:$4 sm:$0xff]  }
 0x494   : > { %4869 = vmatprep.subr.bf16.mxu1 %v6392_v40  ;;  %v5607_v40 = vld [vmem:[%s6920_s1 + $0x1e4] ss:$8 sps:$4 sm:$0xff]  }
 0x496   : > { %2005 = vmatmul.mubr.bf16.gmra.mxu1 %v5598_v16 }
 0x497   : > { %4870 = vmatpush3.bf16.msra.mxu1 %v6396_v23  ;;  %2012 = vmatprep.mubr.bf16.mxu1 %v4381_v19  ;;  %v4392_v23 = vld [vmem:[%s6920_s1 + $0x1f0] sm:$0x11] }
 0x498   : > { %4871 = vmatprep.subr.bf16.mxu1 %v6400_v41  ;;  %v5609_v41 = vld [vmem:[%s6920_s1 + $0x1e0] ss:$8 sps:$4 sm:$0xff]  }
 0x49b   : > { %4872 = vmatpush3.bf16.msra.mxu1 %v6404_v42  ;;  %v4400_v42 = vcombine.high %v4392_v23, %v4392_v23 }
 0x49c   : > { %4873 = vmatprep.subr.bf16.mxu1 %v6408_v43  ;;  %v4399_v43 = vcombine.low %v4392_v23, %v4392_v23 }
 0x49e   : > { %2013 = vmatmul.mubr.bf16.gmra.mxu1 %v4380_v29 }
 0x49f   : > { %4874 = vmatpush3.bf16.msra.mxu1 %v6412_v44  ;;  %2189 = vmatprep.mubr.bf16.mxu1 %v5603_v60  ;;  %v2025_v44 = vld [vmem:[#allocation2 + $0xe] sm:$0x3] }
 0x4a0   : > { %4875 = vmatprep.subr.bf16.mxu1 %v6416_v45  ;;  %5408 = vmatprep.subr.msk.bf16.mxu0 %vm759_vm0, %v2025_v44  ;;  %v2039_v45 = vsel %vm759_vm0, %v2025_v44, 0 }
 0x4a1   : > { %5094 = vmatpush3.bf16.msra.mxu0 %v2039_v45 }
 0x4a3   : > { %4876 = vmatpush3.bf16.msra.mxu1 %v6423_v48  ;;  %v2226_v48 = vld [vmem:[#allocation2 + $0x10] sm:$0x3] }
 0x4a4   : > { %5409 = vmatprep.subr.msk.bf16.mxu0 %vm759_vm0, %v2226_v48 }
 0x4a6   : > { %2190 = vmatmul.mubr.bf16.vlgmr.msra.gmra.mxu1 %v5601_v35  ;;  %v2240_v35 = vsel %vm759_vm0, %v2226_v48, 0 }
 0x4a7   : > { %2197 = vmatprep.mubr.bf16.mxu1 %v5604_v38 }
 0x4ae   : > { %2198 = vmatmul.mubr.bf16.gmra.mxu1 %v5606_v39 }
 0x4af   : > { %2205 = vmatprep.mubr.bf16.mxu1 %v5607_v40 }
 0x4b6   : > { %2206 = vmatmul.mubr.bf16.gmra.mxu1 %v5609_v41 }
 0x4b7   : > { %2213 = vmatprep.mubr.bf16.mxu1 %v4400_v42 }
 0x4be   : > { %2214 = vmatmul.mubr.bf16.gmra.mxu1 %v4399_v43 }
 0x506   : > { %v5077_v8 = vpop.f32.mrf.mxu1 }
 0x507   : > { %v1705_v47 = vadd.f32 %v5077_v8, %v6490_v36 }
 0x508   : > { %v1673_v28 = vpop.f32.mrf.mxu1 }
 0x509   : > { %v1703_v52 = vadd.f32 %v1673_v28, %v6492_v37 }
 0x50a   : > { %v5078_v53 = vpop.f32.mrf.mxu1 }
 0x50b   : > { %v1706_v55 = vadd.f32 %v5078_v53, %v6494_v20 }
 0x50c   : > { %v1676_v56 = vpop.f32.mrf.mxu1 }
 0x50d   : > { %v1704_v58 = vadd.f32 %v1676_v56, %v1503_v54 }
 0x512   : > { %v5081_v12 = vpop.f32.mrf.mxu1 }
 0x513   : > { %v1709_v36 = vadd.f32 %v5081_v12, %v6498_v49 }
 0x514   : > { %v1689_v59 = vpop.f32.mrf.mxu1 }
 0x515   : > { %v1707_v37 = vadd.f32 %v1689_v59, %v6500_v50 }
 0x516   : > { %v5082_v0 = vpop.f32.mrf.mxu1 }
 0x518   : > { %v1692_v1 = vpop.f32.mrf.mxu1 }
 0x519   : > { %v1708_v20 = vadd.f32 %v1692_v1, %v1507_v24 }
 0x526   : > { %v5087_v2 = vpop.f32.mrf.mxu1 }
 0x527   : > { %v6605_v3 = vadd.f32 %v5087_v2, %v1705_v47 }
 0x528   : > { %v1874_v4 = vpop.f32.mrf.mxu1 }
 0x529   : > { %v6607_v26 = vadd.f32 %v1874_v4, %v1703_v52 }
 0x52a   : > { %v5088_v61 = vpop.f32.mrf.mxu1 }
 0x52b   : > { %v6609_v31 = vadd.f32 %v5088_v61, %v1706_v55 }
 0x52c   : > { %v1877_v49 = vpop.f32.mrf.mxu1 }
 0x52d   : > { %v6611_v5 = vadd.f32 %v1877_v49, %v1704_v58 }
 0x532   : > { %v5091_v34 = vpop.f32.mrf.mxu1 }
 0x533   : > { %v6613_v6 = vadd.f32 %v5091_v34, %v1709_v36 }
 0x534   : > { %v1890_v50 = vpop.f32.mrf.mxu1 }
 0x535   : > { %v6615_v7 = vadd.f32 %v1890_v50, %v1707_v37 }
 0x536   : > { %v5092_v51 = vpop.f32.mrf.mxu1 }
 0x537   : > { %v5877_v51 = vmov 0.0  }
 0x538   : > { %v1893_v9 = vpop.f32.mrf.mxu1  ;;  %5113 = vmatprep.subr.bf16.mxu1 %v5877_v51  ;;  %5121 = vmatprep.mubr.msk.bf16.mxu1 %vm5878_vm2, %v5877_v51 }
 0x539   : > { %v6617_v10 = vadd.f32 %v1893_v9, %v1708_v20 }
 0x546   : > { %v4832_v13 = vpop.f32.mrf.mxu1 }
 0x548   : > { %v4833_v14 = vpop.f32.mrf.mxu1 }
 0x549   : > { %v4834_v22 = vadd.f32 %v4833_v14, %v4832_v13 }
 0x54a   : > { %v4835_v15 = vpop.f32.mrf.mxu1 }
 0x54c   : > { %v4836_v17 = vpop.f32.mrf.mxu1 }
 0x54d   : > { %v4837_v27 = vadd.f32 %v4836_v17, %v4835_v15 }
 0x54e   : > { %v4838_v57 = vpop.f32.mrf.mxu1 }
 0x54f   : > { %v2020_v32 = vpack.c.bf16 %v4837_v27, %v4834_v22 }
 0x550   : > { %v4839_v33 = vpop.f32.mrf.mxu1 }
 0x551   : > { %5095 = vmatprep.mubr.msk.bf16.mxu0 %vm746_vm1, %v2020_v32  ;;  %v4840_v16 = vadd.f32 %v4839_v33, %v4838_v57 }
 0x552   : > { %v4841_v63 = vpop.f32.mrf.mxu1 }
 0x554   : > { %v4842_v46 = vpop.f32.mrf.mxu1 }
 0x555   : > { %v4843_v19 = vadd.f32 %v4842_v46, %v4841_v63 }
 0x556   : > { %v4844_v29 = vpop.f32.mrf.mxu1 }
 0x557   : > { %v2021_v60 = vpack.c.bf16 %v4843_v19, %v4840_v16  ;;  %v4405_v16 = vld [vmem:[%s6922_s3] ss:$0 sm:$0xff] }
 0x558   : > { %v4845_v38 = vpop.f32.mrf.mxu1 }
 0x559   : > { %5096 = vmatmul.mubr.msk.bf16.vlgmr.msra.gmra.mxu0 %vm746_vm1, %v2021_v60  ;;  %v4846_v23 = vadd.f32 %v4845_v38, %v4844_v29 }
 0x55a   : > { %v4847_v39 = vpop.f32.mrf.mxu1  ;;  %5104 = vmatpush3.bf16.msra.mxu0 %v2240_v35 }
 0x55b   : > { %5125 = vmatprep.subr.bf16.mxu0 %v5877_v51 }
 0x55c   : > { %v4848_v40 = vpop.f32.mrf.mxu1 }
 0x55d   : > { %v4849_v41 = vadd.f32 %v4848_v40, %v4847_v39 }
 0x55e   : > { %v4850_v42 = vpop.f32.mrf.mxu1 }
 0x55f   : > { %v2022_v43 = vpack.c.bf16 %v4849_v41, %v4846_v23 }
 0x560   : > { %v4851_v44 = vpop.f32.mrf.mxu1 }
 0x561   : > { %v4852_v45 = vadd.f32 %v4851_v44, %v4850_v42  ;;  %5099 = vmatprep.mubr.msk.bf16.mxu0 %vm746_vm1, %v2022_v43 }
 0x562   : > { %v4853_v18 = vpop.f32.mrf.mxu1 }
 0x563   : > { %v2023_v8 = vpack.c.bf16 %v4852_v45, %v4852_v45 }
 0x564   : > { %v4854_v21 = vpop.f32.mrf.mxu1 }
 0x565   : > { %5100 = vmatmul.mubr.msk.bf16.gmra.mxu0 %vm746_vm1, %v2023_v8 }
 0x566   : > { %v4877_v48 = vpop.f32.mrf.mxu1 }
 0x568   : > { %v4878_v47 = vpop.f32.mrf.mxu1 }
 0x569   : > { %v4879_v52 = vadd.f32 %v4878_v47, %v4877_v48 }
 0x56a   : > { %v4880_v28 = vpop.f32.mrf.mxu1 }
 0x56c   : > { %v4881_v30 = vpop.f32.mrf.mxu1 }
 0x56d   : > { %v4882_v53 = vadd.f32 %v4881_v30, %v4880_v28 }
 0x56e   : > { %v4883_v54 = vpop.f32.mrf.mxu1 }
 0x56f   : > { %v2221_v55 = vpack.c.bf16 %v4882_v53, %v4879_v52 }
 0x570   : > { %v4884_v56 = vpop.f32.mrf.mxu1 }
 0x571   : > { %5105 = vmatprep.mubr.msk.bf16.mxu0 %vm746_vm1, %v2221_v55  ;;  %v4885_v12 = vadd.f32 %v4884_v56, %v4883_v54  ;;  %v5879_v56 = vmov 0  }
 0x572   : > { %v4886_v58 = vpop.f32.mrf.mxu1 }
 0x574   : > { %v4887_v11 = vpop.f32.mrf.mxu1 }
 0x575   : > { %v4888_v25 = vadd.f32 %v4887_v11, %v4886_v58 }
 0x576   : > { %v4889_v36 = vpop.f32.mrf.mxu1 }
 0x577   : > { %v2222_v59 = vpack.c.bf16 %v4888_v25, %v4885_v12 }
 0x578   : > { %v4890_v62 = vpop.f32.mrf.mxu1 }
 0x579   : > { %5106 = vmatmul.mubr.msk.bf16.vlgmr.msra.gmra.mxu0 %vm746_vm1, %v2222_v59  ;;  %v4891_v24 = vadd.f32 %v4890_v62, %v4889_v36 }
 0x57a   : > { %v4892_v37 = vpop.f32.mrf.mxu1 }
 0x57c   : > { %v4893_v0 = vpop.f32.mrf.mxu1 }
 0x57d   : > { %v4894_v1 = vadd.f32 %v4893_v0, %v4892_v37  ;;  %v5612_v37 = vld [vmem:[#allocation5] sm:$0x1f]   ;;  %v5613_v0 = vld [vmem:[#allocation5 + $0x8] sm:$0x1f]  }
 0x57e   : > { %v4895_v20 = vpop.f32.mrf.mxu1 }
 0x57f   : > { %v2223_v2 = vpack.c.bf16 %v4894_v1, %v4891_v24  ;;  %v5614_v24 = vld [vmem:[#allocation7 + $0x18] sm:$0xff]   ;;  %v5615_v1 = vld [vmem:[#allocation7 + $0x8] sm:$0xff]  }
 0x580   : > { %v4896_v4 = vpop.f32.mrf.mxu1 }
 0x581   : > { %v4897_v61 = vadd.f32 %v4896_v4, %v4895_v20  ;;  %5109 = vmatprep.mubr.msk.bf16.mxu0 %vm746_vm1, %v2223_v2  ;;  %v5616_v20 = vld [vmem:[#allocation7 + $0x10] sm:$0xff]   ;;  %v5617_v2 = vld [vmem:[#allocation7] sm:$0xff]  }
 0x582   : > { %v4898_v49 = vpop.f32.mrf.mxu1 }
 0x583   : > { %v2224_v34 = vpack.c.bf16 %v4897_v61, %v4897_v61 }
 0x584   : > { %v4899_v50 = vpop.f32.mrf.mxu1 }
 0x585   : > { %5110 = vmatmul.mubr.msk.bf16.gmra.mxu0 %vm746_vm1, %v2224_v34 }
 0x586   : > { %5133 = vmatprep.mubr.msk.bf16.mxu0 %vm5878_vm2, %v5877_v51 }
 0x619   : > { %v5097_v9 = vpop.f32.mrf.mxu0 }
 0x61a   : > { %v2107_v32 = vadd.f32 %v5097_v9, %v6605_v3 }
 0x61b   : > { %v2075_v13 = vpop.f32.mrf.mxu0 }
 0x61c   : > { %v2105_v63 = vadd.f32 %v2075_v13, %v6607_v26 }
 0x61d   : > { %v5098_v14 = vpop.f32.mrf.mxu0 }
 0x61e   : > { %v2108_v29 = vadd.f32 %v5098_v14, %v6609_v31 }
 0x61f   : > { %v2078_v15 = vpop.f32.mrf.mxu0 }
 0x620   : > { %v2106_v38 = vadd.f32 %v2078_v15, %v6611_v5 }
 0x625   : > { %v5101_v17 = vpop.f32.mrf.mxu0 }
 0x626   : > { %v2111_v45 = vadd.f32 %v5101_v17, %v6613_v6  ;;  %v2351_v6 = vsel %vm2349_vm3, 65535, %v5879_v56  ;;  %v5626_v56 = vld [vmem:[#allocation7 + $0x40] sm:$0xff]  }
 0x627   : > { %v2091_v22 = vpop.f32.mrf.mxu0 }
 0x628   : > { %v2109_v48 = vadd.f32 %v2091_v22, %v6615_v7  ;;  %v5618_v22 = vld [vmem:[#allocation5 + $0x10] sm:$0x1f]  }
 0x629   : > { %v5102_v27 = vpop.f32.mrf.mxu0 }
 0x62a   : > { %v5619_v27 = vld [vmem:[#allocation7 + $0x28] sm:$0xff]  }
 0x62b   : > { %v2094_v57 = vpop.f32.mrf.mxu0 }
 0x62c   : > { %v2110_v54 = vadd.f32 %v2094_v57, %v6617_v10  ;;  %v5620_v57 = vld [vmem:[#allocation7 + $0x20] sm:$0xff]  }
 0x639   : > { %v5107_v33 = vpop.f32.mrf.mxu0 }
 0x63a   : > { %v2308_v46 = vadd.f32 %v5107_v33, %v2107_v32 }
 0x63b   : > { %v2276_v19 = vpop.f32.mrf.mxu0 }
 0x63c   : > { %v2306_v60 = vadd.f32 %v2276_v19, %v2105_v63  ;;  %v2322_v39 = vadd.f32 %v4405_v16, %v2308_v46 }
 0x63d   : > { %v5108_v35 = vpop.f32.mrf.mxu0 }
 0x63e   : > { %v2309_v40 = vadd.f32 %v5108_v35, %v2108_v29  ;;  %v2320_v41 = vadd.f32 %v4405_v16, %v2306_v60  ;;  %v2329_v43 = vmax.f32 %v2322_v39, 0.0 }
 0x63f   : > { %v2279_v23 = vpop.f32.mrf.mxu0 }
 0x640   : > { %v2323_v3 = vadd.f32 %v4405_v16, %v2309_v40  ;;  %v2307_v42 = vadd.f32 %v2279_v23, %v2106_v38  ;;  %v2327_v18 = vmax.f32 %v2320_v41, 0.0 }
 0x642   : > { %v2330_v26 = vmax.f32 %v2323_v3, 0.0  ;;  %v2321_v44 = vadd.f32 %v4405_v16, %v2307_v42  ;;  %v5621_v42 = vld [vmem:[#allocation5 + $0x18] sm:$0x1f]  }
 0x644   : > { %v6642_v8 = vpack.c.bf16 %v2330_v26, %v2329_v43  ;;  %v2328_v21 = vmax.f32 %v2321_v44, 0.0  ;;  %v5622_v43 = vld [vmem:[#allocation7 + $0x38] sm:$0xff]   ;;  %v5623_v26 = vld [vmem:[#allocation7 + $0x30] sm:$0xff]  }
 0x645   : > { %v5111_v31 = vpop.f32.mrf.mxu0 }
 0x646   : > { %v6645_v47 = vpack.c.bf16 %v2328_v21, %v2327_v18  ;;  %v2312_v5 = vadd.f32 %v5111_v31, %v2111_v45 }
 0x647   : > { %v2292_v28 = vpop.f32.mrf.mxu0 }
 0x648   : > { %v2326_v30 = vadd.f32 %v4405_v16, %v2312_v5  ;;  %v2310_v52 = vadd.f32 %v2292_v28, %v2109_v48 }
 0x649   : > { %v5112_v53 = vpop.f32.mrf.mxu0 }
 0x64a   : > { %v2333_v55 = vmax.f32 %v2326_v30, 0.0  ;;  %v2324_v12 = vadd.f32 %v4405_v16, %v2310_v52 }
 0x64b   : > { %v2295_v58 = vpop.f32.mrf.mxu0 }
 0x64c   : > { %v2337_v11 = vpack.c.bf16 %v2333_v55, %v2333_v55  ;;  %v2311_v25 = vadd.f32 %v2295_v58, %v2110_v54  ;;  %v2331_v59 = vmax.f32 %v2324_v12, 0.0  ;;  %v5624_v54 = vld [vmem:[#allocation5 + $0x20] sm:$0x1f]   ;;  %v5625_v55 = vld [vmem:[#allocation7 + $0x48] sm:$0xff]  }
 0x64e   : > { %v6648_v36 = vand.u32 %v2351_v6, %v2337_v11  ;;  %v2325_v7 = vadd.f32 %v4405_v16, %v2311_v25 }
 0x650   : > { %v2332_v62 = vmax.f32 %v2325_v7, 0.0  ;;  %5114 = vmatpush3.bf16.msra.mxu1 %v6648_v36  ;;  %5126 = vmatpush3.bf16.msra.mxu0 %v6648_v36 }
 0x651   : > { %5115 = vmatprep.subr.bf16.mxu1 %v5877_v51  ;;  %5127 = vmatprep.subr.bf16.mxu0 %v5877_v51 }
 0x652   : > { %v6654_v10 = vpack.c.bf16 %v2332_v62, %v2331_v59 }
 0x654   : > { %5116 = vmatpush3.bf16.msra.mxu1 %v6654_v10  ;;  %5128 = vmatpush3.bf16.msra.mxu0 %v6654_v10 }
 0x655   : > { %5117 = vmatprep.subr.bf16.mxu1 %v5877_v51  ;;  %5129 = vmatprep.subr.bf16.mxu0 %v5877_v51 }
 0x658   : > { %5118 = vmatpush3.bf16.msra.mxu1 %v6642_v8  ;;  %5130 = vmatpush3.bf16.msra.mxu0 %v6642_v8 }
 0x659   : > { %5119 = vmatprep.subr.bf16.mxu1 %v5877_v51  ;;  %5131 = vmatprep.subr.bf16.mxu0 %v5877_v51 }
 0x65c   : > { %5120 = vmatpush3.bf16.msra.mxu1 %v6645_v47  ;;  %5132 = vmatpush3.bf16.msra.mxu0 %v6645_v47 }
 0x65d   : > { %5137 = vmatprep.subr.bf16.mxu1 %v5877_v51  ;;  %5145 = vmatprep.subr.bf16.mxu0 %v5877_v51 }
 0x65f   : > { %5122 = vmatmul.mubr.msk.bf16.vlgmr.msra.gmra.mxu1 %vm2345_vm4, %v5612_v37  ;;  %5134 = vmatmul.mubr.msk.bf16.vlgmr.msra.gmra.mxu0 %vm2345_vm4, %v5613_v0 }
 0x660   : > { %5138 = vmatpush3.bf16.msra.mxu1 %v5614_v24  ;;  %5141 = vmatprep.mubr.msk.bf16.mxu1 %vm5878_vm2, %v5877_v51 }
 0x661   : > { %5139 = vmatprep.subr.bf16.mxu1 %v5877_v51  ;;  %5149 = vmatprep.mubr.msk.bf16.mxu0 %vm5878_vm2, %v5877_v51 }
 0x662   : > { %5146 = vmatpush3.bf16.msra.mxu0 %v5615_v1  ;;  %v5627_v1 = vld [vmem:[#allocation5 + $0x28] sm:$0x1f]  }
 0x663   : > { %5147 = vmatprep.subr.bf16.mxu0 %v5877_v51 }
 0x664   : > { %5140 = vmatpush3.bf16.msra.mxu1 %v5616_v20  ;;  %v5628_v20 = vld [vmem:[#allocation7 + $0x58] sm:$0xff]  }
 0x665   : > { %5153 = vmatprep.subr.bf16.mxu1 %v5877_v51 }
 0x666   : > { %5148 = vmatpush3.bf16.msra.mxu0 %v5617_v2  ;;  %v5629_v2 = vld [vmem:[#allocation7 + $0x50] sm:$0xff]  }
 0x667   : > { %5165 = vmatprep.subr.bf16.mxu0 %v5877_v51 }
 0x71f   : > { %v2389_v4 = vpop.f32.mrf.mxu1  ;;  %v2446_v61 = vpop.f32.mrf.mxu0 }
 0x721   : > { %v5123_v49 = vpop.f32.mrf.mxu1  ;;  %v5135_v34 = vpop.f32.mrf.mxu0 }
 0x723   : > { %v2392_v50 = vpop.f32.mrf.mxu1  ;;  %v2449_v9 = vpop.f32.mrf.mxu0 }
 0x724   : > { %v2396_v13 = vpack.c.bf16 %v2392_v50, %v2389_v4  ;;  %v2453_v14 = vpack.c.bf16 %v2449_v9, %v2446_v61 }
 0x725   : > { %v5136_v15 = vpop.f32.mrf.mxu0  ;;  %v5124_v17 = vpop.f32.mrf.mxu1 }
 0x726   : > { %5142 = vmatmul.mubr.msk.bf16.vlgmr.msra.gmra.mxu1 %vm2471_vm5, %v2453_v14  ;;  %5150 = vmatmul.mubr.msk.bf16.vlgmr.msra.gmra.mxu0 %vm2471_vm5, %v2396_v13 }
 0x727   : > { %5154 = vmatpush3.bf16.msra.mxu1 %v6648_v36  ;;  %5161 = vmatprep.mubr.msk.bf16.mxu1 %vm5878_vm2, %v5877_v51 }
 0x728   : > { %5155 = vmatprep.subr.bf16.mxu1 %v5877_v51  ;;  %5169 = vmatprep.mubr.msk.bf16.mxu0 %vm5878_vm2, %v5877_v51 }
 0x729   : > { %5166 = vmatpush3.bf16.msra.mxu0 %v5619_v27  ;;  %v5630_v27 = vld [vmem:[#allocation5 + $0x30] sm:$0x1f]  }
 0x72a   : > { %5167 = vmatprep.subr.bf16.mxu0 %v5877_v51 }
 0x72b   : > { %5156 = vmatpush3.bf16.msra.mxu1 %v6654_v10 }
 0x72c   : > { %5157 = vmatprep.subr.bf16.mxu1 %v5877_v51 }
 0x72d   : > { %5168 = vmatpush3.bf16.msra.mxu0 %v5620_v57  ;;  %v5631_v57 = vld [vmem:[#allocation7 + $0x68] sm:$0xff]  }
 0x72e   : > { %5173 = vmatprep.subr.bf16.mxu0 %v5877_v51 }
 0x72f   : > { %5158 = vmatpush3.bf16.msra.mxu1 %v6642_v8 }
 0x730   : > { %5159 = vmatprep.subr.bf16.mxu1 %v5877_v51 }
 0x733   : > { %5160 = vmatpush3.bf16.msra.mxu1 %v6645_v47 }
 0x734   : > { %5185 = vmatprep.subr.bf16.mxu1 %v5877_v51 }
 0x736   : > { %5162 = vmatmul.mubr.msk.bf16.vlgmr.msra.gmra.mxu1 %vm2345_vm4, %v5618_v22 }
 0x737   : > { %5189 = vmatprep.mubr.msk.bf16.mxu1 %vm5878_vm2, %v5877_v51  ;;  %5186 = vmatpush3.bf16.msra.mxu1 %v5622_v43 }
 0x738   : > { %5187 = vmatprep.subr.bf16.mxu1 %v5877_v51 }
 0x73b   : > { %5188 = vmatpush3.bf16.msra.mxu1 %v5623_v26 }
 0x73c   : > { %5193 = vmatprep.subr.bf16.mxu1 %v5877_v51 }
 0x7e6   : > { %v2509_v32 = vpop.f32.mrf.mxu1  ;;  %v2565_v33 = vpop.f32.mrf.mxu0 }
 0x7e7   : > { %v2566_v63 = vadd.f32 %v2565_v33, %v2509_v32  ;;  %v5632_v32 = vld [vmem:[#allocation7 + $0x60] sm:$0xff]  }
 0x7e8   : > { %v5143_v46 = vpop.f32.mrf.mxu1  ;;  %v5151_v16 = vpop.f32.mrf.mxu0 }
 0x7ea   : > { %v2512_v19 = vpop.f32.mrf.mxu1  ;;  %v2568_v29 = vpop.f32.mrf.mxu0 }
 0x7eb   : > { %v2569_v60 = vadd.f32 %v2568_v29, %v2512_v19 }
 0x7ec   : > { %v5144_v35 = vpop.f32.mrf.mxu1  ;;  %v5152_v38 = vpop.f32.mrf.mxu0 }
 0x7f6   : > { %v2617_v39 = vpop.f32.mrf.mxu1 }
 0x7f8   : > { %v5163_v40 = vpop.f32.mrf.mxu1 }
 0x7fa   : > { %v2620_v23 = vpop.f32.mrf.mxu1 }
 0x7fb   : > { %v2624_v41 = vpack.c.bf16 %v2620_v23, %v2617_v39  ;;  %v5633_v23 = vld [vmem:[#allocation5 + $0x38] sm:$0x1f]  }
 0x7fc   : > { %v5164_v3 = vpop.f32.mrf.mxu1 }
 0x7fd   : > { %5170 = vmatmul.mubr.msk.bf16.vlgmr.msra.gmra.mxu0 %vm2471_vm5, %v2624_v41  ;;  %v5634_v41 = vld [vmem:[#allocation7 + $0x78] sm:$0xff]   ;;  %v5635_v3 = vld [vmem:[#allocation7 + $0x70] sm:$0xff]  }
 0x7fe   : > { %5174 = vmatpush3.bf16.msra.mxu0 %v6648_v36  ;;  %5181 = vmatprep.mubr.msk.bf16.mxu0 %vm5878_vm2, %v5877_v51 }
 0x7ff   : > { %5175 = vmatprep.subr.bf16.mxu0 %v5877_v51 }
 0x802   : > { %5176 = vmatpush3.bf16.msra.mxu0 %v6654_v10 }
 0x803   : > { %5177 = vmatprep.subr.bf16.mxu0 %v5877_v51 }
 0x806   : > { %5178 = vmatpush3.bf16.msra.mxu0 %v6642_v8 }
 0x807   : > { %5179 = vmatprep.subr.bf16.mxu0 %v5877_v51 }
 0x80a   : > { %5180 = vmatpush3.bf16.msra.mxu0 %v6645_v47 }
 0x80b   : > { %5205 = vmatprep.subr.bf16.mxu0 %v5877_v51 }
 0x80d   : > { %5182 = vmatmul.mubr.msk.bf16.vlgmr.msra.gmra.mxu0 %vm2345_vm4, %v5621_v42 }
 0x80e   : > { %5209 = vmatprep.mubr.msk.bf16.mxu0 %vm5878_vm2, %v5877_v51  ;;  %5206 = vmatpush3.bf16.msra.mxu0 %v5625_v55 }
 0x80f   : > { %5207 = vmatprep.subr.bf16.mxu0 %v5877_v51 }
 0x812   : > { %5208 = vmatpush3.bf16.msra.mxu0 %v5626_v56 }
 0x813   : > { %5213 = vmatprep.subr.bf16.mxu0 %v5877_v51 }
 0x8bd   : > { %v2679_v44 = vpop.f32.mrf.mxu0 }
 0x8be   : > { %v2686_v45 = vadd.f32 %v2679_v44, %v2566_v63 }
 0x8bf   : > { %v5171_v18 = vpop.f32.mrf.mxu0 }
 0x8c1   : > { %v2682_v21 = vpop.f32.mrf.mxu0 }
 0x8c2   : > { %v2687_v31 = vadd.f32 %v2682_v21, %v2569_v60 }
 0x8c3   : > { %v5172_v48 = vpop.f32.mrf.mxu0 }
 0x8cd   : > { %v2733_v5 = vpop.f32.mrf.mxu0 }
 0x8cf   : > { %v5183_v28 = vpop.f32.mrf.mxu0 }
 0x8d1   : > { %v2736_v30 = vpop.f32.mrf.mxu0 }
 0x8d2   : > { %v2740_v52 = vpack.c.bf16 %v2736_v30, %v2733_v5  ;;  %v5636_v30 = vld [vmem:[#allocation5 + $0x40] sm:$0x1f]  }
 0x8d3   : > { %v5184_v53 = vpop.f32.mrf.mxu0 }
 0x8d4   : > { %5190 = vmatmul.mubr.msk.bf16.vlgmr.msra.gmra.mxu1 %vm2471_vm5, %v2740_v52 }
 0x8d5   : > { %5194 = vmatpush3.bf16.msra.mxu1 %v6648_v36  ;;  %5201 = vmatprep.mubr.msk.bf16.mxu1 %vm5878_vm2, %v5877_v51 }
 0x8d6   : > { %5195 = vmatprep.subr.bf16.mxu1 %v5877_v51 }
 0x8d9   : > { %5196 = vmatpush3.bf16.msra.mxu1 %v6654_v10 }
 0x8da   : > { %5197 = vmatprep.subr.bf16.mxu1 %v5877_v51 }
 0x8dd   : > { %5198 = vmatpush3.bf16.msra.mxu1 %v6642_v8 }
 0x8de   : > { %5199 = vmatprep.subr.bf16.mxu1 %v5877_v51 }
 0x8e1   : > { %5200 = vmatpush3.bf16.msra.mxu1 %v6645_v47 }
 0x8e2   : > { %5225 = vmatprep.subr.bf16.mxu1 %v5877_v51 }
 0x8e4   : > { %5202 = vmatmul.mubr.msk.bf16.vlgmr.msra.gmra.mxu1 %vm2345_vm4, %v5624_v54 }
 0x8e5   : > { %5229 = vmatprep.mubr.msk.bf16.mxu1 %vm5878_vm2, %v5877_v51  ;;  %5226 = vmatpush3.bf16.msra.mxu1 %v5628_v20 }
 0x8e6   : > { %5227 = vmatprep.subr.bf16.mxu1 %v5877_v51 }
 0x8e9   : > { %5228 = vmatpush3.bf16.msra.mxu1 %v5629_v2 }
 0x8ea   : > { %5233 = vmatprep.subr.bf16.mxu1 %v5877_v51 }
 0x994   : > { %v2795_v6 = vpop.f32.mrf.mxu1 }
 0x995   : > { %v2802_v58 = vadd.f32 %v2795_v6, %v2686_v45 }
 0x996   : > { %v5191_v11 = vpop.f32.mrf.mxu1 }
 0x998   : > { %v2798_v12 = vpop.f32.mrf.mxu1 }
 0x999   : > { %v2803_v25 = vadd.f32 %v2798_v12, %v2687_v31  ;;  %v5639_v12 = vld [vmem:[#allocation8 + $0x18] sm:$0xff]  }
 0x99a   : > { %v5192_v7 = vpop.f32.mrf.mxu1 }
 0x9a4   : > { %v2849_v59 = vpop.f32.mrf.mxu1 }
 0x9a6   : > { %v5203_v62 = vpop.f32.mrf.mxu1 }
 0x9a7   : > { %v5642_v62 = vld [vmem:[#allocation8 + $0x30] sm:$0xff]  }
 0x9a8   : > { %v2852_v37 = vpop.f32.mrf.mxu1 }
 0x9a9   : > { %v2856_v0 = vpack.c.bf16 %v2852_v37, %v2849_v59  ;;  %v5641_v59 = vld [vmem:[#allocation8 + $0x10] sm:$0xff]   ;;  %v5643_v37 = vld [vmem:[#allocation8 + $0x8] sm:$0xff]  }
 0x9aa   : > { %v5204_v24 = vpop.f32.mrf.mxu1 }
 0x9ab   : > { %5210 = vmatmul.mubr.msk.bf16.vlgmr.msra.gmra.mxu0 %vm2471_vm5, %v2856_v0  ;;  %v5644_v0 = vld [vmem:[#allocation8 + $0x28] sm:$0xff]   ;;  %v5645_v24 = vld [vmem:[#allocation8] sm:$0xff]  }
 0x9ac   : > { %5214 = vmatpush3.bf16.msra.mxu0 %v6648_v36  ;;  %5221 = vmatprep.mubr.msk.bf16.mxu0 %vm5878_vm2, %v5877_v51 }
 0x9ad   : > { %5215 = vmatprep.subr.bf16.mxu0 %v5877_v51 }
 0x9b0   : > { %5216 = vmatpush3.bf16.msra.mxu0 %v6654_v10 }
 0x9b1   : > { %5217 = vmatprep.subr.bf16.mxu0 %v5877_v51 }
 0x9b4   : > { %5218 = vmatpush3.bf16.msra.mxu0 %v6642_v8 }
 0x9b5   : > { %5219 = vmatprep.subr.bf16.mxu0 %v5877_v51 }
 0x9b8   : > { %5220 = vmatpush3.bf16.msra.mxu0 %v6645_v47 }
 0x9b9   : > { %5245 = vmatprep.subr.bf16.mxu0 %v5877_v51 }
 0x9bb   : > { %5222 = vmatmul.mubr.msk.bf16.vlgmr.msra.gmra.mxu0 %vm2345_vm4, %v5627_v1  ;;  %v5646_v1 = vld [vmem:[#allocation8 + $0x20] sm:$0xff]  }
 0x9bc   : > { %5249 = vmatprep.mubr.msk.bf16.mxu0 %vm5878_vm2, %v5877_v51  ;;  %5246 = vmatpush3.bf16.msra.mxu0 %v5631_v57 }
 0x9bd   : > { %5247 = vmatprep.subr.bf16.mxu0 %v5877_v51 }
 0x9c0   : > { %5248 = vmatpush3.bf16.msra.mxu0 %v5632_v32  ;;  %v5649_v32 = vld [vmem:[#allocation8 + $0x50] sm:$0xff]  }
 0x9c1   : > { %5253 = vmatprep.subr.bf16.mxu0 %v5877_v51 }
 0xa6b   : > { %v2911_v4 = vpop.f32.mrf.mxu0 }
 0xa6c   : > { %v2918_v61 = vadd.f32 %v2911_v4, %v2802_v58  ;;  %v4451_v4 = vld [vmem:[%s6925_s6] ss:$0 sm:$0xff] }
 0xa6d   : > { %v5211_v49 = vpop.f32.mrf.mxu0 }
 0xa6f   : > { %v2914_v34 = vpop.f32.mrf.mxu0 }
 0xa70   : > { %v2919_v50 = vadd.f32 %v2914_v34, %v2803_v25 }
 0xa71   : > { %v5212_v9 = vpop.f32.mrf.mxu0 }
 0xa7b   : > { %v2965_v13 = vpop.f32.mrf.mxu0 }
 0xa7d   : > { %v5223_v14 = vpop.f32.mrf.mxu0 }
 0xa7f   : > { %v2968_v15 = vpop.f32.mrf.mxu0 }
 0xa80   : > { %v2972_v17 = vpack.c.bf16 %v2968_v15, %v2965_v13 }
 0xa81   : > { %v5224_v22 = vpop.f32.mrf.mxu0 }
 0xa82   : > { %5230 = vmatmul.mubr.msk.bf16.vlgmr.msra.gmra.mxu1 %vm2471_vm5, %v2972_v17  ;;  %v5647_v17 = vld [vmem:[#allocation8 + $0x58] sm:$0xff]  }
 0xa83   : > { %5234 = vmatpush3.bf16.msra.mxu1 %v6648_v36  ;;  %5241 = vmatprep.mubr.msk.bf16.mxu1 %vm5878_vm2, %v5877_v51 }
 0xa84   : > { %5235 = vmatprep.subr.bf16.mxu1 %v5877_v51 }
 0xa87   : > { %5236 = vmatpush3.bf16.msra.mxu1 %v6654_v10 }
 0xa88   : > { %5237 = vmatprep.subr.bf16.mxu1 %v5877_v51 }
 0xa8b   : > { %5238 = vmatpush3.bf16.msra.mxu1 %v6642_v8 }
 0xa8c   : > { %5239 = vmatprep.subr.bf16.mxu1 %v5877_v51 }
 0xa8f   : > { %5240 = vmatpush3.bf16.msra.mxu1 %v6645_v47 }
 0xa90   : > { %5265 = vmatprep.subr.bf16.mxu1 %v5877_v51 }
 0xa92   : > { %5242 = vmatmul.mubr.msk.bf16.vlgmr.msra.gmra.mxu1 %vm2345_vm4, %v5630_v27  ;;  %v5648_v27 = vld [vmem:[#allocation8 + $0x78] sm:$0xff]  }
 0xa93   : > { %5269 = vmatprep.mubr.msk.bf16.mxu1 %vm5878_vm2, %v5877_v51  ;;  %5266 = vmatpush3.bf16.msra.mxu1 %v5634_v41  ;;  %v5660_v41 = vld [vmem:[#allocation8 + $0xa8] sm:$0xff]  }
 0xa94   : > { %5267 = vmatprep.subr.bf16.mxu1 %v5877_v51 }
 0xa97   : > { %5268 = vmatpush3.bf16.msra.mxu1 %v5635_v3  ;;  %v5661_v3 = vld [vmem:[#allocation8 + $0x80] sm:$0xff]  }
 0xa98   : > { %5273 = vmatprep.subr.bf16.mxu1 %v5877_v51 }
 0xb42   : > { %v3027_v33 = vpop.f32.mrf.mxu1 }
 0xb43   : > { %v3034_v63 = vadd.f32 %v3027_v33, %v2918_v61  ;;  %v5650_v33 = vld [vmem:[#allocation8 + $0x70] sm:$0xff]  }
 0xb44   : > { %v5231_v46 = vpop.f32.mrf.mxu1 }
 0xb45   : > { %v5652_v46 = vld [vmem:[#allocation8 + $0x68] sm:$0xff]  }
 0xb46   : > { %v3030_v16 = vpop.f32.mrf.mxu1 }
 0xb47   : > { %v3035_v19 = vadd.f32 %v3030_v16, %v2919_v50  ;;  %v5653_v16 = vld [vmem:[#allocation8 + $0x40] sm:$0xff]  }
 0xb48   : > { %v5232_v29 = vpop.f32.mrf.mxu1 }
 0xb49   : > { %v5655_v29 = vld [vmem:[#allocation8 + $0x98] sm:$0xff]  }
 0xb52   : > { %v3081_v60 = vpop.f32.mrf.mxu1 }
 0xb54   : > { %v5243_v35 = vpop.f32.mrf.mxu1 }
 0xb55   : > { %v5656_v35 = vld [vmem:[#allocation8 + $0xb8] sm:$0xff]  }
 0xb56   : > { %v3084_v38 = vpop.f32.mrf.mxu1 }
 0xb57   : > { %v3088_v39 = vpack.c.bf16 %v3084_v38, %v3081_v60 }
 0xb58   : > { %v5244_v40 = vpop.f32.mrf.mxu1 }
 0xb59   : > { %5250 = vmatmul.mubr.msk.bf16.vlgmr.msra.gmra.mxu0 %vm2471_vm5, %v3088_v39  ;;  %v5657_v39 = vld [vmem:[#allocation8 + $0x90] sm:$0xff]  }
 0xb5a   : > { %5254 = vmatpush3.bf16.msra.mxu0 %v6648_v36  ;;  %5261 = vmatprep.mubr.msk.bf16.mxu0 %vm5878_vm2, %v5877_v51  ;;  %v5658_v40 = vld [vmem:[#allocation8 + $0xb0] sm:$0xff]  }
 0xb5b   : > { %5255 = vmatprep.subr.bf16.mxu0 %v5877_v51 }
 0xb5e   : > { %5256 = vmatpush3.bf16.msra.mxu0 %v6654_v10 }
 0xb5f   : > { %5257 = vmatprep.subr.bf16.mxu0 %v5877_v51 }
 0xb62   : > { %5258 = vmatpush3.bf16.msra.mxu0 %v6642_v8 }
 0xb63   : > { %5259 = vmatprep.subr.bf16.mxu0 %v5877_v51 }
 0xb66   : > { %5260 = vmatpush3.bf16.msra.mxu0 %v6645_v47 }
 0xb67   : > { %5285 = vmatprep.subr.bf16.mxu0 %v5877_v51 }
 0xb69   : > { %5262 = vmatmul.mubr.msk.bf16.vlgmr.msra.gmra.mxu0 %vm2345_vm4, %v5633_v23  ;;  %v5659_v23 = vld [vmem:[#allocation8 + $0x88] sm:$0xff]  }
 0xb6a   : > { %5289 = vmatprep.mubr.msk.bf16.mxu0 %vm5878_vm2, %v5877_v51 }
 0xc19   : > { %v3143_v42 = vpop.f32.mrf.mxu0 }
 0xc1a   : > { %v3150_v43 = vadd.f32 %v3143_v42, %v3034_v63  ;;  %v5651_v63 = vld [vmem:[#allocation8 + $0x48] sm:$0xff]   ;;  %v5662_v42 = vld [vmem:[#allocation8 + $0xa0] sm:$0xff]  }
 0xc1b   : > { %v5251_v26 = vpop.f32.mrf.mxu0 }
 0xc1d   : > { %v3146_v44 = vpop.f32.mrf.mxu0 }
 0xc1e   : > { %v3151_v45 = vadd.f32 %v3146_v44, %v3035_v19  ;;  %v5654_v19 = vld [vmem:[#allocation8 + $0x60] sm:$0xff]   ;;  %v5664_v44 = vld [vmem:[#allocation8 + $0xf8] sm:$0xff]  }
 0xc1f   : > { %v5252_v18 = vpop.f32.mrf.mxu0 }
 0xc20   : > { %v5665_v18 = vld [vmem:[#allocation8 + $0xd0] sm:$0xff]  }
 0xc29   : > { %v3197_v21 = vpop.f32.mrf.mxu0 }
 0xc2b   : > { %v5263_v31 = vpop.f32.mrf.mxu0 }
 0xc2c   : > { %v5667_v31 = vld [vmem:[#allocation8 + $0xc8] sm:$0xff]  }
 0xc2d   : > { %v3200_v48 = vpop.f32.mrf.mxu0 }
 0xc2e   : > { %v3204_v5 = vpack.c.bf16 %v3200_v48, %v3197_v21  ;;  %v5666_v21 = vld [vmem:[#allocation8 + $0xf0] sm:$0xff]   ;;  %v5668_v48 = vld [vmem:[#allocation8 + $0xe8] sm:$0xff]  }
 0xc2f   : > { %v5264_v28 = vpop.f32.mrf.mxu0 }
 0xc30   : > { %5270 = vmatmul.mubr.msk.bf16.vlgmr.msra.gmra.mxu1 %vm2471_vm5, %v3204_v5  ;;  %v5669_v5 = vld [vmem:[#allocation8 + $0xc0] sm:$0xff]  }
 0xc31   : > { %5274 = vmatpush3.bf16.msra.mxu1 %v6648_v36  ;;  %5281 = vmatprep.mubr.msk.bf16.mxu1 %vm5878_vm2, %v5877_v51  ;;  %v5637_v36 = vld [vmem:[#allocation7 + $0x88] sm:$0xff]   ;;  %v5670_v28 = vld [vmem:[#allocation8 + $0xe0] sm:$0xff]  }
 0xc32   : > { %5275 = vmatprep.subr.bf16.mxu1 %v5877_v51  ;;  %5286 = vmatpush3.bf16.msra.mxu0 %v5637_v36 }
 0xc33   : > { %5287 = vmatprep.subr.bf16.mxu0 %v5877_v51 }
 0xc35   : > { %5276 = vmatpush3.bf16.msra.mxu1 %v6654_v10  ;;  %v5638_v10 = vld [vmem:[#allocation7 + $0x80] sm:$0xff]  }
 0xc36   : > { %5277 = vmatprep.subr.bf16.mxu1 %v5877_v51  ;;  %5288 = vmatpush3.bf16.msra.mxu0 %v5638_v10 }
 0xc37   : > { %5293 = vmatprep.subr.bf16.mxu0 %v5877_v51 }
 0xc39   : > { %5278 = vmatpush3.bf16.msra.mxu1 %v6642_v8  ;;  %v5640_v8 = vld [vmem:[#allocation8 + $0x38] sm:$0xff]  }
 0xc3a   : > { %5279 = vmatprep.subr.bf16.mxu1 %v5877_v51 }
 0xc3d   : > { %5280 = vmatpush3.bf16.msra.mxu1 %v6645_v47 }
 0xc3e   : > { %5305 = vmatprep.subr.bf16.mxu1 %v5877_v51 }
 0xc40   : > { %5282 = vmatmul.mubr.msk.bf16.vlgmr.msra.gmra.mxu1 %vm2345_vm4, %v5636_v30  ;;  %v5671_v30 = vld [vmem:[#allocation8 + $0x118] sm:$0xff]  }
 0xc41   : > { %5313 = vmatprep.mubr.msk.bf16.mxu1 %vm5878_vm2, %v5877_v51  ;;  %5306 = vmatpush3.bf16.msra.mxu1 %v5640_v8  ;;  %v5672_v8 = vld [vmem:[#allocation8 + $0x110] sm:$0xff]  }
 0xc42   : > { %5307 = vmatprep.subr.bf16.mxu1 %v5877_v51 }
 0xc45   : > { %5308 = vmatpush3.bf16.msra.mxu1 %v5642_v62 }
 0xc46   : > { %5309 = vmatprep.subr.bf16.mxu1 %v5877_v51 }
 0xc49   : > { %5310 = vmatpush3.bf16.msra.mxu1 %v5644_v0 }
 0xc4a   : > { %5311 = vmatprep.subr.bf16.mxu1 %v5877_v51 }
 0xc4d   : > { %5312 = vmatpush3.bf16.msra.mxu1 %v5646_v1 }
 0xc4e   : > { %5329 = vmatprep.subr.bf16.mxu1 %v5877_v51 }
 0xcf0   : > { %v3259_v47 = vpop.f32.mrf.mxu1 }
 0xcf1   : > { %v3266_v52 = vadd.f32 %v3259_v47, %v3150_v43  ;;  %v5663_v43 = vld [vmem:[#allocation8 + $0xd8] sm:$0xff]   ;;  %v5673_v47 = vld [vmem:[#allocation8 + $0x108] sm:$0xff]  }
 0xcf2   : > { %v5271_v53 = vpop.f32.mrf.mxu1 }
 0xcf4   : > { %v3262_v54 = vpop.f32.mrf.mxu1 }
 0xcf5   : > { %v3267_v55 = vadd.f32 %v3262_v54, %v3151_v45 }
 0xcf6   : > { %v5272_v56 = vpop.f32.mrf.mxu1 }
 0xd00   : > { %v3313_v6 = vpop.f32.mrf.mxu1 }
 0xd02   : > { %v5283_v58 = vpop.f32.mrf.mxu1 }
 0xd04   : > { %v3316_v11 = vpop.f32.mrf.mxu1 }
 0xd05   : > { %v3320_v25 = vpack.c.bf16 %v3316_v11, %v3313_v6 }
 0xd06   : > { %v5284_v7 = vpop.f32.mrf.mxu1 }
 0xd07   : > { %5290 = vmatmul.mubr.msk.bf16.vlgmr.msra.gmra.mxu0 %vm2471_vm5, %v3320_v25 }
 0xd08   : > { %5294 = vmatpush3.bf16.msra.mxu0 %v5639_v12  ;;  %5301 = vmatprep.mubr.msk.bf16.mxu0 %vm5878_vm2, %v5877_v51 }
 0xd09   : > { %5295 = vmatprep.subr.bf16.mxu0 %v5877_v51 }
 0xd0c   : > { %5296 = vmatpush3.bf16.msra.mxu0 %v5641_v59 }
 0xd0d   : > { %5297 = vmatprep.subr.bf16.mxu0 %v5877_v51 }
 0xd10   : > { %5298 = vmatpush3.bf16.msra.mxu0 %v5643_v37 }
 0xd11   : > { %5299 = vmatprep.subr.bf16.mxu0 %v5877_v51 }
 0xd14   : > { %5300 = vmatpush3.bf16.msra.mxu0 %v5645_v24 }
 0xd15   : > { %5317 = vmatprep.subr.bf16.mxu0 %v5877_v51 }
 0xdc7   : > { %v3375_v20 = vpop.f32.mrf.mxu0 }
 0xdc8   : > { %v3382_v2 = vadd.f32 %v3375_v20, %v3266_v52  ;;  %v5674_v52 = vld [vmem:[#allocation8 + $0x100] sm:$0xff]  }
 0xdc9   : > { %v5291_v61 = vpop.f32.mrf.mxu0 }
 0xdca   : > { %v3391_v34 = vadd.f32 %v4451_v4, %v3382_v2 }
 0xdcb   : > { %v3378_v49 = vpop.f32.mrf.mxu0 }
 0xdcc   : > { %v3383_v50 = vadd.f32 %v3378_v49, %v3267_v55  ;;  %v3393_v14 = vmax.f32 %v3391_v34, 0.0  ;;  %v3396_v34 = vld [vmem:[%s6927_s8] sm:$0x1] }
 0xdcd   : > { %v5292_v9 = vpop.f32.mrf.mxu0 }
 0xdce   : > { %v3392_v13 = vadd.f32 %v4451_v4, %v3383_v50 }
 0xdd0   : > { %v3394_v15 = vmax.f32 %v3392_v13, 0.0 }
 0xdd2   : > { %v6807_v22 = vpack.c.bf16 %v3394_v15, %v3393_v14 }
 0xdd4   : > { %5302 = vmatmul.mubr.msk.bf16.vlgmr.msra.gmra.mxu0 %vm3429_vm6, %v6807_v22  ;;  %v6812_v57 = vshrl.u32 %v6807_v22, 16  ;;  %v3563_v60 = vrot.slane %v6807_v22, 1  ;;  %v3719_v26 = vrot.slane %v6807_v22, 2  ;;  %v3875_v36 = vrot.slane %v6807_v22, 3 }
 0xdd5   : > { %5318 = vmatpush3.bf16.msra.mxu0 %v5647_v17  ;;  %5325 = vmatprep.mubr.msk.bf16.mxu0 %vm5878_vm2, %v5877_v51  ;;  %v4031_v53 = vrot.slane %v6807_v22, 4 }
 0xdd6   : > { %5314 = vmatmul.mubr.msk.bf16.vlgmr.msra.gmra.mxu1 %vm3429_vm6, %v6812_v57  ;;  %5319 = vmatprep.subr.bf16.mxu0 %v5877_v51  ;;  %v3641_v38 = vrot.slane %v6812_v57, 1  ;;  %v3797_v45 = vrot.slane %v6812_v57, 2  ;;  %v3953_v10 = vrot.slane %v6812_v57, 3 }
 0xdd7   : > { %5330 = vmatpush3.bf16.msra.mxu1 %v5648_v27  ;;  %5337 = vmatprep.mubr.msk.bf16.mxu1 %vm5878_vm2, %v5877_v51 }
 0xdd8   : > { %5331 = vmatprep.subr.bf16.mxu1 %v5877_v51 }
 0xdd9   : > { %5320 = vmatpush3.bf16.msra.mxu0 %v5649_v32 }
 0xdda   : > { %5321 = vmatprep.subr.bf16.mxu0 %v5877_v51 }
 0xddb   : > { %5332 = vmatpush3.bf16.msra.mxu1 %v5650_v33 }
 0xddc   : > { %5333 = vmatprep.subr.bf16.mxu1 %v5877_v51 }
 0xddd   : > { %5322 = vmatpush3.bf16.msra.mxu0 %v5651_v63 }
 0xdde   : > { %5323 = vmatprep.subr.bf16.mxu0 %v5877_v51 }
 0xddf   : > { %5334 = vmatpush3.bf16.msra.mxu1 %v5652_v46 }
 0xde0   : > { %5335 = vmatprep.subr.bf16.mxu1 %v5877_v51 }
 0xde1   : > { %5324 = vmatpush3.bf16.msra.mxu0 %v5653_v16 }
 0xde2   : > { %5341 = vmatprep.subr.bf16.mxu0 %v5877_v51 }
 0xde3   : > { %5336 = vmatpush3.bf16.msra.mxu1 %v5654_v19 }
 0xde4   : > { %5326 = vmatmul.mubr.msk.bf16.vlgmr.msra.gmra.mxu0 %vm3429_vm6, %v3563_v60  ;;  %5353 = vmatprep.subr.bf16.mxu1 %v5877_v51 }
 0xde5   : > { %5342 = vmatpush3.bf16.msra.mxu0 %v5655_v29  ;;  %5349 = vmatprep.mubr.msk.bf16.mxu0 %vm5878_vm2, %v5877_v51 }
 0xde6   : > { %5338 = vmatmul.mubr.msk.bf16.vlgmr.msra.gmra.mxu1 %vm3429_vm6, %v3641_v38  ;;  %5343 = vmatprep.subr.bf16.mxu0 %v5877_v51 }
 0xde7   : > { %5354 = vmatpush3.bf16.msra.mxu1 %v5656_v35  ;;  %5361 = vmatprep.mubr.msk.bf16.mxu1 %vm5878_vm2, %v5877_v51 }
 0xde8   : > { %5355 = vmatprep.subr.bf16.mxu1 %v5877_v51 }
 0xde9   : > { %5344 = vmatpush3.bf16.msra.mxu0 %v5657_v39 }
 0xdea   : > { %5345 = vmatprep.subr.bf16.mxu0 %v5877_v51 }
 0xdeb   : > { %5356 = vmatpush3.bf16.msra.mxu1 %v5658_v40 }
 0xdec   : > { %5357 = vmatprep.subr.bf16.mxu1 %v5877_v51 }
 0xded   : > { %5346 = vmatpush3.bf16.msra.mxu0 %v5659_v23 }
 0xdee   : > { %5347 = vmatprep.subr.bf16.mxu0 %v5877_v51 }
 0xdef   : > { %5358 = vmatpush3.bf16.msra.mxu1 %v5660_v41 }
 0xdf0   : > { %5359 = vmatprep.subr.bf16.mxu1 %v5877_v51 }
 0xdf1   : > { %5348 = vmatpush3.bf16.msra.mxu0 %v5661_v3 }
 0xdf2   : > { %5365 = vmatprep.subr.bf16.mxu0 %v5877_v51 }
 0xdf3   : > { %5360 = vmatpush3.bf16.msra.mxu1 %v5662_v42 }
 0xdf4   : > { %5350 = vmatmul.mubr.msk.bf16.vlgmr.msra.gmra.mxu0 %vm3429_vm6, %v3719_v26  ;;  %5377 = vmatprep.subr.bf16.mxu1 %v5877_v51 }
 0xdf5   : > { %5366 = vmatpush3.bf16.msra.mxu0 %v5663_v43  ;;  %5373 = vmatprep.mubr.msk.bf16.mxu0 %vm5878_vm2, %v5877_v51 }
 0xdf6   : > { %5362 = vmatmul.mubr.msk.bf16.vlgmr.msra.gmra.mxu1 %vm3429_vm6, %v3797_v45  ;;  %5367 = vmatprep.subr.bf16.mxu0 %v5877_v51 }
 0xdf7   : > { %5378 = vmatpush3.bf16.msra.mxu1 %v5664_v44  ;;  %5385 = vmatprep.mubr.msk.bf16.mxu1 %vm5878_vm2, %v5877_v51 }
 0xdf8   : > { %5379 = vmatprep.subr.bf16.mxu1 %v5877_v51 }
 0xdf9   : > { %5368 = vmatpush3.bf16.msra.mxu0 %v5665_v18 }
 0xdfa   : > { %5369 = vmatprep.subr.bf16.mxu0 %v5877_v51 }
 0xdfb   : > { %5380 = vmatpush3.bf16.msra.mxu1 %v5666_v21 }
 0xdfc   : > { %5381 = vmatprep.subr.bf16.mxu1 %v5877_v51 }
 0xdfd   : > { %5370 = vmatpush3.bf16.msra.mxu0 %v5667_v31 }
 0xdfe   : > { %5371 = vmatprep.subr.bf16.mxu0 %v5877_v51 }
 0xdff   : > { %5382 = vmatpush3.bf16.msra.mxu1 %v5668_v48 }
 0xe00   : > { %5383 = vmatprep.subr.bf16.mxu1 %v5877_v51 }
 0xe01   : > { %5372 = vmatpush3.bf16.msra.mxu0 %v5669_v5 }
 0xe02   : > { %5389 = vmatprep.subr.bf16.mxu0 %v5877_v51 }
 0xe03   : > { %5384 = vmatpush3.bf16.msra.mxu1 %v5670_v28 }
 0xe04   : > { %5374 = vmatmul.mubr.msk.bf16.vlgmr.msra.gmra.mxu0 %vm3429_vm6, %v3875_v36 }
 0xe05   : > { %5390 = vmatpush3.bf16.msra.mxu0 %v5671_v30  ;;  %5397 = vmatprep.mubr.msk.bf16.mxu0 %vm5878_vm2, %v5877_v51 }
 0xe06   : > { %5386 = vmatmul.mubr.msk.bf16.vlgmr.msra.gmra.mxu1 %vm3429_vm6, %v3953_v10  ;;  %5391 = vmatprep.subr.bf16.mxu0 %v5877_v51 }
 0xe09   : > { %5392 = vmatpush3.bf16.msra.mxu0 %v5672_v8 }
 0xe0a   : > { %5393 = vmatprep.subr.bf16.mxu0 %v5877_v51 }
 0xe0d   : > { %5394 = vmatpush3.bf16.msra.mxu0 %v5673_v47 }
 0xe0e   : > { %5395 = vmatprep.subr.bf16.mxu0 %v5877_v51 }
 0xe11   : > { %5396 = vmatpush3.bf16.msra.mxu0 %v5674_v52 }
 0xe14   : > { %5398 = vmatmul.mubr.msk.bf16.vlgmr.msra.gmra.mxu0 %vm3429_vm6, %v4031_v53 }
 0xe94   : > { %v3467_v54 = vpop.f32.mrf.mxu0 }
 0xe95   : > { %v3473_v14 = vadd.f32 %v3467_v54, %v3396_v34 }
 0xe96   : > { %v5303_v55 = vpop.f32.mrf.mxu0  ;;  %v3546_v56 = vpop.f32.mrf.mxu1 }
 0xe97   : > { %v3552_v15 = vadd.f32 %v3546_v56, %v3473_v14 }
 0xe98   : > { %v3470_v6 = vpop.f32.mrf.mxu0  ;;  %v5315_v58 = vpop.f32.mrf.mxu1 }
 0xe9a   : > { %v5304_v11 = vpop.f32.mrf.mxu0  ;;  %v3549_v12 = vpop.f32.mrf.mxu1 }
 0xe9c   : > { %v5316_v25 = vpop.f32.mrf.mxu1 }
 0xea4   : > { %v3625_v7 = vpop.f32.mrf.mxu0 }
 0xea5   : > { %v3631_v17 = vadd.f32 %v3625_v7, %v3552_v15 }
 0xea6   : > { %v5327_v59 = vpop.f32.mrf.mxu0  ;;  %v3703_v62 = vpop.f32.mrf.mxu1 }
 0xea7   : > { %v3709_v32 = vadd.f32 %v3703_v62, %v3631_v17 }
 0xea8   : > { %v3628_v37 = vpop.f32.mrf.mxu0  ;;  %v5339_v0 = vpop.f32.mrf.mxu1 }
 0xeaa   : > { %v5328_v24 = vpop.f32.mrf.mxu0  ;;  %v3706_v51 = vpop.f32.mrf.mxu1 }
 0xeac   : > { %v5340_v1 = vpop.f32.mrf.mxu1 }
 0xeb4   : > { %v3781_v20 = vpop.f32.mrf.mxu0 }
 0xeb5   : > { %v3787_v46 = vadd.f32 %v3781_v20, %v3709_v32 }
 0xeb6   : > { %v5351_v2 = vpop.f32.mrf.mxu0  ;;  %v3859_v4 = vpop.f32.mrf.mxu1 }
 0xeb7   : > { %v3865_v60 = vadd.f32 %v3859_v4, %v3787_v46 }
 0xeb8   : > { %v3784_v61 = vpop.f32.mrf.mxu0  ;;  %v5363_v49 = vpop.f32.mrf.mxu1 }
 0xeba   : > { %v5352_v50 = vpop.f32.mrf.mxu0  ;;  %v3862_v9 = vpop.f32.mrf.mxu1 }
 0xebc   : > { %v5364_v13 = vpop.f32.mrf.mxu1 }
 0xec4   : > { %v3937_v22 = vpop.f32.mrf.mxu0 }
 0xec5   : > { %v3943_v35 = vadd.f32 %v3937_v22, %v3865_v60 }
 0xec6   : > { %v5375_v27 = vpop.f32.mrf.mxu0  ;;  %v4015_v57 = vpop.f32.mrf.mxu1 }
 0xec7   : > { %v4021_v38 = vadd.f32 %v4015_v57, %v3943_v35 }
 0xec8   : > { %v3940_v33 = vpop.f32.mrf.mxu0  ;;  %v5387_v63 = vpop.f32.mrf.mxu1 }
 0xeca   : > { %v5376_v16 = vpop.f32.mrf.mxu0  ;;  %v4018_v19 = vpop.f32.mrf.mxu1 }
 0xecc   : > { %v5388_v29 = vpop.f32.mrf.mxu1 }
 0xed4   : > { %v4093_v39 = vpop.f32.mrf.mxu0 }
 0xed5   : > { %v4099_v40 = vadd.f32 %v4093_v39, %v4021_v38 }
 0xed6   : > { %v5399_v23 = vpop.f32.mrf.mxu0 }
 0xed7   : > { %4101 = vst.msk [vmem:[%s383_s24] sm:$0x1] %vm4100_vm7, %v4099_v40 }
 0xed8   : > { %v4096_v41 = vpop.f32.mrf.mxu0 }
 0xed9   : > { %5808 = shalt.err (!%p5805_p3)
}
 0xeda   : > { %s5809_s14 = scalar_lea.hbm %s6878_s18, 16  ;;  %s5813_s21 = scalar_lea.hbm %s6928_s9, 32 }
 0xedb   : > { %p5810_p9 = scmp.ne.s32.totalorder %s6878_s18, %s5809_s14  ;;  %p5814_p12 = scmp.lt.s32.totalorder %s6878_s18, %s6928_s9 }
 0xedc   : > { %p5815_p10 = scmp.lt.s32.totalorder %s5813_s21, %s5809_s14 }
 0xedd   : > { %p5811_p4 = pnand %p5810_p9, %p5969_p5 }
 0xede   : > { %p5816_p8 = por %p5815_p10, %p5814_p12 }
 0xedf   : > { %p5812_p7 = pneg %p5811_p4 }
 0xee1   : > { %p5817_p11 = pnand %p5816_p8, %p5812_p7 }
 0xee3   : > { %5820 = shalt.err (!%p5817_p11)
}
 0xee4   : > { %5426 = dma.vmem_to_hbm [thread:$0]  (%p5969_p5), %s6880_s28, 16, %s6878_s18, %s4103_s13   ;;  %v5400_v3 = vpop.f32.mrf.mxu0 }
 0xee5 PF: > { %p5453_p1 = scmp.ge.s32.totalorder %s5867_s12, 2  ;;  %s4127_s16 = sand.u32 1, %s5855_s30  }
 0xee6   : > { %s4128_s26 = scalar_lea.sflag [#allocation4], %s4127_s16 }
 0xee7   : > { %p5442_p0 = pnand %p5453_p1, %p5973_p6 }
 0xee9   : > { %p5443_p2 = pneg %p5442_p0 }
 0xeeb   : > { %5850 = dma.done.wait (%p5443_p2), %s4128_s26, 16  }
 0xeec   : > { %5852 = vsyncadd (%p5443_p2), %s4128_s26, 4294967280  ;;  %s6947_s19 = sld [smem:[#allocation15_spill]]  ;;  %p22_p13 = scmp.ge.s32.totalorder %s5956_s15, 4  }
 0xeed   : > { %s6948_s30 = smov %s5859_s10  ;;  %s6949_s10 = smov %s5863_s11 }
 0xeee   : > { %s6951_s12 = smov %s5956_s15  ;;  %24 = sbr.rel (!%p22_p13) target bundleno = 6 (0x6), region = 148 }
 0xef2   : > { %s6950_s11 = smov %s6947_s19 }
 0xef3   :  { %4132 = vsyncpa [#allocation3], 1 }
 0xef4   :  { %4134 = vsyncpa [#allocation3 + $0x1], 1 }
 0xef5   :  { %4135 = vsyncpa [#allocation6], 1 }
 0xef6   :  { %4136 = vsyncpa [#allocation9], 1 }
 0xef7   :  { %4137 = vsyncpa [#allocation4], 1 }
 0xef8   :  { %4139 = vsyncpa [#allocation4 + $0x1], 1 }

</bundles_post_ra>
